<compile_context>
chip_gen: v5e
topology: v5e:2x2
jax: 0.10.0
libtpu: 0.0.40
codegen_flags: <defaults>
</compile_context>

<pallas_src>
import functools

import jax
import jax.numpy as jnp
from jax.experimental import pallas as pl
from jax.experimental.pallas import tpu as pltpu


# ----------------------------------------------------------------------------
# Fused kernel: 4 dilated 3x3 convs (im2col + one wide-K matmul) + channel
# attention + residual, one image per grid step, lane-dense (C, H*W) layout.
# ----------------------------------------------------------------------------
def _aspp_fused_kernel(xp_ref, x_ref, wbig_ref, bconv_ref,
                       w1_ref, b1_ref, w2_ref, b2_ref, o_ref,
                       *, dilations, d_max, H, W):
    HW = H * W
    C = xp_ref.shape[-1]

    xp = xp_ref[0].astype(jnp.float32)                        # (Hp, Wp, C)

    # Build im2col: rows ordered (branch, ky, kx, ci); columns = H*W (lanes).
    pieces = []
    for d in dilations:                                       # static unroll
        off = d_max - d
        for ky in range(3):
            for kx in range(3):
                oy = off + ky * d
                ox = off + kx * d
                patch = xp[oy:oy + H, ox:ox + W, :]           # (H, W, Cin)
                pieces.append(patch.reshape(HW, C).T)         # (Cin, H*W)
    im2col = jnp.concatenate(pieces, axis=0)                  # (nb*9*Cin, H*W)

    # Single wide-K MXU matmul with the block-diagonal fused conv weight.
    f = jnp.dot(wbig_ref[...], im2col,
                preferred_element_type=jnp.float32)           # (Ctot, H*W)
    f = f + bconv_ref[...]                                    # (Ctot,1) bcast

    # Channel attention on VPU/XLU (global mean pool -> 1x1 -> ReLU -> 1x1
    # -> sigmoid); the matrices are tiny, so no MXU round-trip.
    pooled = jnp.sum(f, axis=1, keepdims=True) * (1.0 / HW)   # (Ctot, 1)
    h = jnp.sum(pooled * w1_ref[...], axis=0, keepdims=True) + b1_ref[...]
    h = jnp.maximum(h, 0.0)                                   # (1, Cmid)
    ca = jax.nn.sigmoid(
        jnp.sum(w2_ref[...] * h, axis=1, keepdims=True) + b2_ref[...])  # (Ctot,1)

    # Residual, fully lane-dense.
    out = x_ref[0].astype(jnp.float32) + f * ca               # (C, H*W)
    o_ref[0] = out.astype(o_ref.dtype)


# ----------------------------------------------------------------------------
# Parameter repacking (PyTorch layouts -> fused kernel layouts), done once.
# ----------------------------------------------------------------------------
def prepare_kernel_params(params):
    blocks, biases, dils = [], [], []
    cin = params["branches"][0][0].shape[2]
    for (w_hwio, b, d) in params["branches"]:                 # w_hwio: (3,3,Cin,Cout)
        kh, kw, ci, cout = w_hwio.shape
        blocks.append(w_hwio.reshape(kh * kw * ci, cout).T)   # (Cout, 9*Cin)
        biases.append(b.reshape(cout))
        dils.append(int(d))
    nb = len(blocks)
    ctot = sum(blk.shape[0] for blk in blocks)
    w_big = jnp.zeros((ctot, nb * 9 * cin), jnp.float32)      # block-diagonal
    row = 0
    for i, blk in enumerate(blocks):
        cout = blk.shape[0]
        w_big = w_big.at[row:row + cout, i * 9 * cin:(i + 1) * 9 * cin].set(blk)
        row += cout
    kparams = dict(
        w_big=w_big,                                          # (Ctot, nb*9*Cin)
        b_conv=jnp.concatenate(biases).reshape(ctot, 1),      # (Ctot, 1)
        ca_w1=params["ca_w1"],                                # (C, Cmid)
        ca_b1=params["ca_b1"],                                # (1, Cmid)
        ca_w2=params["ca_w2"].T,                              # (C, Cmid)
        ca_b2=params["ca_b2"].reshape(-1, 1),                 # (C, 1)
    )
    return kparams, tuple(dils)


# ----------------------------------------------------------------------------
# Forward wrapper (pad once, free reshapes, one pallas_call).
# ----------------------------------------------------------------------------
@functools.partial(jax.jit, static_argnames=("dilations",))
def aspp_forward(x_nchw, kparams, dilations):
    N, C, H, W = x_nchw.shape
    d_max = max(dilations)
    assert d_max < H and d_max < W, "pad-once-by-d_max requires d_max < H, W"
    HW = H * W
    Hp, Wp = H + 2 * d_max, W + 2 * d_max

    x_nhwc = jnp.transpose(x_nchw, (0, 2, 3, 1))
    xp = jnp.pad(x_nhwc, ((0, 0), (d_max, d_max), (d_max, d_max), (0, 0)),
                 mode="reflect")                              # (N, Hp, Wp, C)
    x_flat = x_nchw.reshape(N, C, HW)                         # lane-dense residual

    w_big, b_conv = kparams["w_big"], kparams["b_conv"]
    w1, b1 = kparams["ca_w1"], kparams["ca_b1"]
    w2, b2 = kparams["ca_w2"], kparams["ca_b2"]
    ctot, kcols = w_big.shape
    cmid = w1.shape[1]
    assert ctot == C

    kernel = functools.partial(_aspp_fused_kernel, dilations=dilations,
                               d_max=d_max, H=H, W=W)
    out_flat = pl.pallas_call(
        kernel,
        out_shape=jax.ShapeDtypeStruct((N, ctot, HW), x_nchw.dtype),
        grid=(N,),
        in_specs=[
            pl.BlockSpec((1, Hp, Wp, C), lambda n: (n, 0, 0, 0)),   # padded image
            pl.BlockSpec((1, C, HW), lambda n: (n, 0, 0)),          # residual input
            pl.BlockSpec((ctot, kcols), lambda n: (0, 0)),          # fused conv W
            pl.BlockSpec((ctot, 1), lambda n: (0, 0)),              # fused conv b
            pl.BlockSpec((C, cmid), lambda n: (0, 0)),              # CA w1
            pl.BlockSpec((1, cmid), lambda n: (0, 0)),              # CA b1
            pl.BlockSpec((ctot, cmid), lambda n: (0, 0)),           # CA w2 (C,Cmid)
            pl.BlockSpec((ctot, 1), lambda n: (0, 0)),              # CA b2
        ],
        out_specs=pl.BlockSpec((1, ctot, HW), lambda n: (n, 0, 0)),
        compiler_params=pltpu.CompilerParams(
            dimension_semantics=("parallel",)),
    )(xp, x_flat, w_big, b_conv, w1, b1, w2, b2)
    return out_flat.reshape(N, ctot, H, W)                    # free reshape -> NCHW


# ----------------------------------------------------------------------------
# Deterministic synthetic parameter init (PyTorch shapes -> HWIO etc.).
# ----------------------------------------------------------------------------
def init_params(key, C):
    c4 = C // 4
    couts = [c4, c4, c4, C - 3 * c4]
    dils = [1, 2, 4, 8]
    cmid = C // 16
    keys = jax.random.split(key, 12)
    scale = 0.1
    branches = []
    for i, (cout, d) in enumerate(zip(couts, dils)):
        w_oihw = jax.random.normal(keys[2 * i], (cout, C, 3, 3), jnp.float32) * scale
        b = jax.random.normal(keys[2 * i + 1], (cout,), jnp.float32) * scale
        w_hwio = jnp.transpose(w_oihw, (2, 3, 1, 0))          # OIHW -> HWIO
        branches.append((w_hwio, b.reshape(1, cout), d))
    w1_oihw = jax.random.normal(keys[8], (cmid, C, 1, 1), jnp.float32) * scale
    b1 = jax.random.normal(keys[9], (cmid,), jnp.float32) * scale
    w2_oihw = jax.random.normal(keys[10], (C, cmid, 1, 1), jnp.float32) * scale
    b2 = jax.random.normal(keys[11], (C,), jnp.float32) * scale
    return dict(
        branches=branches,
        ca_w1=jnp.transpose(w1_oihw[:, :, 0, 0], (1, 0)),     # (C, Cmid)
        ca_b1=b1.reshape(1, cmid),
        ca_w2=jnp.transpose(w2_oihw[:, :, 0, 0], (1, 0)),     # (Cmid, C)
        ca_b2=b2.reshape(1, C),
    )


# ----------------------------------------------------------------------------
# Pure-JAX reference (numerical sanity check).
# ----------------------------------------------------------------------------
def aspp_ref(x_nchw, params):
    x = jnp.transpose(x_nchw, (0, 2, 3, 1))
    outs = []
    for (w, b, d) in params["branches"]:
        xp = jnp.pad(x, ((0, 0), (d, d), (d, d), (0, 0)), mode="reflect")
        y = jax.lax.conv_general_dilated(
            xp, w, window_strides=(1, 1), padding="VALID", rhs_dilation=(d, d),
            dimension_numbers=("NHWC", "HWIO", "NHWC"))
        outs.append(y + b.reshape(1, 1, 1, -1))
    f = jnp.concatenate(outs, axis=-1)
    pooled = jnp.mean(f, axis=(1, 2))                         # (N, C)
    h = jnp.maximum(pooled @ params["ca_w1"] + params["ca_b1"], 0.0)
    ca = jax.nn.sigmoid(h @ params["ca_w2"] + params["ca_b2"])
    out = x + f * ca[:, None, None, :]
    return jnp.transpose(out, (0, 3, 1, 2))


if __name__ == "__main__":
    key = jax.random.PRNGKey(0)
    kx_, kp_ = jax.random.split(key)
    N, C, H, W = 2, 16, 16, 16          # C=16 so that C//16 >= 1 (as in PyTorch)
    x = jax.random.normal(kx_, (N, C, H, W), jnp.float32)
    params = init_params(kp_, C)
    kparams, dils = prepare_kernel_params(params)

    out = aspp_forward(x, kparams, dils)
    out = jax.block_until_ready(out)

    ref = jax.block_until_ready(aspp_ref(x, params))
    assert out.shape == (N, C, H, W)
    err = float(jnp.max(jnp.abs(out - ref)))
    assert err < 1e-3, f"mismatch vs pure-JAX reference: {err}"

    print("KERNEL_OK")
</pallas_src>

<mosaic_0001>
module attributes {stable_mosaic.version = 11 : i64} {
  func.func @_aspp_fused_kernel(%arg0: i32, %arg1: memref<1x32x32x16xf32, #tpu.memory_space<vmem>>, %arg2: memref<1x16x256xf32, #tpu.memory_space<vmem>>, %arg3: memref<16x576xf32, #tpu.memory_space<vmem>>, %arg4: memref<16x1xf32, #tpu.memory_space<vmem>>, %arg5: memref<16x1xf32, #tpu.memory_space<vmem>>, %arg6: memref<1x1xf32, #tpu.memory_space<vmem>>, %arg7: memref<16x1xf32, #tpu.memory_space<vmem>>, %arg8: memref<16x1xf32, #tpu.memory_space<vmem>>, %arg9: memref<1x16x256xf32, #tpu.memory_space<vmem>>) attributes {dimension_semantics = [#tpu.dimension_semantics<parallel>], iteration_bounds = array<i64: 2>, scalar_prefetch = 0 : i64, scratch_operands = 0 : i64, tpu.core_type = #tpu.core_type<tc>, window_params = [{transform_indices = @transform_0, window_bounds = array<i64: 1, 32, 32, 16>}, {transform_indices = @transform_1, window_bounds = array<i64: 1, 16, 256>}, {pipeline_mode = #tpu.pipeline_mode<synchronous>, transform_indices = @transform_2, window_bounds = array<i64: 16, 576>}, {pipeline_mode = #tpu.pipeline_mode<synchronous>, transform_indices = @transform_3, window_bounds = array<i64: 16, 1>}, {pipeline_mode = #tpu.pipeline_mode<synchronous>, transform_indices = @transform_4, window_bounds = array<i64: 16, 1>}, {pipeline_mode = #tpu.pipeline_mode<synchronous>, transform_indices = @transform_5, window_bounds = array<i64: 1, 1>}, {pipeline_mode = #tpu.pipeline_mode<synchronous>, transform_indices = @transform_6, window_bounds = array<i64: 16, 1>}, {pipeline_mode = #tpu.pipeline_mode<synchronous>, transform_indices = @transform_7, window_bounds = array<i64: 16, 1>}, {transform_indices = @transform_8, window_bounds = array<i64: 1, 16, 256>}]} {
    %c0 = arith.constant 0 : index
    %c0_0 = arith.constant 0 : index
    %c0_1 = arith.constant 0 : index
    %c0_2 = arith.constant 0 : index
    %0 = vector.load %arg1[%c0, %c0_0, %c0_1, %c0_2] : memref<1x32x32x16xf32, #tpu.memory_space<vmem>>, vector<1x32x32x16xf32>
    %1 = vector.shape_cast %0 : vector<1x32x32x16xf32> to vector<32x32x16xf32>
    %2 = vector.extract_strided_slice %1 {offsets = [7, 7, 0], sizes = [16, 16, 16], strides = [1, 1, 1]} : vector<32x32x16xf32> to vector<16x16x16xf32>
    %3 = vector.shape_cast %2 : vector<16x16x16xf32> to vector<256x16xf32>
    %4 = tpu.transpose %3, [1, 0] : vector<256x16xf32> -> vector<16x256xf32>
    %5 = vector.extract_strided_slice %1 {offsets = [7, 8, 0], sizes = [16, 16, 16], strides = [1, 1, 1]} : vector<32x32x16xf32> to vector<16x16x16xf32>
    %6 = vector.shape_cast %5 : vector<16x16x16xf32> to vector<256x16xf32>
    %7 = tpu.transpose %6, [1, 0] : vector<256x16xf32> -> vector<16x256xf32>
    %8 = vector.extract_strided_slice %1 {offsets = [7, 9, 0], sizes = [16, 16, 16], strides = [1, 1, 1]} : vector<32x32x16xf32> to vector<16x16x16xf32>
    %9 = vector.shape_cast %8 : vector<16x16x16xf32> to vector<256x16xf32>
    %10 = tpu.transpose %9, [1, 0] : vector<256x16xf32> -> vector<16x256xf32>
    %11 = vector.extract_strided_slice %1 {offsets = [8, 7, 0], sizes = [16, 16, 16], strides = [1, 1, 1]} : vector<32x32x16xf32> to vector<16x16x16xf32>
    %12 = vector.shape_cast %11 : vector<16x16x16xf32> to vector<256x16xf32>
    %13 = tpu.transpose %12, [1, 0] : vector<256x16xf32> -> vector<16x256xf32>
    %14 = vector.extract_strided_slice %1 {offsets = [8, 8, 0], sizes = [16, 16, 16], strides = [1, 1, 1]} : vector<32x32x16xf32> to vector<16x16x16xf32>
    %15 = vector.shape_cast %14 : vector<16x16x16xf32> to vector<256x16xf32>
    %16 = tpu.transpose %15, [1, 0] : vector<256x16xf32> -> vector<16x256xf32>
    %17 = vector.extract_strided_slice %1 {offsets = [8, 9, 0], sizes = [16, 16, 16], strides = [1, 1, 1]} : vector<32x32x16xf32> to vector<16x16x16xf32>
    %18 = vector.shape_cast %17 : vector<16x16x16xf32> to vector<256x16xf32>
    %19 = tpu.transpose %18, [1, 0] : vector<256x16xf32> -> vector<16x256xf32>
    %20 = vector.extract_strided_slice %1 {offsets = [9, 7, 0], sizes = [16, 16, 16], strides = [1, 1, 1]} : vector<32x32x16xf32> to vector<16x16x16xf32>
    %21 = vector.shape_cast %20 : vector<16x16x16xf32> to vector<256x16xf32>
    %22 = tpu.transpose %21, [1, 0] : vector<256x16xf32> -> vector<16x256xf32>
    %23 = vector.extract_strided_slice %1 {offsets = [9, 8, 0], sizes = [16, 16, 16], strides = [1, 1, 1]} : vector<32x32x16xf32> to vector<16x16x16xf32>
    %24 = vector.shape_cast %23 : vector<16x16x16xf32> to vector<256x16xf32>
    %25 = tpu.transpose %24, [1, 0] : vector<256x16xf32> -> vector<16x256xf32>
    %26 = vector.extract_strided_slice %1 {offsets = [9, 9, 0], sizes = [16, 16, 16], strides = [1, 1, 1]} : vector<32x32x16xf32> to vector<16x16x16xf32>
    %27 = vector.shape_cast %26 : vector<16x16x16xf32> to vector<256x16xf32>
    %28 = tpu.transpose %27, [1, 0] : vector<256x16xf32> -> vector<16x256xf32>
    %29 = vector.extract_strided_slice %1 {offsets = [6, 6, 0], sizes = [16, 16, 16], strides = [1, 1, 1]} : vector<32x32x16xf32> to vector<16x16x16xf32>
    %30 = vector.shape_cast %29 : vector<16x16x16xf32> to vector<256x16xf32>
    %31 = tpu.transpose %30, [1, 0] : vector<256x16xf32> -> vector<16x256xf32>
    %32 = vector.extract_strided_slice %1 {offsets = [6, 8, 0], sizes = [16, 16, 16], strides = [1, 1, 1]} : vector<32x32x16xf32> to vector<16x16x16xf32>
    %33 = vector.shape_cast %32 : vector<16x16x16xf32> to vector<256x16xf32>
    %34 = tpu.transpose %33, [1, 0] : vector<256x16xf32> -> vector<16x256xf32>
    %35 = vector.extract_strided_slice %1 {offsets = [6, 10, 0], sizes = [16, 16, 16], strides = [1, 1, 1]} : vector<32x32x16xf32> to vector<16x16x16xf32>
    %36 = vector.shape_cast %35 : vector<16x16x16xf32> to vector<256x16xf32>
    %37 = tpu.transpose %36, [1, 0] : vector<256x16xf32> -> vector<16x256xf32>
    %38 = vector.extract_strided_slice %1 {offsets = [8, 6, 0], sizes = [16, 16, 16], strides = [1, 1, 1]} : vector<32x32x16xf32> to vector<16x16x16xf32>
    %39 = vector.shape_cast %38 : vector<16x16x16xf32> to vector<256x16xf32>
    %40 = tpu.transpose %39, [1, 0] : vector<256x16xf32> -> vector<16x256xf32>
    %41 = vector.extract_strided_slice %1 {offsets = [8, 8, 0], sizes = [16, 16, 16], strides = [1, 1, 1]} : vector<32x32x16xf32> to vector<16x16x16xf32>
    %42 = vector.shape_cast %41 : vector<16x16x16xf32> to vector<256x16xf32>
    %43 = tpu.transpose %42, [1, 0] : vector<256x16xf32> -> vector<16x256xf32>
    %44 = vector.extract_strided_slice %1 {offsets = [8, 10, 0], sizes = [16, 16, 16], strides = [1, 1, 1]} : vector<32x32x16xf32> to vector<16x16x16xf32>
    %45 = vector.shape_cast %44 : vector<16x16x16xf32> to vector<256x16xf32>
    %46 = tpu.transpose %45, [1, 0] : vector<256x16xf32> -> vector<16x256xf32>
    %47 = vector.extract_strided_slice %1 {offsets = [10, 6, 0], sizes = [16, 16, 16], strides = [1, 1, 1]} : vector<32x32x16xf32> to vector<16x16x16xf32>
    %48 = vector.shape_cast %47 : vector<16x16x16xf32> to vector<256x16xf32>
    %49 = tpu.transpose %48, [1, 0] : vector<256x16xf32> -> vector<16x256xf32>
    %50 = vector.extract_strided_slice %1 {offsets = [10, 8, 0], sizes = [16, 16, 16], strides = [1, 1, 1]} : vector<32x32x16xf32> to vector<16x16x16xf32>
    %51 = vector.shape_cast %50 : vector<16x16x16xf32> to vector<256x16xf32>
    %52 = tpu.transpose %51, [1, 0] : vector<256x16xf32> -> vector<16x256xf32>
    %53 = vector.extract_strided_slice %1 {offsets = [10, 10, 0], sizes = [16, 16, 16], strides = [1, 1, 1]} : vector<32x32x16xf32> to vector<16x16x16xf32>
    %54 = vector.shape_cast %53 : vector<16x16x16xf32> to vector<256x16xf32>
    %55 = tpu.transpose %54, [1, 0] : vector<256x16xf32> -> vector<16x256xf32>
    %56 = vector.extract_strided_slice %1 {offsets = [4, 4, 0], sizes = [16, 16, 16], strides = [1, 1, 1]} : vector<32x32x16xf32> to vector<16x16x16xf32>
    %57 = vector.shape_cast %56 : vector<16x16x16xf32> to vector<256x16xf32>
    %58 = tpu.transpose %57, [1, 0] : vector<256x16xf32> -> vector<16x256xf32>
    %59 = vector.extract_strided_slice %1 {offsets = [4, 8, 0], sizes = [16, 16, 16], strides = [1, 1, 1]} : vector<32x32x16xf32> to vector<16x16x16xf32>
    %60 = vector.shape_cast %59 : vector<16x16x16xf32> to vector<256x16xf32>
    %61 = tpu.transpose %60, [1, 0] : vector<256x16xf32> -> vector<16x256xf32>
    %62 = vector.extract_strided_slice %1 {offsets = [4, 12, 0], sizes = [16, 16, 16], strides = [1, 1, 1]} : vector<32x32x16xf32> to vector<16x16x16xf32>
    %63 = vector.shape_cast %62 : vector<16x16x16xf32> to vector<256x16xf32>
    %64 = tpu.transpose %63, [1, 0] : vector<256x16xf32> -> vector<16x256xf32>
    %65 = vector.extract_strided_slice %1 {offsets = [8, 4, 0], sizes = [16, 16, 16], strides = [1, 1, 1]} : vector<32x32x16xf32> to vector<16x16x16xf32>
    %66 = vector.shape_cast %65 : vector<16x16x16xf32> to vector<256x16xf32>
    %67 = tpu.transpose %66, [1, 0] : vector<256x16xf32> -> vector<16x256xf32>
    %68 = vector.extract_strided_slice %1 {offsets = [8, 8, 0], sizes = [16, 16, 16], strides = [1, 1, 1]} : vector<32x32x16xf32> to vector<16x16x16xf32>
    %69 = vector.shape_cast %68 : vector<16x16x16xf32> to vector<256x16xf32>
    %70 = tpu.transpose %69, [1, 0] : vector<256x16xf32> -> vector<16x256xf32>
    %71 = vector.extract_strided_slice %1 {offsets = [8, 12, 0], sizes = [16, 16, 16], strides = [1, 1, 1]} : vector<32x32x16xf32> to vector<16x16x16xf32>
    %72 = vector.shape_cast %71 : vector<16x16x16xf32> to vector<256x16xf32>
    %73 = tpu.transpose %72, [1, 0] : vector<256x16xf32> -> vector<16x256xf32>
    %74 = vector.extract_strided_slice %1 {offsets = [12, 4, 0], sizes = [16, 16, 16], strides = [1, 1, 1]} : vector<32x32x16xf32> to vector<16x16x16xf32>
    %75 = vector.shape_cast %74 : vector<16x16x16xf32> to vector<256x16xf32>
    %76 = tpu.transpose %75, [1, 0] : vector<256x16xf32> -> vector<16x256xf32>
    %77 = vector.extract_strided_slice %1 {offsets = [12, 8, 0], sizes = [16, 16, 16], strides = [1, 1, 1]} : vector<32x32x16xf32> to vector<16x16x16xf32>
    %78 = vector.shape_cast %77 : vector<16x16x16xf32> to vector<256x16xf32>
    %79 = tpu.transpose %78, [1, 0] : vector<256x16xf32> -> vector<16x256xf32>
    %80 = vector.extract_strided_slice %1 {offsets = [12, 12, 0], sizes = [16, 16, 16], strides = [1, 1, 1]} : vector<32x32x16xf32> to vector<16x16x16xf32>
    %81 = vector.shape_cast %80 : vector<16x16x16xf32> to vector<256x16xf32>
    %82 = tpu.transpose %81, [1, 0] : vector<256x16xf32> -> vector<16x256xf32>
    %83 = vector.extract_strided_slice %1 {offsets = [0, 0, 0], sizes = [16, 16, 16], strides = [1, 1, 1]} : vector<32x32x16xf32> to vector<16x16x16xf32>
    %84 = vector.shape_cast %83 : vector<16x16x16xf32> to vector<256x16xf32>
    %85 = tpu.transpose %84, [1, 0] : vector<256x16xf32> -> vector<16x256xf32>
    %86 = vector.extract_strided_slice %1 {offsets = [0, 8, 0], sizes = [16, 16, 16], strides = [1, 1, 1]} : vector<32x32x16xf32> to vector<16x16x16xf32>
    %87 = vector.shape_cast %86 : vector<16x16x16xf32> to vector<256x16xf32>
    %88 = tpu.transpose %87, [1, 0] : vector<256x16xf32> -> vector<16x256xf32>
    %89 = vector.extract_strided_slice %1 {offsets = [0, 16, 0], sizes = [16, 16, 16], strides = [1, 1, 1]} : vector<32x32x16xf32> to vector<16x16x16xf32>
    %90 = vector.shape_cast %89 : vector<16x16x16xf32> to vector<256x16xf32>
    %91 = tpu.transpose %90, [1, 0] : vector<256x16xf32> -> vector<16x256xf32>
    %92 = vector.extract_strided_slice %1 {offsets = [8, 0, 0], sizes = [16, 16, 16], strides = [1, 1, 1]} : vector<32x32x16xf32> to vector<16x16x16xf32>
    %93 = vector.shape_cast %92 : vector<16x16x16xf32> to vector<256x16xf32>
    %94 = tpu.transpose %93, [1, 0] : vector<256x16xf32> -> vector<16x256xf32>
    %95 = vector.extract_strided_slice %1 {offsets = [8, 8, 0], sizes = [16, 16, 16], strides = [1, 1, 1]} : vector<32x32x16xf32> to vector<16x16x16xf32>
    %96 = vector.shape_cast %95 : vector<16x16x16xf32> to vector<256x16xf32>
    %97 = tpu.transpose %96, [1, 0] : vector<256x16xf32> -> vector<16x256xf32>
    %98 = vector.extract_strided_slice %1 {offsets = [8, 16, 0], sizes = [16, 16, 16], strides = [1, 1, 1]} : vector<32x32x16xf32> to vector<16x16x16xf32>
    %99 = vector.shape_cast %98 : vector<16x16x16xf32> to vector<256x16xf32>
    %100 = tpu.transpose %99, [1, 0] : vector<256x16xf32> -> vector<16x256xf32>
    %101 = vector.extract_strided_slice %1 {offsets = [16, 0, 0], sizes = [16, 16, 16], strides = [1, 1, 1]} : vector<32x32x16xf32> to vector<16x16x16xf32>
    %102 = vector.shape_cast %101 : vector<16x16x16xf32> to vector<256x16xf32>
    %103 = tpu.transpose %102, [1, 0] : vector<256x16xf32> -> vector<16x256xf32>
    %104 = vector.extract_strided_slice %1 {offsets = [16, 8, 0], sizes = [16, 16, 16], strides = [1, 1, 1]} : vector<32x32x16xf32> to vector<16x16x16xf32>
    %105 = vector.shape_cast %104 : vector<16x16x16xf32> to vector<256x16xf32>
    %106 = tpu.transpose %105, [1, 0] : vector<256x16xf32> -> vector<16x256xf32>
    %107 = vector.extract_strided_slice %1 {offsets = [16, 16, 0], sizes = [16, 16, 16], strides = [1, 1, 1]} : vector<32x32x16xf32> to vector<16x16x16xf32>
    %108 = vector.shape_cast %107 : vector<16x16x16xf32> to vector<256x16xf32>
    %109 = tpu.transpose %108, [1, 0] : vector<256x16xf32> -> vector<16x256xf32>
    %110 = tpu.concatenate %4, %7, %10, %13, %16, %19, %22, %25, %28, %31, %34, %37, %40, %43, %46, %49 in 0 : vector<16x256xf32>, vector<16x256xf32>, vector<16x256xf32>, vector<16x256xf32>, vector<16x256xf32>, vector<16x256xf32>, vector<16x256xf32>, vector<16x256xf32>, vector<16x256xf32>, vector<16x256xf32>, vector<16x256xf32>, vector<16x256xf32>, vector<16x256xf32>, vector<16x256xf32>, vector<16x256xf32>, vector<16x256xf32> -> vector<256x256xf32>
    %111 = tpu.concatenate %52, %55, %58, %61, %64, %67, %70, %73, %76, %79, %82, %85, %88, %91, %94, %97 in 0 : vector<16x256xf32>, vector<16x256xf32>, vector<16x256xf32>, vector<16x256xf32>, vector<16x256xf32>, vector<16x256xf32>, vector<16x256xf32>, vector<16x256xf32>, vector<16x256xf32>, vector<16x256xf32>, vector<16x256xf32>, vector<16x256xf32>, vector<16x256xf32>, vector<16x256xf32>, vector<16x256xf32>, vector<16x256xf32> -> vector<256x256xf32>
    %112 = tpu.concatenate %100, %103, %106, %109 in 0 : vector<16x256xf32>, vector<16x256xf32>, vector<16x256xf32>, vector<16x256xf32> -> vector<64x256xf32>
    %113 = tpu.concatenate %110, %111, %112 in 0 : vector<256x256xf32>, vector<256x256xf32>, vector<64x256xf32> -> vector<576x256xf32>
    %c0_3 = arith.constant 0 : index
    %c0_4 = arith.constant 0 : index
    %114 = vector.load %arg3[%c0_3, %c0_4] : memref<16x576xf32, #tpu.memory_space<vmem>>, vector<16x576xf32>
    %cst = arith.constant dense<0.000000e+00> : vector<16x256xf32>
    %115 = tpu.matmul %114, %113, %cst {dimension_numbers = #tpu.dot_dimension_numbers<[1], [0], [0], [1], [0, 0, 1, 1], [], []>} : vector<16x576xf32>, vector<576x256xf32>, vector<16x256xf32> -> vector<16x256xf32>
    %c0_5 = arith.constant 0 : index
    %c0_6 = arith.constant 0 : index
    %116 = vector.load %arg4[%c0_5, %c0_6] : memref<16x1xf32, #tpu.memory_space<vmem>>, vector<16x1xf32>
    %117 = vector.broadcast %116 : vector<16x1xf32> to vector<16x256xf32>
    %118 = arith.addf %115, %117 : vector<16x256xf32>
    %cst_7 = arith.constant dense<0.000000e+00> : vector<16xf32>
    %119 = vector.multi_reduction <add>, %118, %cst_7 [1] : vector<16x256xf32> to vector<16xf32>
    %120 = vector.shape_cast %119 : vector<16xf32> to vector<16x1xf32>
    %cst_8 = arith.constant 3.906250e-03 : f32
    %121 = vector.broadcast %cst_8 : f32 to vector<16x1xf32>
    %122 = arith.mulf %120, %121 : vector<16x1xf32>
    %c0_9 = arith.constant 0 : index
    %c0_10 = arith.constant 0 : index
    %123 = vector.load %arg5[%c0_9, %c0_10] : memref<16x1xf32, #tpu.memory_space<vmem>>, vector<16x1xf32>
    %124 = arith.mulf %122, %123 : vector<16x1xf32>
    %cst_11 = arith.constant dense<0.000000e+00> : vector<1xf32>
    %125 = vector.multi_reduction <add>, %124, %cst_11 [0] : vector<16x1xf32> to vector<1xf32>
    %126 = vector.shape_cast %125 : vector<1xf32> to vector<1x1xf32>
    %c0_12 = arith.constant 0 : index
    %c0_13 = arith.constant 0 : index
    %127 = vector.load %arg6[%c0_12, %c0_13] : memref<1x1xf32, #tpu.memory_space<vmem>>, vector<1x1xf32>
    %128 = arith.addf %126, %127 : vector<1x1xf32>
    %cst_14 = arith.constant 0.000000e+00 : f32
    %129 = vector.broadcast %cst_14 : f32 to vector<1x1xf32>
    %130 = arith.maximumf %128, %129 : vector<1x1xf32>
    %c0_15 = arith.constant 0 : index
    %c0_16 = arith.constant 0 : index
    %131 = vector.load %arg7[%c0_15, %c0_16] : memref<16x1xf32, #tpu.memory_space<vmem>>, vector<16x1xf32>
    %132 = vector.broadcast %130 : vector<1x1xf32> to vector<16x1xf32>
    %133 = arith.mulf %131, %132 : vector<16x1xf32>
    %cst_17 = arith.constant dense<0.000000e+00> : vector<16xf32>
    %134 = vector.multi_reduction <add>, %133, %cst_17 [1] : vector<16x1xf32> to vector<16xf32>
    %135 = vector.shape_cast %134 : vector<16xf32> to vector<16x1xf32>
    %c0_18 = arith.constant 0 : index
    %c0_19 = arith.constant 0 : index
    %136 = vector.load %arg8[%c0_18, %c0_19] : memref<16x1xf32, #tpu.memory_space<vmem>>, vector<16x1xf32>
    %137 = arith.addf %135, %136 : vector<16x1xf32>
    %138 = arith.negf %137 : vector<16x1xf32>
    %139 = math.exp %138 : vector<16x1xf32>
    %cst_20 = arith.constant 1.000000e+00 : f32
    %140 = vector.broadcast %cst_20 : f32 to vector<16x1xf32>
    %141 = arith.addf %140, %139 : vector<16x1xf32>
    %142 = arith.divf %140, %141 : vector<16x1xf32>
    %c0_21 = arith.constant 0 : index
    %c0_22 = arith.constant 0 : index
    %c0_23 = arith.constant 0 : index
    %143 = vector.load %arg2[%c0_21, %c0_22, %c0_23] : memref<1x16x256xf32, #tpu.memory_space<vmem>>, vector<1x16x256xf32>
    %144 = vector.shape_cast %143 : vector<1x16x256xf32> to vector<16x256xf32>
    %145 = vector.broadcast %142 : vector<16x1xf32> to vector<16x256xf32>
    %146 = arith.mulf %118, %145 : vector<16x256xf32>
    %147 = arith.addf %144, %146 : vector<16x256xf32>
    %c0_24 = arith.constant 0 : index
    %c0_25 = arith.constant 0 : index
    %c0_26 = arith.constant 0 : index
    %148 = vector.load %arg9[%c0_24, %c0_25, %c0_26] : memref<1x16x256xf32, #tpu.memory_space<vmem>>, vector<1x16x256xf32>
    %149 = vector.shape_cast %148 : vector<1x16x256xf32> to vector<16x256xf32>
    %150 = vector.shape_cast %147 : vector<16x256xf32> to vector<1x16x256xf32>
    tpu.vector_store %arg9[%c0_24, %c0_25, %c0_26], %150 {strides = array<i32>} : memref<1x16x256xf32, #tpu.memory_space<vmem>>, vector<1x16x256xf32>,
    return
  }
  func.func @transform_0(%arg0: i32) -> (i32, i32, i32, i32) {
    %c0_i32 = arith.constant 0 : i32
    %c0_i32_0 = arith.constant 0 : i32
    %c0_i32_1 = arith.constant 0 : i32
    %c0_i32_2 = arith.constant 0 : i32
    return %arg0, %c0_i32, %c0_i32_0, %c0_i32_1 : i32, i32, i32, i32
  }
  func.func @transform_1(%arg0: i32) -> (i32, i32, i32) {
    %c0_i32 = arith.constant 0 : i32
    %c0_i32_0 = arith.constant 0 : i32
    %c0_i32_1 = arith.constant 0 : i32
    return %arg0, %c0_i32, %c0_i32_0 : i32, i32, i32
  }
  func.func @transform_2(%arg0: i32) -> (i32, i32) {
    %c0_i32 = arith.constant 0 : i32
    %c0_i32_0 = arith.constant 0 : i32
    %c0_i32_1 = arith.constant 0 : i32
    return %c0_i32, %c0_i32_0 : i32, i32
  }
  func.func @transform_3(%arg0: i32) -> (i32, i32) {
    %c0_i32 = arith.constant 0 : i32
    %c0_i32_0 = arith.constant 0 : i32
    %c0_i32_1 = arith.constant 0 : i32
    return %c0_i32, %c0_i32_0 : i32, i32
  }
  func.func @transform_4(%arg0: i32) -> (i32, i32) {
    %c0_i32 = arith.constant 0 : i32
    %c0_i32_0 = arith.constant 0 : i32
    %c0_i32_1 = arith.constant 0 : i32
    return %c0_i32, %c0_i32_0 : i32, i32
  }
  func.func @transform_5(%arg0: i32) -> (i32, i32) {
    %c0_i32 = arith.constant 0 : i32
    %c0_i32_0 = arith.constant 0 : i32
    %c0_i32_1 = arith.constant 0 : i32
    return %c0_i32, %c0_i32_0 : i32, i32
  }
  func.func @transform_6(%arg0: i32) -> (i32, i32) {
    %c0_i32 = arith.constant 0 : i32
    %c0_i32_0 = arith.constant 0 : i32
    %c0_i32_1 = arith.constant 0 : i32
    return %c0_i32, %c0_i32_0 : i32, i32
  }
  func.func @transform_7(%arg0: i32) -> (i32, i32) {
    %c0_i32 = arith.constant 0 : i32
    %c0_i32_0 = arith.constant 0 : i32
    %c0_i32_1 = arith.constant 0 : i32
    return %c0_i32, %c0_i32_0 : i32, i32
  }
  func.func @transform_8(%arg0: i32) -> (i32, i32, i32) {
    %c0_i32 = arith.constant 0 : i32
    %c0_i32_0 = arith.constant 0 : i32
    %c0_i32_1 = arith.constant 0 : i32
    return %arg0, %c0_i32, %c0_i32_0 : i32, i32, i32
  }
}

</mosaic_0001>

<bundles_post_ra>
// kernel: aspp_forward.1
= control target key start
LH: loop header
LB: loop body
LE: loop exit
PB: predicated region body
PF: predicated region fallthrough
CT: control target
= control target key end

     0   :  { %s5019_s29 = smov 0   ;;  %s7253_s0 = inlined_call_operand.vmem [shape: f32[2,32,32,16], index: 0, kind: input, shape index: {}]   ;;  %s7254_s1 = inlined_call_operand.vmem [shape: f32[2,16,256], index: 1, kind: input, shape index: {}]   ;;  %s7255_s2 = inlined_call_operand.vmem [shape: f32[16,576], index: 2, kind: input, shape index: {}]   ;;  %s7256_s3 = inlined_call_operand.vmem [shape: f32[16,1], index: 3, kind: input, shape index: {}]   ;;  %s7257_s4 = inlined_call_operand.vmem [shape: f32[16,1], index: 4, kind: input, shape index: {}]   ;;  %s7258_s5 = inlined_call_operand.<no memory space> [shape: f32[1,1], index: 5, kind: input, shape index: {}]   ;;  %s7259_s6 = inlined_call_operand.vmem [shape: f32[16,1], index: 6, kind: input, shape index: {}]   ;;  %s7260_s7 = inlined_call_operand.vmem [shape: f32[16,1], index: 7, kind: input, shape index: {}]   ;;  %s7261_s8 = inlined_call_operand.vmem [shape: f32[2,16,256], index: 8, kind: output, shape index: {}]  }
   0x1   :  { %v13_v0 = vstv %s7258_s5 }
   0x2   :  { %14 = vst [vmem:[#allocation2] sm:$0x1] %v13_v0 }
   0x3 LB: > { %s3579_s30 = sadd.s32 4294967295, %s4968_s29   ;;  %p3583_p0 = scmp.ge.s32.totalorder %s4968_s29, 1  ;;  %s4968_s29 = sphi %s5019_s29, %s20_s29  }
   0x4   : > { %p274_p1 = scmp.lt.s32.totalorder %s4968_s29, 3 }
   0x6   : > { %p275_p2 = pnand %p3583_p0, %p274_p1 }
   0x8   : > { %278 = sbr.rel (%p275_p2) target bundleno = 1801 (0x709), region = 52 }
   0xd   : > { %p313_p3 = scmp.lt.s32.totalorder %s3579_s30, 1  ;;  %vm761_vm0 = vcmask 1046528   ;;  %vm504_vm1 = vcmask 1040384   ;;  %vm1603_vm2 = vcmask 1045504   ;;  %vm1361_vm3 = vcmask 1041408  }
   0xe   : > { %vm2166_vm4 = vcmask 1043456   ;;  %vm3175_vm5 = vcmask 523264   ;;  %vm3424_vm6 = vcmask 7168  }
   0xf   : > { %s7569_s30 = smov (!%p313_p3, %s3579_s30), 1 }
  0x10   : > { %s3598_s5 = sshll.u32 %s7569_s30, 10  ;;  %s3599_s27 = sshll.u32 %s7569_s30, 5 }
  0x11   : > { %s5033_s11 = scalar_lea.vmem %s7253_s0, %s3598_s5  ;;  %s322_s9 = scalar_lea.vmem %s7254_s1, %s3599_s27 }
  0x12   : > { %v357_v1 = vld [vmem:[%s5033_s11 + $0xe8] sm:$0xff]  ;;  %v358_v2 = vld [vmem:[%s5033_s11 + $0xf0] sm:$0xff]  ;;  %v356_v8 = vld [vmem:[%s5033_s11 + $0xe0] sm:$0xff]  ;;  %s327_s12 = scalar_lea.vmem %s7261_s8, %s3599_s27 }
  0x13   : > { %v5038_v3 = vld [vmem:[%s5033_s11 + $0x1e8] sm:$0xff]  ;;  %v5041_v4 = vld [vmem:[%s5033_s11 + $0x1f0] sm:$0xff]  ;;  %v762_v5 = vrot.slane %v357_v1, 1  ;;  %v763_v6 = vrot.slane %v358_v2, 1  ;;  %v388_v9 = vld [vmem:[%s5033_s11 + $0x1e0] sm:$0xff]  ;;  %v505_v12 = vrot.slane %v356_v8, 7 }
  0x14   : > { %v802_v7 = vrot.slane %v5038_v3, 1  ;;  %v3610_v10 = vpack.i.bf16 %v5038_v3, %v357_v1  ;;  %v803_v11 = vrot.slane %v5041_v4, 1  ;;  %v506_v13 = vrot.slane %v357_v1, 7  ;;  %v359_v15 = vld [vmem:[%s5033_s11 + $0xf8] sm:$0xff]  ;;  %v361_v33 = vld [vmem:[%s5033_s11 + $0x108] sm:$0xff]  ;;  %v362_v34 = vld [vmem:[%s5033_s11 + $0x110] sm:$0xff] }
  0x15   : > { %v545_v14 = vrot.slane %v388_v9, 7  ;;  %v391_v16 = vld [vmem:[%s5033_s11 + $0x1f8] sm:$0xff]  ;;  %v764_v17 = vsel %vm761_vm0, %v762_v5, %v763_v6  ;;  %v546_v18 = vrot.slane %v5038_v3, 7  ;;  %v765_v19 = vrot.slane %v359_v15, 1  ;;  %v5074_v35 = vld [vmem:[%s5033_s11 + $0x208] sm:$0xff]  ;;  %v5077_v36 = vld [vmem:[%s5033_s11 + $0x210] sm:$0xff] }
  0x16   : > { %3611 = vxpose.xlu1.b32.start [1/16] (narrow) %v3610_v10, 16  ;;  %v805_v20 = vrot.slane %v391_v16, 1  ;;  %v5053_v21 = vsel %vm761_vm0, %v802_v7, %v803_v11  ;;  %v507_v22 = vsel %vm504_vm1, %v505_v12, %v506_v13  ;;  %v508_v23 = vrot.slane %v358_v2, 7  ;;  %7386 = vst [vmem:[#allocation3_spill] sm:$0xff] %v5074_v35  ;;  %v360_v37 = vld [vmem:[%s5033_s11 + $0x100] sm:$0xff]  ;;  %v363_v52 = vld [vmem:[%s5033_s11 + $0x118] sm:$0xff] }
  0x17   : > { %v548_v24 = vrot.slane %v5041_v4, 7  ;;  %v3694_v25 = vpack.i.bf16 %v5053_v21, %v764_v17  ;;  %v5059_v26 = vsel %vm504_vm1, %v545_v14, %v546_v18  ;;  %v3612_v28 = vpack.i.bf16 %v5041_v4, %v358_v2  ;;  %7387 = vst [vmem:[#allocation4_spill] sm:$0xff] %v5077_v36  ;;  %v392_v38 = vld [vmem:[%s5033_s11 + $0x200] sm:$0xff]  ;;  %v395_v55 = vld [vmem:[%s5033_s11 + $0x218] sm:$0xff]  ;;  %v365_v5 = vld [vmem:[%s5033_s11 + $0x128] sm:$0xff] }
  0x18   : > { %v3652_v27 = vpack.i.bf16 %v5059_v26, %v507_v22  ;;  %v766_v29 = vsel %vm761_vm0, %v763_v6, %v765_v19  ;;  %v5065_v30 = vsel %vm761_vm0, %v803_v11, %v805_v20  ;;  %v509_v31 = vsel %vm504_vm1, %v506_v13, %v508_v23  ;;  %v366_v6 = vld [vmem:[%s5033_s11 + $0x130] sm:$0xff]  ;;  %v397_v7 = vld [vmem:[%s5033_s11 + $0x228] sm:$0xff]  ;;  %v364_v9 = vld [vmem:[%s5033_s11 + $0x120] sm:$0xff] }
  0x19   : > { %3695 = vxpose.xlu2.b32.start [1/16] (narrow) %v3694_v25, 16  ;;  %v5069_v32 = vsel %vm504_vm1, %v546_v18, %v548_v24  ;;  %v3696_v39 = vpack.i.bf16 %v5065_v30, %v766_v29  ;;  %v767_v41 = vrot.slane %v361_v33, 1  ;;  %v768_v42 = vrot.slane %v362_v34, 1  ;;  %v398_v8 = vld [vmem:[%s5033_s11 + $0x230] sm:$0xff]  ;;  %v396_v10 = vld [vmem:[%s5033_s11 + $0x220] sm:$0xff]  ;;  %v399_v29 = vld [vmem:[%s5033_s11 + $0x238] sm:$0xff] }
  0x1a   : > { %3653 = vxpose.xlu0.b32.start [1/16] (narrow) %v3652_v27, 16  ;;  %v3654_v40 = vpack.i.bf16 %v5069_v32, %v509_v31  ;;  %v807_v43 = vrot.slane %v5074_v35, 1  ;;  %v808_v44 = vrot.slane %v5077_v36, 1  ;;  %v510_v45 = vrot.slane %v360_v37, 7 }
  0x1b   : > { %v511_v46 = vrot.slane %v361_v33, 7  ;;  %v550_v47 = vrot.slane %v392_v38, 7  ;;  %v551_v48 = vrot.slane %v5074_v35, 7  ;;  %v5087_v49 = vpack.i.bf16 %v5074_v35, %v361_v33 }
  0x1c   : > { %v769_v50 = vsel %vm761_vm0, %v767_v41, %v768_v42  ;;  %v5091_v51 = vsel %vm761_vm0, %v807_v43, %v808_v44  ;;  %v770_v57 = vrot.slane %v363_v52, 1  ;;  %v810_v59 = vrot.slane %v395_v55, 1  ;;  %v369_v43 = vld [vmem:[%s5033_s11 + $0x148] sm:$0xff]  ;;  %v400_v52 = vld [vmem:[%s5033_s11 + $0x240] sm:$0xff] }
  0x1d   : > { %7388 = vst [vmem:[#allocation5_spill] sm:$0xff] %v5091_v51  ;;  %v512_v53 = vsel %vm504_vm1, %v510_v45, %v511_v46  ;;  %v5096_v54 = vsel %vm504_vm1, %v550_v47, %v551_v48  ;;  %v5100_v56 = vpack.i.bf16 %v5091_v51, %v769_v50  ;;  %v513_v60 = vrot.slane %v362_v34, 7  ;;  %v401_v47 = vld [vmem:[%s5033_s11 + $0x248] sm:$0xff]  ;;  %v368_v50 = vld [vmem:[%s5033_s11 + $0x140] sm:$0xff] }
  0x1e   : > { %3613 = vxpose.xlu1.b32.cont [2/16] (narrow) %v3612_v28, 16  ;;  %7389 = vst [vmem:[#allocation6_spill] sm:$0xff] %v5096_v54  ;;  %v5104_v58 = vpack.i.bf16 %v5096_v54, %v512_v53  ;;  %v553_v61 = vrot.slane %v5077_v36, 7  ;;  %v5109_v62 = vpack.i.bf16 %v5077_v36, %v362_v34  ;;  %v771_v63 = vsel %vm761_vm0, %v768_v42, %v770_v57  ;;  %v367_v28 = vld [vmem:[%s5033_s11 + $0x138] sm:$0xff] }
  0x1f   : > { %v5114_v0 = vsel %vm761_vm0, %v808_v44, %v810_v59  ;;  %v514_v1 = vsel %vm504_vm1, %v511_v46, %v513_v60  ;;  %v772_v13 = vrot.slane %v365_v5, 1  ;;  %v773_v14 = vrot.slane %v366_v6, 1  ;;  %v370_v46 = vld [vmem:[%s5033_s11 + $0x150] sm:$0xff]  ;;  %v419_v54 = vld [vmem:[%s5033_s11 + $0x2d8] sm:$0xff] }
  0x20   : > { %7390 = vst [vmem:[#allocation7_spill] sm:$0xff] %v5114_v0  ;;  %v5118_v2 = vsel %vm504_vm1, %v551_v48, %v553_v61  ;;  %v5127_v11 = vpack.i.bf16 %v5114_v0, %v771_v63  ;;  %v812_v15 = vrot.slane %v397_v7, 1  ;;  %v813_v16 = vrot.slane %v398_v8, 1  ;;  %v402_v48 = vld [vmem:[%s5033_s11 + $0x250] sm:$0xff] }
  0x21   : > { %3697 = vxpose.xlu2.b32.cont [2/16] (narrow) %v3696_v39, 16  ;;  %7391 = vst [vmem:[#allocation8_spill] sm:$0xff] %v5118_v2  ;;  %v5130_v12 = vpack.i.bf16 %v5118_v2, %v514_v1  ;;  %v515_v17 = vrot.slane %v364_v9, 7  ;;  %v516_v18 = vrot.slane %v365_v5, 7  ;;  %v555_v19 = vrot.slane %v396_v10, 7  ;;  %v5301_v2 = vld [vmem:[%s5033_s11 + $0x1c0] sm:$0xff] }
  0x22   : > { %3655 = vxpose.xlu0.b32.cont [2/16] (narrow) %v3654_v40, 16  ;;  %v556_v20 = vrot.slane %v397_v7, 7  ;;  %v5134_v22 = vpack.i.bf16 %v397_v7, %v365_v5  ;;  %v774_v23 = vsel %vm761_vm0, %v772_v13, %v773_v14  ;;  %v814_v24 = vsel %vm761_vm0, %v812_v15, %v813_v16  ;;  %v403_v13 = vld [vmem:[%s5033_s11 + $0x258] sm:$0xff]  ;;  %7393 = vst [vmem:[#allocation10_spill] sm:$0xff] %v5301_v2 }
  0x23   : > { %v517_v25 = vsel %vm504_vm1, %v515_v17, %v516_v18  ;;  %v5143_v31 = vpack.i.bf16 %v814_v24, %v774_v23  ;;  %v775_v34 = vrot.slane %v367_v28, 1  ;;  %v815_v37 = vrot.slane %v399_v29, 1 }
  0x24   : > { %v557_v27 = vsel %vm504_vm1, %v555_v19, %v556_v20  ;;  %v518_v38 = vrot.slane %v366_v6, 7  ;;  %v558_v39 = vrot.slane %v398_v8, 7  ;;  %v5149_v40 = vpack.i.bf16 %v398_v8, %v366_v6  ;;  %v371_v8 = vld [vmem:[%s5033_s11 + $0x158] sm:$0xff] }
  0x25   : > { %v5146_v33 = vpack.i.bf16 %v557_v27, %v517_v25  ;;  %v776_v41 = vsel %vm761_vm0, %v773_v14, %v775_v34  ;;  %v816_v42 = vsel %vm761_vm0, %v813_v16, %v815_v37  ;;  %v777_v55 = vrot.slane %v369_v43, 1  ;;  %v373_v34 = vld [vmem:[%s5033_s11 + $0x168] sm:$0xff]  ;;  %v374_v37 = vld [vmem:[%s5033_s11 + $0x170] sm:$0xff] }
  0x26   : > { %3615 = vxpose.xlu1.b32.cont [3/16] (narrow) %v5087_v49, 16  ;;  %v519_v44 = vsel %vm504_vm1, %v516_v18, %v518_v38  ;;  %v559_v45 = vsel %vm504_vm1, %v556_v20, %v558_v39  ;;  %v5162_v53 = vpack.i.bf16 %v816_v42, %v776_v41  ;;  %v778_v59 = vrot.slane %v370_v46, 1  ;;  %v405_v38 = vld [vmem:[%s5033_s11 + $0x268] sm:$0xff]  ;;  %v406_v39 = vld [vmem:[%s5033_s11 + $0x270] sm:$0xff]  ;;  %v372_v41 = vld [vmem:[%s5033_s11 + $0x160] sm:$0xff] }
  0x27   : > { %v5165_v57 = vpack.i.bf16 %v559_v45, %v519_v44  ;;  %v817_v60 = vrot.slane %v401_v47, 1  ;;  %v818_v61 = vrot.slane %v402_v48, 1  ;;  %v520_v63 = vrot.slane %v368_v50, 7  ;;  %v404_v42 = vld [vmem:[%s5033_s11 + $0x260] sm:$0xff] }
  0x28   : > { %v521_v1 = vrot.slane %v369_v43, 7  ;;  %v560_v5 = vrot.slane %v400_v52, 7  ;;  %v561_v6 = vrot.slane %v401_v47, 7  ;;  %v5168_v7 = vpack.i.bf16 %v401_v47, %v369_v43 }
  0x29   : > { %3699 = vxpose.xlu2.b32.cont [3/16] (narrow) %v5100_v56, 16  ;;  %v779_v9 = vsel %vm761_vm0, %v777_v55, %v778_v59  ;;  %v819_v10 = vsel %vm761_vm0, %v817_v60, %v818_v61  ;;  %v780_v16 = vrot.slane %v371_v8, 1  ;;  %v820_v18 = vrot.slane %v403_v13, 1  ;;  %v407_v8 = vld [vmem:[%s5033_s11 + $0x278] sm:$0xff] }
  0x2a   : > { %3657 = vxpose.xlu0.b32.cont [3/16] (narrow) %v5104_v58, 16  ;;  %v522_v14 = vsel %vm504_vm1, %v520_v63, %v521_v1  ;;  %v562_v15 = vsel %vm504_vm1, %v560_v5, %v561_v6  ;;  %v5177_v17 = vpack.i.bf16 %v819_v10, %v779_v9  ;;  %v523_v19 = vrot.slane %v370_v46, 7 }
  0x2b   : > { %v563_v20 = vrot.slane %v402_v48, 7  ;;  %v5180_v23 = vpack.i.bf16 %v562_v15, %v522_v14  ;;  %v781_v24 = vsel %vm761_vm0, %v778_v59, %v780_v16  ;;  %v821_v25 = vsel %vm761_vm0, %v818_v61, %v820_v18 }
  0x2c   : > { %v524_v27 = vsel %vm504_vm1, %v521_v1, %v523_v19  ;;  %v5187_v29 = vpack.i.bf16 %v402_v48, %v370_v46  ;;  %v5196_v43 = vpack.i.bf16 %v821_v25, %v781_v24  ;;  %v782_v45 = vrot.slane %v373_v34, 1 }
  0x2d   : > { %v564_v28 = vsel %vm504_vm1, %v561_v6, %v563_v20  ;;  %v783_v47 = vrot.slane %v374_v37, 1  ;;  %v822_v46 = vrot.slane %v405_v38, 1  ;;  %v823_v48 = vrot.slane %v406_v39, 1  ;;  %v375_v6 = vld [vmem:[%s5033_s11 + $0x178] sm:$0xff] }
  0x2e   : > { %3617 = vxpose.xlu1.b32.cont [4/16] (narrow) %v5109_v62, 16  ;;  %v5198_v44 = vpack.i.bf16 %v564_v28, %v524_v27  ;;  %v525_v50 = vrot.slane %v372_v41, 7  ;;  %v526_v52 = vrot.slane %v373_v34, 7  ;;  %v565_v55 = vrot.slane %v404_v42, 7  ;;  %v377_v27 = vld [vmem:[%s5033_s11 + $0x188] sm:$0xff]  ;;  %v378_v28 = vld [vmem:[%s5033_s11 + $0x190] sm:$0xff] }
  0x2f   : > { %v566_v59 = vrot.slane %v405_v38, 7  ;;  %v5202_v60 = vpack.i.bf16 %v405_v38, %v373_v34  ;;  %v784_v61 = vsel %vm761_vm0, %v782_v45, %v783_v47  ;;  %v824_v63 = vsel %vm761_vm0, %v822_v46, %v823_v48  ;;  %v409_v34 = vld [vmem:[%s5033_s11 + $0x288] sm:$0xff]  ;;  %v410_v38 = vld [vmem:[%s5033_s11 + $0x290] sm:$0xff]  ;;  %v376_v41 = vld [vmem:[%s5033_s11 + $0x180] sm:$0xff] }
  0x30   : > { %v527_v1 = vsel %vm504_vm1, %v525_v50, %v526_v52  ;;  %v5211_v9 = vpack.i.bf16 %v824_v63, %v784_v61  ;;  %v785_v13 = vrot.slane %v375_v6, 1  ;;  %v825_v14 = vrot.slane %v407_v8, 1  ;;  %v408_v42 = vld [vmem:[%s5033_s11 + $0x280] sm:$0xff]  ;;  %v379_v63 = vld [vmem:[%s5033_s11 + $0x198] sm:$0xff] }
  0x31   : > { %3701 = vxpose.xlu2.b32.cont [4/16] (narrow) %v5127_v11, 16  ;;  %v567_v5 = vsel %vm504_vm1, %v565_v55, %v566_v59  ;;  %v528_v15 = vrot.slane %v374_v37, 7  ;;  %v568_v16 = vrot.slane %v406_v39, 7  ;;  %v5217_v18 = vpack.i.bf16 %v406_v39, %v374_v37  ;;  %v411_v6 = vld [vmem:[%s5033_s11 + $0x298] sm:$0xff] }
  0x32   : > { %3659 = vxpose.xlu0.b32.cont [4/16] (narrow) %v5130_v12, 16  ;;  %v5213_v10 = vpack.i.bf16 %v567_v5, %v527_v1  ;;  %v786_v19 = vsel %vm761_vm0, %v783_v47, %v785_v13  ;;  %v826_v20 = vsel %vm761_vm0, %v823_v48, %v825_v14  ;;  %v787_v39 = vrot.slane %v377_v27, 1 }
  0x33   : > { %v529_v24 = vsel %vm504_vm1, %v526_v52, %v528_v15  ;;  %v569_v25 = vsel %vm504_vm1, %v566_v59, %v568_v16  ;;  %v5230_v45 = vpack.i.bf16 %v826_v20, %v786_v19  ;;  %v788_v47 = vrot.slane %v378_v28, 1 }
  0x34   : > { %v5232_v37 = vpack.i.bf16 %v569_v25, %v529_v24  ;;  %v827_v46 = vrot.slane %v409_v34, 1  ;;  %v828_v48 = vrot.slane %v410_v38, 1  ;;  %v530_v50 = vrot.slane %v376_v41, 7 }
  0x35   : > { %v531_v52 = vrot.slane %v377_v27, 7  ;;  %v570_v55 = vrot.slane %v408_v42, 7  ;;  %v571_v59 = vrot.slane %v409_v34, 7  ;;  %v5236_v61 = vpack.i.bf16 %v409_v34, %v377_v27 }
  0x36   : > { %3619 = vxpose.xlu1.b32.cont [5/16] (narrow) %v5134_v22, 16  ;;  %v789_v1 = vsel %vm761_vm0, %v787_v39, %v788_v47  ;;  %v829_v5 = vsel %vm761_vm0, %v827_v46, %v828_v48  ;;  %v790_v14 = vrot.slane %v379_v63, 1  ;;  %v830_v16 = vrot.slane %v411_v6, 1  ;;  %v381_v39 = vld [vmem:[%s5033_s11 + $0x1a8] sm:$0xff]  ;;  %v382_v46 = vld [vmem:[%s5033_s11 + $0x1b0] sm:$0xff]  ;;  %v380_v63 = vld [vmem:[%s5033_s11 + $0x1a0] sm:$0xff] }
  0x37   : > { %v532_v8 = vsel %vm504_vm1, %v530_v50, %v531_v52  ;;  %v572_v13 = vsel %vm504_vm1, %v570_v55, %v571_v59  ;;  %v5245_v15 = vpack.i.bf16 %v829_v5, %v789_v1  ;;  %v533_v19 = vrot.slane %v378_v28, 7  ;;  %v413_v50 = vld [vmem:[%s5033_s11 + $0x2a8] sm:$0xff]  ;;  %v414_v55 = vld [vmem:[%s5033_s11 + $0x2b0] sm:$0xff]  ;;  %v412_v1 = vld [vmem:[%s5033_s11 + $0x2a0] sm:$0xff] }
  0x38   : > { %v573_v20 = vrot.slane %v410_v38, 7  ;;  %v5248_v24 = vpack.i.bf16 %v572_v13, %v532_v8  ;;  %v791_v25 = vsel %vm761_vm0, %v788_v47, %v790_v14  ;;  %v831_v27 = vsel %vm761_vm0, %v828_v48, %v830_v16 }
  0x39   : > { %3703 = vxpose.xlu2.b32.cont [5/16] (narrow) %v5143_v31, 16  ;;  %v534_v34 = vsel %vm504_vm1, %v531_v52, %v533_v19  ;;  %v5255_v42 = vpack.i.bf16 %v410_v38, %v378_v28  ;;  %v5264_v5 = vpack.i.bf16 %v831_v27, %v791_v25  ;;  %v792_v48 = vrot.slane %v381_v39, 1  ;;  %v383_v27 = vld [vmem:[%s5033_s11 + $0x1b8] sm:$0xff] }
  0x3a   : > { %3661 = vxpose.xlu0.b32.cont [5/16] (narrow) %v5146_v33, 16  ;;  %v574_v41 = vsel %vm504_vm1, %v571_v59, %v573_v20  ;;  %v793_v52 = vrot.slane %v382_v46, 1  ;;  %v832_v28 = vrot.slane %v413_v50, 1  ;;  %v833_v38 = vrot.slane %v414_v55, 1 }
  0x3b   : > { %v5266_v47 = vpack.i.bf16 %v574_v41, %v534_v34  ;;  %v535_v59 = vrot.slane %v380_v63, 7  ;;  %v536_v6 = vrot.slane %v381_v39, 7  ;;  %v575_v8 = vrot.slane %v412_v1, 7  ;;  %v415_v34 = vld [vmem:[%s5033_s11 + $0x2b8] sm:$0xff] }
  0x3c   : > { %v576_v13 = vrot.slane %v413_v50, 7  ;;  %v5270_v14 = vpack.i.bf16 %v413_v50, %v381_v39  ;;  %v794_v16 = vsel %vm761_vm0, %v792_v48, %v793_v52  ;;  %v834_v19 = vsel %vm761_vm0, %v832_v28, %v833_v38 }
  0x3d   : > { %v537_v20 = vsel %vm504_vm1, %v535_v59, %v536_v6  ;;  %v5279_v41 = vpack.i.bf16 %v834_v19, %v794_v16  ;;  %v795_v39 = vrot.slane %v383_v27, 1  ;;  %v835_v50 = vrot.slane %v415_v34, 1  ;;  %v417_v27 = vld [vmem:[%s5033_s11 + $0x2c8] sm:$0xff]  ;;  %v418_v34 = vld [vmem:[%s5033_s11 + $0x2d0] sm:$0xff] }
  0x3e   : > { %3621 = vxpose.xlu1.b32.cont [6/16] (narrow) %v5149_v40, 16  ;;  %v577_v25 = vsel %vm504_vm1, %v575_v8, %v576_v13  ;;  %v538_v1 = vrot.slane %v382_v46, 7  ;;  %v578_v48 = vrot.slane %v414_v55, 7  ;;  %v5285_v28 = vpack.i.bf16 %v414_v55, %v382_v46  ;;  %v416_v46 = vld [vmem:[%s5033_s11 + $0x2c0] sm:$0xff] }
  0x3f   : > { %v5281_v63 = vpack.i.bf16 %v577_v25, %v537_v20  ;;  %v796_v59 = vsel %vm761_vm0, %v793_v52, %v795_v39  ;;  %v836_v8 = vsel %vm761_vm0, %v833_v38, %v835_v50  ;;  %v5293_v20 = vld [vmem:[%s5033_s11 + $0x1c8] sm:$0xff]  ;;  %v5296_v25 = vld [vmem:[%s5033_s11 + $0x1d0] sm:$0xff]  ;;  %v540_v39 = vrot.slane %v5301_v2, 7  ;;  %v5323_v2 = vld [vmem:[%s5033_s11 + $0x1d8] sm:$0xff] }
  0x40   : > { %v539_v16 = vsel %vm504_vm1, %v536_v6, %v538_v1  ;;  %v579_v19 = vsel %vm504_vm1, %v576_v13, %v578_v48  ;;  %7392 = vst [vmem:[#allocation9_spill] sm:$0xff] %v5293_v20  ;;  %v5304_v55 = vpack.i.bf16 %v836_v8, %v796_v59  ;;  %v797_v52 = vrot.slane %v5293_v20, 1 }
  0x41   : > { %3705 = vxpose.xlu2.b32.cont [6/16] (narrow) %v5162_v53, 16  ;;  %v5306_v0 = vpack.i.bf16 %v579_v19, %v539_v16  ;;  %v798_v38 = vrot.slane %v5296_v25, 1  ;;  %v837_v6 = vrot.slane %v417_v27, 1  ;;  %v838_v13 = vrot.slane %v418_v34, 1 }
  0x42   : > { %3663 = vxpose.xlu0.b32.cont [6/16] (narrow) %v5165_v57, 16  ;;  %v541_v50 = vrot.slane %v5293_v20, 7  ;;  %v580_v1 = vrot.slane %v416_v46, 7  ;;  %v581_v48 = vrot.slane %v417_v27, 7  ;;  %v5315_v59 = vpack.i.bf16 %v417_v27, %v5293_v20 }
  0x43   : > { %v799_v8 = vsel %vm761_vm0, %v797_v52, %v798_v38  ;;  %v839_v16 = vsel %vm761_vm0, %v837_v6, %v838_v13  ;;  %v800_v27 = vrot.slane %v5323_v2, 1  ;;  %v840_v20 = vrot.slane %v419_v54, 1 }
  0x44   : > { %v542_v19 = vsel %vm504_vm1, %v540_v39, %v541_v50  ;;  %v582_v36 = vsel %vm504_vm1, %v580_v1, %v581_v48  ;;  %v5326_v46 = vpack.i.bf16 %v839_v16, %v799_v8  ;;  %v543_v52 = vrot.slane %v5296_v25, 7 }
  0x45   : > { %v5329_v51 = vpack.i.bf16 %v582_v36, %v542_v19  ;;  %v583_v35 = vrot.slane %v418_v34, 7  ;;  %v5335_v6 = vpack.i.bf16 %v418_v34, %v5296_v25  ;;  %v801_v39 = vsel %vm761_vm0, %v798_v38, %v800_v27 }
  0x46   : > { %3623 = vxpose.xlu1.b32.cont [7/16] (narrow) %v5168_v7, 16  ;;  %v841_v1 = vsel %vm761_vm0, %v838_v13, %v840_v20  ;;  %v544_v36 = vsel %vm504_vm1, %v541_v50, %v543_v52  ;;  %v5409_v13 = vld [vmem:[%s5033_s11 + $0x2f8] sm:$0xff] }
  0x47   : > { %v584_v8 = vsel %vm504_vm1, %v581_v48, %v583_v35  ;;  %v5342_v16 = vpack.i.bf16 %v841_v1, %v801_v39  ;;  %v5389_v35 = vld [vmem:[%s5033_s11 + $0x2e8] sm:$0xff]  ;;  %v1080_v19 = vrot.slane %v5409_v13, 1 }
  0x48   : > { %v5345_v54 = vpack.i.bf16 %v584_v8, %v544_v36  ;;  %v3806_v20 = vpack.i.bf16 %v5389_v35, %v5038_v3 }
  0x49   : > { %3707 = vxpose.xlu2.b32.cont [7/16] (narrow) %v5177_v17, 16 }
  0x4a   : > { %3665 = vxpose.xlu0.b32.cont [7/16] (narrow) %v5180_v23, 16 }
  0x4e   : > { %3625 = vxpose.xlu1.b32.cont [8/16] (narrow) %v5187_v29, 16 }
  0x51   : > { %3709 = vxpose.xlu2.b32.cont [8/16] (narrow) %v5196_v43, 16 }
  0x52   : > { %3667 = vxpose.xlu0.b32.cont [8/16] (narrow) %v5198_v44, 16 }
  0x56   : > { %3627 = vxpose.xlu1.b32.cont [9/16] (narrow) %v5202_v60, 16 }
  0x59   : > { %3711 = vxpose.xlu2.b32.cont [9/16] (narrow) %v5211_v9, 16 }
  0x5a   : > { %3669 = vxpose.xlu0.b32.cont [9/16] (narrow) %v5213_v10, 16 }
  0x5e   : > { %3629 = vxpose.xlu1.b32.cont [10/16] (narrow) %v5217_v18, 16 }
  0x61   : > { %3713 = vxpose.xlu2.b32.cont [10/16] (narrow) %v5230_v45, 16 }
  0x62   : > { %3671 = vxpose.xlu0.b32.cont [10/16] (narrow) %v5232_v37, 16 }
  0x66   : > { %3631 = vxpose.xlu1.b32.cont [11/16] (narrow) %v5236_v61, 16 }
  0x69   : > { %3715 = vxpose.xlu2.b32.cont [11/16] (narrow) %v5245_v15, 16 }
  0x6a   : > { %3673 = vxpose.xlu0.b32.cont [11/16] (narrow) %v5248_v24, 16 }
  0x6e   : > { %3633 = vxpose.xlu1.b32.cont [12/16] (narrow) %v5255_v42, 16 }
  0x71   : > { %3717 = vxpose.xlu2.b32.cont [12/16] (narrow) %v5264_v5, 16 }
  0x72   : > { %3675 = vxpose.xlu0.b32.cont [12/16] (narrow) %v5266_v47, 16 }
  0x76   : > { %3635 = vxpose.xlu1.b32.cont [13/16] (narrow) %v5270_v14, 16 }
  0x79   : > { %3719 = vxpose.xlu2.b32.cont [13/16] (narrow) %v5279_v41, 16 }
  0x7a   : > { %3677 = vxpose.xlu0.b32.cont [13/16] (narrow) %v5281_v63, 16 }
  0x7e   : > { %3637 = vxpose.xlu1.b32.cont [14/16] (narrow) %v5285_v28, 16 }
  0x81   : > { %3721 = vxpose.xlu2.b32.cont [14/16] (narrow) %v5304_v55, 16 }
  0x82   : > { %3679 = vxpose.xlu0.b32.cont [14/16] (narrow) %v5306_v0, 16 }
  0x86   : > { %3639 = vxpose.xlu1.b32.cont [15/16] (narrow) %v5315_v59, 16 }
  0x89   : > { %3723 = vxpose.xlu2.b32.cont [15/16] (narrow) %v5326_v46, 16 }
  0x8a   : > { %3681 = vxpose.xlu0.b32.cont [15/16] (narrow) %v5329_v51, 16 }
  0x8e   : > { %3641 = vxpose.xlu1.b32.end [16/16] (narrow) %v5335_v6, 16 }
  0x91   : > { %3725 = vxpose.xlu2.b32.end [16/16] (narrow) %v5342_v16, 16 }
  0x92   : > { %3683 = vxpose.xlu0.b32.end [16/16] (narrow) %v5345_v54, 16 }
  0x96   : > { %3779 = vxpose.xlu1.b32.start [1/16] (narrow) %v5087_v49, 16  ;;  %v5392_v49 = vld [vmem:[%s5033_s11 + $0x2f0] sm:$0xff] }
  0x97   : > { %v944_v27 = vrot.slane %v5392_v49, 7  ;;  %v3808_v3 = vpack.i.bf16 %v5392_v49, %v5041_v4  ;;  %v5458_v4 = vld [vmem:[%s5033_s11 + $0x308] sm:$0xff] }
  0x99   : > { %3821 = vxpose.xlu2.b32.start [1/16] (narrow) %v5100_v56, 16  ;;  %v5395_v56 = vld [vmem:[%s5033_s11 + $0x2e0] sm:$0xff] }
  0x9a   : > { %3737 = vxpose.xlu0.b32.start [1/16] (narrow) %v5104_v58, 16  ;;  %v1077_v58 = vrot.slane %v5389_v35, 1 }
  0x9e   : > { %3781 = vxpose.xlu1.b32.cont [2/16] (narrow) %v5109_v62, 16  ;;  %v1078_v62 = vrot.slane %v5392_v49, 1 }
  0xa0   : > { %v1079_v34 = vsel %vm761_vm0, %v1077_v58, %v1078_v62  ;;  %v1081_v52 = vsel %vm761_vm0, %v1078_v62, %v1080_v19 }
  0xa1   : > { %3823 = vxpose.xlu2.b32.cont [2/16] (narrow) %v5127_v11, 16  ;;  %v941_v11 = vrot.slane %v5395_v56, 7  ;;  %v3848_v50 = vpack.i.bf16 %v1079_v34, %v5053_v21  ;;  %v3850_v1 = vpack.i.bf16 %v1081_v52, %v5065_v30  ;;  %v5464_v30 = vld [vmem:[%s5033_s11 + $0x300] sm:$0xff] }
  0xa2   : > { %3739 = vxpose.xlu0.b32.cont [2/16] (narrow) %v5130_v12, 16  ;;  %v942_v12 = vrot.slane %v5389_v35, 7 }
  0xa4   : > { %v943_v38 = vsel %vm504_vm1, %v941_v11, %v942_v12  ;;  %v945_v39 = vsel %vm504_vm1, %v942_v12, %v944_v27  ;;  %v355_v11 = vld [vmem:[%s5033_s11 + $0xd8] sm:$0xff] }
  0xa5   : > { %v3764_v48 = vpack.i.bf16 %v943_v38, %v5059_v26  ;;  %v3766_v21 = vpack.i.bf16 %v945_v39, %v5069_v32  ;;  %v5461_v26 = vld [vmem:[%s5033_s11 + $0x310] sm:$0xff]  ;;  %v1287_v32 = vrot.slane %v5458_v4, 1  ;;  %v1607_v34 = vrot.slane %v355_v11, 2  ;;  %v5592_v11 = vld [vmem:[%s5033_s11 + $0x208] sm:$0xff] }
  0xa6   : > { %3783 = vxpose.xlu1.b32.cont [3/16] (narrow) %v5134_v22, 16  ;;  %v1647_v38 = vrot.slane %v5323_v2, 2  ;;  %7413 = vst [vmem:[#allocation14_spill] sm:$0xff] %v5592_v11 }
  0xa9   : > { %3825 = vxpose.xlu2.b32.cont [3/16] (narrow) %v5143_v31, 16 }
  0xaa   : > { %3741 = vxpose.xlu0.b32.cont [3/16] (narrow) %v5146_v33, 16 }
  0xae   : > { %3785 = vxpose.xlu1.b32.cont [4/16] (narrow) %v5149_v40, 16 }
  0xb1   : > { %3827 = vxpose.xlu2.b32.cont [4/16] (narrow) %v5162_v53, 16 }
  0xb2   : > { %3743 = vxpose.xlu0.b32.cont [4/16] (narrow) %v5165_v57, 16 }
  0xb6   : > { %3787 = vxpose.xlu1.b32.cont [5/16] (narrow) %v5168_v7, 16 }
  0xb9   : > { %3829 = vxpose.xlu2.b32.cont [5/16] (narrow) %v5177_v17, 16 }
  0xba   : > { %3745 = vxpose.xlu0.b32.cont [5/16] (narrow) %v5180_v23, 16 }
  0xbe   : > { %3789 = vxpose.xlu1.b32.cont [6/16] (narrow) %v5187_v29, 16 }
  0xc1   : > { %3831 = vxpose.xlu2.b32.cont [6/16] (narrow) %v5196_v43, 16 }
  0xc2   : > { %3747 = vxpose.xlu0.b32.cont [6/16] (narrow) %v5198_v44, 16 }
  0xc6   : > { %3791 = vxpose.xlu1.b32.cont [7/16] (narrow) %v5202_v60, 16 }
  0xc9   : > { %3833 = vxpose.xlu2.b32.cont [7/16] (narrow) %v5211_v9, 16 }
  0xca   : > { %3749 = vxpose.xlu0.b32.cont [7/16] (narrow) %v5213_v10, 16 }
  0xce   : > { %3793 = vxpose.xlu1.b32.cont [8/16] (narrow) %v5217_v18, 16 }
  0xd1   : > { %3835 = vxpose.xlu2.b32.cont [8/16] (narrow) %v5230_v45, 16 }
  0xd2   : > { %3751 = vxpose.xlu0.b32.cont [8/16] (narrow) %v5232_v37, 16 }
  0xd6   : > { %3795 = vxpose.xlu1.b32.cont [9/16] (narrow) %v5236_v61, 16 }
  0xd9   : > { %3837 = vxpose.xlu2.b32.cont [9/16] (narrow) %v5245_v15, 16 }
  0xda   : > { %3753 = vxpose.xlu0.b32.cont [9/16] (narrow) %v5248_v24, 16 }
  0xde   : > { %3797 = vxpose.xlu1.b32.cont [10/16] (narrow) %v5255_v42, 16 }
  0xe1   : > { %3839 = vxpose.xlu2.b32.cont [10/16] (narrow) %v5264_v5, 16 }
  0xe2   : > { %3755 = vxpose.xlu0.b32.cont [10/16] (narrow) %v5266_v47, 16 }
  0xe6   : > { %3799 = vxpose.xlu1.b32.cont [11/16] (narrow) %v5270_v14, 16 }
  0xe9   : > { %3841 = vxpose.xlu2.b32.cont [11/16] (narrow) %v5279_v41, 16 }
  0xea   : > { %3757 = vxpose.xlu0.b32.cont [11/16] (narrow) %v5281_v63, 16 }
  0xee   : > { %3801 = vxpose.xlu1.b32.cont [12/16] (narrow) %v5285_v28, 16 }
  0xf1   : > { %3843 = vxpose.xlu2.b32.cont [12/16] (narrow) %v5304_v55, 16 }
  0xf2   : > { %3759 = vxpose.xlu0.b32.cont [12/16] (narrow) %v5306_v0, 16 }
  0xf6   : > { %3803 = vxpose.xlu1.b32.cont [13/16] (narrow) %v5315_v59, 16 }
  0xf9   : > { %3845 = vxpose.xlu2.b32.cont [13/16] (narrow) %v5326_v46, 16 }
  0xfa   : > { %3761 = vxpose.xlu0.b32.cont [13/16] (narrow) %v5329_v51, 16 }
  0xfe   : > { %3805 = vxpose.xlu1.b32.cont [14/16] (narrow) %v5335_v6, 16 }
 0x101   : > { %3847 = vxpose.xlu2.b32.cont [14/16] (narrow) %v5342_v16, 16 }
 0x102   : > { %3763 = vxpose.xlu0.b32.cont [14/16] (narrow) %v5345_v54, 16 }
 0x106   : > { %3807 = vxpose.xlu1.b32.cont [15/16] (narrow) %v3806_v20, 16 }
 0x109   : > { %3849 = vxpose.xlu2.b32.cont [15/16] (narrow) %v3848_v50, 16 }
 0x10a   : > { %3765 = vxpose.xlu0.b32.cont [15/16] (narrow) %v3764_v48, 16 }
 0x10e   : > { %3809 = vxpose.xlu1.b32.end [16/16] (narrow) %v3808_v3, 16 }
 0x111   : > { %3851 = vxpose.xlu2.b32.end [16/16] (narrow) %v3850_v1, 16 }
 0x112   : > { %3767 = vxpose.xlu0.b32.end [16/16] (narrow) %v3766_v21, 16 }
 0x116   : > { %3905 = vxpose.xlu1.b32.start [1/16] (narrow) %v5134_v22, 16  ;;  %v1152_v22 = vrot.slane %v5458_v4, 7 }
 0x119   : > { %3947 = vxpose.xlu2.b32.start [1/16] (narrow) %v5143_v31, 16  ;;  %v7394_v31 = vld [vmem:[#allocation3_spill] sm:$0xff] }
 0x11a   : > { %3863 = vxpose.xlu0.b32.start [1/16] (narrow) %v5146_v33, 16  ;;  %v3932_v33 = vpack.i.bf16 %v5458_v4, %v7394_v31  ;;  %v5542_v31 = vld [vmem:[%s5033_s11 + $0x1f0] sm:$0xff] }
 0x11e   : > { %3907 = vxpose.xlu1.b32.cont [2/16] (narrow) %v5149_v40, 16 }
 0x121   : > { %3949 = vxpose.xlu2.b32.cont [2/16] (narrow) %v5162_v53, 16  ;;  %v427_v53 = vld [vmem:[%s5033_s11 + $0x318] sm:$0xff] }
 0x122   : > { %3865 = vxpose.xlu0.b32.cont [2/16] (narrow) %v5165_v57, 16 }
 0x126   : > { %3909 = vxpose.xlu1.b32.cont [3/16] (narrow) %v5168_v7, 16  ;;  %v7395_v7 = vld [vmem:[#allocation5_spill] sm:$0xff] }
 0x129   : > { %3951 = vxpose.xlu2.b32.cont [3/16] (narrow) %v5177_v17, 16 }
 0x12a   : > { %3867 = vxpose.xlu0.b32.cont [3/16] (narrow) %v5180_v23, 16  ;;  %v1290_v23 = vrot.slane %v427_v53, 1 }
 0x12e   : > { %3911 = vxpose.xlu1.b32.cont [4/16] (narrow) %v5187_v29, 16  ;;  %v1154_v29 = vrot.slane %v5461_v26, 7 }
 0x131   : > { %3953 = vxpose.xlu2.b32.cont [4/16] (narrow) %v5196_v43, 16  ;;  %v7396_v43 = vld [vmem:[#allocation6_spill] sm:$0xff] }
 0x132   : > { %3869 = vxpose.xlu0.b32.cont [4/16] (narrow) %v5198_v44, 16 }
 0x136   : > { %3913 = vxpose.xlu1.b32.cont [5/16] (narrow) %v5202_v60, 16 }
 0x139   : > { %3955 = vxpose.xlu2.b32.cont [5/16] (narrow) %v5211_v9, 16  ;;  %v1155_v9 = vsel %vm504_vm1, %v1152_v22, %v1154_v29 }
 0x13a   : > { %3871 = vxpose.xlu0.b32.cont [5/16] (narrow) %v5213_v10, 16  ;;  %v7397_v10 = vld [vmem:[#allocation4_spill] sm:$0xff] }
 0x13e   : > { %3915 = vxpose.xlu1.b32.cont [6/16] (narrow) %v5217_v18, 16  ;;  %v3934_v18 = vpack.i.bf16 %v5461_v26, %v7397_v10  ;;  %v4803_v10 = vld [vmem:[%s5033_s11 + $0xf8] sm:$0xff] }
 0x141   : > { %3957 = vxpose.xlu2.b32.cont [6/16] (narrow) %v5230_v45, 16  ;;  %v5483_v45 = vld [vmem:[%s5033_s11 + $0xc8] sm:$0xff] }
 0x142   : > { %3873 = vxpose.xlu0.b32.cont [6/16] (narrow) %v5232_v37, 16  ;;  %7398 = vst [vmem:[#allocation3_spill] sm:$0xff] %v5483_v45  ;;  %v5486_v37 = vld [vmem:[%s5033_s11 + $0xd0] sm:$0xff] }
 0x143   : > { %7399 = vst [vmem:[#allocation5_spill] sm:$0xff] %v5486_v37  ;;  %v4032_v19 = vpack.i.bf16 %v5296_v25, %v5486_v37 }
 0x146   : > { %3917 = vxpose.xlu1.b32.cont [7/16] (narrow) %v5236_v61, 16  ;;  %v5489_v61 = vld [vmem:[%s5033_s11 + $0xc0] sm:$0xff] }
 0x147   : > { %7400 = vst [vmem:[#allocation6_spill] sm:$0xff] %v5489_v61 }
 0x149   : > { %3959 = vxpose.xlu2.b32.cont [7/16] (narrow) %v5245_v15, 16  ;;  %v7401_v15 = vld [vmem:[#allocation7_spill] sm:$0xff] }
 0x14a   : > { %3875 = vxpose.xlu0.b32.cont [7/16] (narrow) %v5248_v24, 16 }
 0x14e   : > { %3919 = vxpose.xlu1.b32.cont [8/16] (narrow) %v5255_v42, 16  ;;  %v7402_v42 = vld [vmem:[#allocation8_spill] sm:$0xff] }
 0x151   : > { %3961 = vxpose.xlu2.b32.cont [8/16] (narrow) %v5264_v5, 16  ;;  %v3892_v5 = vpack.i.bf16 %v1155_v9, %v7402_v42 }
 0x152   : > { %3877 = vxpose.xlu0.b32.cont [8/16] (narrow) %v5266_v47, 16  ;;  %v1604_v47 = vrot.slane %v5483_v45, 2 }
 0x156   : > { %3921 = vxpose.xlu1.b32.cont [9/16] (narrow) %v5270_v14, 16  ;;  %v1605_v14 = vrot.slane %v5486_v37, 2 }
 0x158   : > { %v1608_v27 = vsel %vm1603_vm2, %v1605_v14, %v1607_v34 }
 0x159   : > { %3963 = vxpose.xlu2.b32.cont [9/16] (narrow) %v5279_v41, 16  ;;  %v7403_v41 = vld [vmem:[#allocation9_spill] sm:$0xff] }
 0x15a   : > { %3879 = vxpose.xlu0.b32.cont [9/16] (narrow) %v5281_v63, 16  ;;  %v1644_v63 = vrot.slane %v7403_v41, 2  ;;  %v1403_v36 = vrot.slane %v7403_v41, 6  ;;  %v4030_v8 = vpack.i.bf16 %v7403_v41, %v5483_v45  ;;  %7408 = vst [vmem:[#allocation9_spill] sm:$0xff] %v5542_v31 }
 0x15e   : > { %3923 = vxpose.xlu1.b32.cont [10/16] (narrow) %v5285_v28, 16  ;;  %v1645_v28 = vrot.slane %v5296_v25, 2 }
 0x161   : > { %3965 = vxpose.xlu2.b32.cont [10/16] (narrow) %v5304_v55, 16  ;;  %v1362_v55 = vrot.slane %v5489_v61, 6 }
 0x162   : > { %3881 = vxpose.xlu0.b32.cont [10/16] (narrow) %v5306_v0, 16  ;;  %v1151_v0 = vrot.slane %v5464_v30, 7 }
 0x164   : > { %v1153_v57 = vsel %vm504_vm1, %v1151_v0, %v1152_v22  ;;  %v5538_v0 = vld [vmem:[%s5033_s11 + $0x1e8] sm:$0xff] }
 0x165   : > { %v3890_v44 = vpack.i.bf16 %v1153_v57, %v7396_v43  ;;  %7407 = vst [vmem:[#allocation8_spill] sm:$0xff] %v5538_v0  ;;  %v1649_v22 = vrot.slane %v5538_v0, 2 }
 0x166   : > { %3925 = vxpose.xlu1.b32.cont [11/16] (narrow) %v5315_v59, 16  ;;  %v1363_v59 = vrot.slane %v5483_v45, 6 }
 0x168   : > { %v1364_v58 = vsel %vm1361_vm3, %v1362_v55, %v1363_v59 }
 0x169   : > { %3967 = vxpose.xlu2.b32.cont [11/16] (narrow) %v5326_v46, 16  ;;  %v7404_v46 = vld [vmem:[#allocation10_spill] sm:$0xff] }
 0x16a   : > { %3883 = vxpose.xlu0.b32.cont [11/16] (narrow) %v5329_v51, 16  ;;  %v1288_v51 = vrot.slane %v5461_v26, 1 }
 0x16c   : > { %v1289_v40 = vsel %vm761_vm0, %v1287_v32, %v1288_v51  ;;  %v1291_v60 = vsel %vm761_vm0, %v1288_v51, %v1290_v23  ;;  %v5534_v32 = vld [vmem:[%s5033_s11 + $0xf0] sm:$0xff]  ;;  %v1408_v23 = vrot.slane %v5538_v0, 6 }
 0x16d   : > { %v3974_v17 = vpack.i.bf16 %v1289_v40, %v7395_v7  ;;  %v3976_v24 = vpack.i.bf16 %v1291_v60, %v7401_v15  ;;  %7406 = vst [vmem:[#allocation7_spill] sm:$0xff] %v5534_v32  ;;  %v1610_v51 = vrot.slane %v5534_v32, 2  ;;  %v5546_v40 = vld [vmem:[%s5033_s11 + $0xe0] sm:$0xff] }
 0x16e   : > { %3927 = vxpose.xlu1.b32.cont [12/16] (narrow) %v5335_v6, 16  ;;  %v1402_v6 = vrot.slane %v7404_v46, 6  ;;  %7409 = vst [vmem:[#allocation10_spill] sm:$0xff] %v5546_v40  ;;  %v1367_v53 = vrot.slane %v5546_v40, 6  ;;  %v5551_v7 = vld [vmem:[%s5033_s11 + $0x1e0] sm:$0xff]  ;;  %v4844_v40 = vld [vmem:[%s5033_s11 + $0x298] sm:$0xff] }
 0x16f   : > { %7410 = vst [vmem:[#allocation11_spill] sm:$0xff] %v5551_v7 }
 0x170   : > { %v5509_v62 = vsel %vm1361_vm3, %v1402_v6, %v1403_v36 }
 0x171   : > { %3969 = vxpose.xlu2.b32.cont [12/16] (narrow) %v5342_v16, 16  ;;  %v1606_v16 = vsel %vm1603_vm2, %v1604_v47, %v1605_v14  ;;  %v1410_v47 = vrot.slane %v5542_v31, 6 }
 0x172   : > { %3885 = vxpose.xlu0.b32.cont [12/16] (narrow) %v5345_v54, 16  ;;  %v5505_v54 = vsel %vm1603_vm2, %v1644_v63, %v1645_v28 }
 0x173   : > { %v4072_v12 = vpack.i.bf16 %v5505_v54, %v1606_v16  ;;  %v5577_v55 = vsel %vm1361_vm3, %v1408_v23, %v1410_v47  ;;  %v5588_v16 = vld [vmem:[%s5033_s11 + $0x110] sm:$0xff] }
 0x174   : > { %7412 = vst [vmem:[#allocation13_spill] sm:$0xff] %v5588_v16 }
 0x176   : > { %3929 = vxpose.xlu1.b32.cont [13/16] (narrow) %v3806_v20, 16  ;;  %v3988_v20 = vpack.i.bf16 %v5509_v62, %v1364_v58  ;;  %v1615_v58 = vrot.slane %v5588_v16, 2 }
 0x179   : > { %3971 = vxpose.xlu2.b32.cont [13/16] (narrow) %v3848_v50, 16  ;;  %v1365_v50 = vrot.slane %v5486_v37, 6  ;;  %v5901_v37 = vld [vmem:[%s5033_s11 + $0x1b0] sm:$0xff] }
 0x17a   : > { %3887 = vxpose.xlu0.b32.cont [13/16] (narrow) %v3764_v48, 16  ;;  %v1405_v48 = vrot.slane %v5296_v25, 6 }
 0x17b   : > { %v1366_v52 = vsel %vm1361_vm3, %v1363_v59, %v1365_v50  ;;  %v4036_v59 = vpack.i.bf16 %v5542_v31, %v5534_v32 }
 0x17c   : > { %v5525_v2 = vsel %vm1361_vm3, %v1403_v36, %v1405_v48  ;;  %v5584_v36 = vld [vmem:[%s5033_s11 + $0x108] sm:$0xff] }
 0x17d   : > { %7411 = vst [vmem:[#allocation12_spill] sm:$0xff] %v5584_v36  ;;  %v1373_v48 = vrot.slane %v5584_v36, 6 }
 0x17e   : > { %3931 = vxpose.xlu1.b32.cont [14/16] (narrow) %v3808_v3, 16  ;;  %v5521_v3 = vsel %vm1603_vm2, %v1645_v28, %v1647_v38  ;;  %v5600_v38 = vld [vmem:[%s5033_s11 + $0x100] sm:$0xff] }
 0x17f   : > { %v4074_v39 = vpack.i.bf16 %v5521_v3, %v1608_v27  ;;  %7415 = vst [vmem:[#allocation16_spill] sm:$0xff] %v5600_v38  ;;  %v1372_v50 = vrot.slane %v5600_v38, 6 }
 0x181   : > { %3973 = vxpose.xlu2.b32.cont [14/16] (narrow) %v3850_v1, 16  ;;  %v3990_v1 = vpack.i.bf16 %v5525_v2, %v1366_v52  ;;  %v1413_v52 = vrot.slane %v5592_v11, 6 }
 0x182   : > { %3889 = vxpose.xlu0.b32.cont [14/16] (narrow) %v3766_v21, 16  ;;  %v5530_v21 = vld [vmem:[%s5033_s11 + $0xe8] sm:$0xff] }
 0x183   : > { %7405 = vst [vmem:[#allocation4_spill] sm:$0xff] %v5530_v21  ;;  %v1609_v25 = vrot.slane %v5530_v21, 2  ;;  %v1368_v57 = vrot.slane %v5530_v21, 6  ;;  %v4034_v29 = vpack.i.bf16 %v5538_v0, %v5530_v21  ;;  %v5875_v21 = vld [vmem:[%s5033_s11 + $0x198] sm:$0xff] }
 0x184   : > { %7446 = vst [vmem:[#allocation47_spill] sm:$0xff] %v5875_v21 }
 0x185   : > { %v1611_v43 = vsel %vm1603_vm2, %v1609_v25, %v1610_v51  ;;  %v1369_v60 = vsel %vm1361_vm3, %v1367_v53, %v1368_v57 }
 0x186   : > { %3933 = vxpose.xlu1.b32.cont [15/16] (narrow) %v3932_v33, 16  ;;  %v1650_v33 = vrot.slane %v5542_v31, 2 }
 0x189   : > { %3975 = vxpose.xlu2.b32.cont [15/16] (narrow) %v3974_v17, 16  ;;  %v1407_v17 = vrot.slane %v5551_v7, 6 }
 0x18a   : > { %3891 = vxpose.xlu0.b32.cont [15/16] (narrow) %v3890_v44, 16  ;;  %v5559_v44 = vsel %vm1603_vm2, %v1649_v22, %v1650_v33 }
 0x18b   : > { %v5563_v9 = vsel %vm1361_vm3, %v1407_v17, %v1408_v23  ;;  %v4076_v15 = vpack.i.bf16 %v5559_v44, %v1611_v43  ;;  %v4812_v23 = vld [vmem:[%s5033_s11 + $0x218] sm:$0xff]  ;;  %v1375_v43 = vrot.slane %v5588_v16, 6 }
 0x18c   : > { %v3992_v14 = vpack.i.bf16 %v5563_v9, %v1369_v60 }
 0x18e   : > { %3935 = vxpose.xlu1.b32.end [16/16] (narrow) %v3934_v18, 16  ;;  %v1612_v18 = vrot.slane %v4803_v10, 2 }
 0x190   : > { %v1613_v41 = vsel %vm1603_vm2, %v1610_v51, %v1612_v18  ;;  %v1374_v51 = vsel %vm1361_vm3, %v1372_v50, %v1373_v48 }
 0x191   : > { %3977 = vxpose.xlu2.b32.end [16/16] (narrow) %v3976_v24, 16  ;;  %v4804_v24 = vld [vmem:[%s5033_s11 + $0x1f8] sm:$0xff] }
 0x192   : > { %3893 = vxpose.xlu0.b32.end [16/16] (narrow) %v3892_v5, 16  ;;  %v1652_v42 = vrot.slane %v4804_v24, 2  ;;  %v1370_v5 = vrot.slane %v5534_v32, 6  ;;  %v1376_v24 = vsel %vm1361_vm3, %v1373_v48, %v1375_v43  ;;  %v5669_v48 = vld [vmem:[%s5033_s11 + $0x220] sm:$0xff] }
 0x193   : > { %7424 = vst [vmem:[#allocation25_spill] sm:$0xff] %v5669_v48 }
 0x194   : > { %v5573_v63 = vsel %vm1603_vm2, %v1650_v33, %v1652_v42  ;;  %v1371_v28 = vsel %vm1361_vm3, %v1368_v57, %v1370_v5  ;;  %v4811_v57 = vld [vmem:[%s5033_s11 + $0x118] sm:$0xff] }
 0x195   : > { %v4078_v46 = vpack.i.bf16 %v5573_v63, %v1613_v41  ;;  %v3994_v6 = vpack.i.bf16 %v5577_v55, %v1371_v28  ;;  %v1617_v17 = vrot.slane %v4811_v57, 2  ;;  %v5652_v28 = vld [vmem:[%s5033_s11 + $0x130] sm:$0xff] }
 0x196   : > { %4031 = vxpose.xlu1.b32.start [1/16] (narrow) %v4030_v8, 16  ;;  %v1614_v8 = vrot.slane %v5584_v36, 2  ;;  %7420 = vst [vmem:[#allocation21_spill] sm:$0xff] %v5652_v28 }
 0x197   : > { %v1618_v18 = vsel %vm1603_vm2, %v1615_v58, %v1617_v17 }
 0x199   : > { %4073 = vxpose.xlu2.b32.start [1/16] (narrow) %v4072_v12, 16  ;;  %v1654_v12 = vrot.slane %v5592_v11, 2 }
 0x19a   : > { %3989 = vxpose.xlu0.b32.start [1/16] (narrow) %v3988_v20, 16  ;;  %v5596_v20 = vld [vmem:[%s5033_s11 + $0x210] sm:$0xff] }
 0x19b   : > { %7414 = vst [vmem:[#allocation15_spill] sm:$0xff] %v5596_v20  ;;  %v1655_v34 = vrot.slane %v5596_v20, 2  ;;  %v1415_v60 = vrot.slane %v5596_v20, 6  ;;  %v4040_v10 = vpack.i.bf16 %v5596_v20, %v5588_v16 }
 0x19d   : > { %v5613_v25 = vsel %vm1603_vm2, %v1654_v12, %v1655_v34  ;;  %v5639_v42 = vsel %vm1361_vm3, %v1413_v52, %v1415_v60  ;;  %v5664_v12 = vld [vmem:[%s5033_s11 + $0x120] sm:$0xff]  ;;  %v4820_v60 = vld [vmem:[%s5033_s11 + $0x238] sm:$0xff] }
 0x19e   : > { %4033 = vxpose.xlu1.b32.cont [2/16] (narrow) %v4032_v19, 16  ;;  %v5605_v19 = vld [vmem:[%s5033_s11 + $0x200] sm:$0xff]  ;;  %7417 = vst [vmem:[#allocation18_spill] sm:$0xff] %v5613_v25  ;;  %v5645_v47 = vpack.i.bf16 %v5639_v42, %v1376_v24 }
 0x19f   : > { %7416 = vst [vmem:[#allocation17_spill] sm:$0xff] %v5605_v19  ;;  %v1412_v27 = vrot.slane %v5605_v19, 6 }
 0x1a0   : > { %7423 = vst [vmem:[#allocation24_spill] sm:$0xff] %v5664_v12 }
 0x1a1   : > { %4075 = vxpose.xlu2.b32.cont [2/16] (narrow) %v4074_v39, 16  ;;  %v4038_v39 = vpack.i.bf16 %v5592_v11, %v5584_v36  ;;  %v5617_v22 = vsel %vm1361_vm3, %v1412_v27, %v1413_v52  ;;  %v1417_v27 = vrot.slane %v5669_v48, 6  ;;  %v4827_v48 = vld [vmem:[%s5033_s11 + $0x158] sm:$0xff] }
 0x1a2   : > { %3991 = vxpose.xlu0.b32.cont [2/16] (narrow) %v3990_v1, 16  ;;  %v1616_v1 = vsel %vm1603_vm2, %v1614_v8, %v1615_v58  ;;  %v5623_v53 = vpack.i.bf16 %v5617_v22, %v1374_v51  ;;  %v5660_v8 = vld [vmem:[%s5033_s11 + $0x230] sm:$0xff]  ;;  %v4835_v11 = vld [vmem:[%s5033_s11 + $0x178] sm:$0xff] }
 0x1a3   : > { %v5620_v33 = vpack.i.bf16 %v5613_v25, %v1616_v1  ;;  %7422 = vst [vmem:[#allocation23_spill] sm:$0xff] %v5660_v8  ;;  %v1660_v58 = vrot.slane %v5660_v8, 2  ;;  %v1420_v24 = vrot.slane %v5660_v8, 6  ;;  %v4836_v36 = vld [vmem:[%s5033_s11 + $0x278] sm:$0xff] }
 0x1a6   : > { %4035 = vxpose.xlu1.b32.cont [3/16] (narrow) %v4034_v29, 16  ;;  %v1657_v29 = vrot.slane %v4812_v23, 2  ;;  %v4819_v23 = vld [vmem:[%s5033_s11 + $0x138] sm:$0xff] }
 0x1a9   : > { %4077 = vxpose.xlu2.b32.cont [3/16] (narrow) %v4076_v15, 16  ;;  %v5635_v15 = vsel %vm1603_vm2, %v1655_v34, %v1657_v29  ;;  %v1377_v34 = vrot.slane %v5664_v12, 6  ;;  %v1622_v29 = vrot.slane %v4819_v23, 2  ;;  %v5718_v23 = vld [vmem:[%s5033_s11 + $0x150] sm:$0xff] }
 0x1aa   : > { %3993 = vxpose.xlu0.b32.cont [3/16] (narrow) %v3992_v14, 16  ;;  %7418 = vst [vmem:[#allocation19_spill] sm:$0xff] %v5635_v15  ;;  %v5642_v5 = vpack.i.bf16 %v5635_v15, %v1618_v18  ;;  %v5648_v14 = vld [vmem:[%s5033_s11 + $0x128] sm:$0xff]  ;;  %v1380_v18 = vrot.slane %v5652_v28, 6 }
 0x1ab   : > { %7419 = vst [vmem:[#allocation20_spill] sm:$0xff] %v5648_v14  ;;  %v1619_v41 = vrot.slane %v5648_v14, 2  ;;  %v1378_v50 = vrot.slane %v5648_v14, 6 }
 0x1ac   : > { %7428 = vst [vmem:[#allocation29_spill] sm:$0xff] %v5718_v23 }
 0x1ad   : > { %v1379_v57 = vsel %vm1361_vm3, %v1377_v34, %v1378_v50 }
 0x1ae   : > { %4037 = vxpose.xlu1.b32.cont [4/16] (narrow) %v4036_v59, 16  ;;  %v1620_v59 = vrot.slane %v5652_v28, 2 }
 0x1b0   : > { %v1621_v1 = vsel %vm1603_vm2, %v1619_v41, %v1620_v59 }
 0x1b1   : > { %4079 = vxpose.xlu2.b32.cont [4/16] (narrow) %v4078_v46, 16  ;;  %v5656_v46 = vld [vmem:[%s5033_s11 + $0x228] sm:$0xff] }
 0x1b2   : > { %3995 = vxpose.xlu0.b32.cont [4/16] (narrow) %v3994_v6, 16  ;;  %7421 = vst [vmem:[#allocation22_spill] sm:$0xff] %v5656_v46  ;;  %v1659_v6 = vrot.slane %v5656_v46, 2  ;;  %v1418_v52 = vrot.slane %v5656_v46, 6 }
 0x1b4   : > { %v5679_v51 = vsel %vm1603_vm2, %v1659_v6, %v1660_v58  ;;  %v5683_v17 = vsel %vm1361_vm3, %v1417_v27, %v1418_v52  ;;  %v1623_v6 = vsel %vm1603_vm2, %v1620_v59, %v1622_v29  ;;  %v1381_v27 = vsel %vm1361_vm3, %v1378_v50, %v1380_v18  ;;  %v5722_v29 = vld [vmem:[%s5033_s11 + $0x248] sm:$0xff] }
 0x1b5   : > { %7425 = vst [vmem:[#allocation26_spill] sm:$0xff] %v5679_v51  ;;  %v5687_v43 = vpack.i.bf16 %v5679_v51, %v1621_v1  ;;  %v5693_v41 = vpack.i.bf16 %v5683_v17, %v1379_v57  ;;  %v4044_v1 = vpack.i.bf16 %v5660_v8, %v5652_v28  ;;  %v1423_v51 = vrot.slane %v5722_v29, 6 }
 0x1b6   : > { %4039 = vxpose.xlu1.b32.cont [5/16] (narrow) %v4038_v39, 16  ;;  %v4042_v39 = vpack.i.bf16 %v5656_v46, %v5648_v14  ;;  %7429 = vst [vmem:[#allocation30_spill] sm:$0xff] %v5722_v29 }
 0x1b9   : > { %4081 = vxpose.xlu2.b32.cont [5/16] (narrow) %v5620_v33, 16 }
 0x1ba   : > { %3997 = vxpose.xlu0.b32.cont [5/16] (narrow) %v5623_v53, 16 }
 0x1be   : > { %4041 = vxpose.xlu1.b32.cont [6/16] (narrow) %v4040_v10, 16  ;;  %v1662_v10 = vrot.slane %v4820_v60, 2  ;;  %v1664_v60 = vrot.slane %v5722_v29, 2 }
 0x1c0   : > { %v5698_v34 = vsel %vm1603_vm2, %v1660_v58, %v1662_v10  ;;  %v5714_v58 = vld [vmem:[%s5033_s11 + $0x148] sm:$0xff]  ;;  %v5726_v10 = vld [vmem:[%s5033_s11 + $0x250] sm:$0xff] }
 0x1c1   : > { %4083 = vxpose.xlu2.b32.cont [6/16] (narrow) %v5642_v5, 16  ;;  %7426 = vst [vmem:[#allocation27_spill] sm:$0xff] %v5698_v34  ;;  %v5708_v59 = vpack.i.bf16 %v5698_v34, %v1623_v6  ;;  %v1624_v50 = vrot.slane %v5714_v58, 2  ;;  %v1665_v18 = vrot.slane %v5726_v10, 2  ;;  %v5742_v15 = vpack.i.bf16 %v5722_v29, %v5714_v58 }
 0x1c2   : > { %3999 = vxpose.xlu0.b32.cont [6/16] (narrow) %v5645_v47, 16  ;;  %7427 = vst [vmem:[#allocation28_spill] sm:$0xff] %v5714_v58  ;;  %v1627_v29 = vrot.slane %v4827_v48, 2 }
 0x1c3   : > { %7430 = vst [vmem:[#allocation31_spill] sm:$0xff] %v5726_v10 }
 0x1c6   : > { %4043 = vxpose.xlu1.b32.cont [7/16] (narrow) %v4042_v39, 16  ;;  %v5702_v39 = vsel %vm1361_vm3, %v1418_v52, %v1420_v24  ;;  %v1625_v52 = vrot.slane %v5718_v23, 2  ;;  %v5730_v24 = vld [vmem:[%s5033_s11 + $0x140] sm:$0xff] }
 0x1c7   : > { %v5711_v57 = vpack.i.bf16 %v5702_v39, %v1381_v27  ;;  %7431 = vst [vmem:[#allocation32_spill] sm:$0xff] %v5730_v24  ;;  %v1382_v6 = vrot.slane %v5730_v24, 6  ;;  %v1383_v27 = vrot.slane %v5714_v58, 6  ;;  %v1666_v24 = vsel %vm1603_vm2, %v1664_v60, %v1665_v18  ;;  %v4828_v58 = vld [vmem:[%s5033_s11 + $0x258] sm:$0xff] }
 0x1c8   : > { %v1626_v25 = vsel %vm1603_vm2, %v1624_v50, %v1625_v52  ;;  %v1667_v14 = vrot.slane %v4828_v58, 2  ;;  %v1385_v50 = vrot.slane %v5718_v23, 6  ;;  %v1425_v60 = vrot.slane %v5726_v10, 6 }
 0x1c9   : > { %4085 = vxpose.xlu2.b32.cont [7/16] (narrow) %v5687_v43, 16  ;;  %v1384_v8 = vsel %vm1361_vm3, %v1382_v6, %v1383_v27  ;;  %v5749_v46 = vpack.i.bf16 %v1666_v24, %v1626_v25  ;;  %v5761_v25 = vpack.i.bf16 %v5726_v10, %v5718_v23  ;;  %v5774_v6 = vld [vmem:[%s5033_s11 + $0x168] sm:$0xff]  ;;  %v5778_v23 = vld [vmem:[%s5033_s11 + $0x170] sm:$0xff] }
 0x1ca   : > { %4001 = vxpose.xlu0.b32.cont [7/16] (narrow) %v5693_v41, 16  ;;  %v1386_v48 = vsel %vm1361_vm3, %v1383_v27, %v1385_v50  ;;  %7434 = vst [vmem:[#allocation35_spill] sm:$0xff] %v5774_v6  ;;  %v1629_v10 = vrot.slane %v5774_v6, 2  ;;  %v5790_v27 = vld [vmem:[%s5033_s11 + $0x160] sm:$0xff] }
 0x1cb   : > { %7433 = vst [vmem:[#allocation34_spill] sm:$0xff] %v5761_v25  ;;  %v1387_v50 = vrot.slane %v5790_v27, 6 }
 0x1cc   : > { %7435 = vst [vmem:[#allocation36_spill] sm:$0xff] %v5778_v23 }
 0x1cd   : > { %7438 = vst [vmem:[#allocation39_spill] sm:$0xff] %v5790_v27 }
 0x1ce   : > { %4045 = vxpose.xlu1.b32.cont [8/16] (narrow) %v4044_v1, 16  ;;  %v5735_v1 = vld [vmem:[%s5033_s11 + $0x240] sm:$0xff] }
 0x1cf   : > { %7432 = vst [vmem:[#allocation33_spill] sm:$0xff] %v5735_v1  ;;  %v1422_v34 = vrot.slane %v5735_v1, 6 }
 0x1d1   : > { %4087 = vxpose.xlu2.b32.cont [8/16] (narrow) %v5708_v59, 16  ;;  %v1424_v28 = vsel %vm1361_vm3, %v1422_v34, %v1423_v51  ;;  %v1426_v34 = vsel %vm1361_vm3, %v1423_v51, %v1425_v60  ;;  %v5786_v51 = vld [vmem:[%s5033_s11 + $0x270] sm:$0xff]  ;;  %v1388_v60 = vrot.slane %v5774_v6, 6 }
 0x1d2   : > { %4003 = vxpose.xlu0.b32.cont [8/16] (narrow) %v5711_v57, 16  ;;  %v5751_v1 = vpack.i.bf16 %v1424_v28, %v1384_v8  ;;  %v1628_v28 = vsel %vm1603_vm2, %v1625_v52, %v1627_v29  ;;  %v1668_v8 = vsel %vm1603_vm2, %v1665_v18, %v1667_v14  ;;  %v5770_v24 = vpack.i.bf16 %v1426_v34, %v1386_v48  ;;  %v5782_v14 = vld [vmem:[%s5033_s11 + $0x268] sm:$0xff] }
 0x1d3   : > { %v5768_v58 = vpack.i.bf16 %v1668_v8, %v1628_v28  ;;  %v1630_v52 = vrot.slane %v5778_v23, 2  ;;  %7436 = vst [vmem:[#allocation37_spill] sm:$0xff] %v5782_v14  ;;  %v1669_v29 = vrot.slane %v5782_v14, 2  ;;  %v1670_v18 = vrot.slane %v5786_v51, 2  ;;  %v5795_v28 = vld [vmem:[%s5033_s11 + $0x260] sm:$0xff] }
 0x1d4   : > { %7437 = vst [vmem:[#allocation38_spill] sm:$0xff] %v5786_v51  ;;  %v1427_v8 = vrot.slane %v5795_v28, 6  ;;  %v1428_v48 = vrot.slane %v5782_v14, 6  ;;  %v5802_v34 = vpack.i.bf16 %v5782_v14, %v5774_v6  ;;  %v1389_v20 = vsel %vm1361_vm3, %v1387_v50, %v1388_v60 }
 0x1d5   : > { %7439 = vst [vmem:[#allocation40_spill] sm:$0xff] %v5795_v28  ;;  %v1631_v12 = vsel %vm1603_vm2, %v1629_v10, %v1630_v52  ;;  %v1671_v27 = vsel %vm1603_vm2, %v1669_v29, %v1670_v18  ;;  %v1632_v28 = vrot.slane %v4835_v11, 2  ;;  %v1672_v14 = vrot.slane %v4836_v36, 2 }
 0x1d6   : > { %4047 = vxpose.xlu1.b32.cont [9/16] (narrow) %v5742_v15, 16  ;;  %7440 = vst [vmem:[#allocation41_spill] sm:$0xff] %v5802_v34  ;;  %v1429_v16 = vsel %vm1361_vm3, %v1427_v8, %v1428_v48  ;;  %v5810_v19 = vpack.i.bf16 %v1671_v27, %v1631_v12  ;;  %v1390_v6 = vrot.slane %v5778_v23, 6  ;;  %v1430_v10 = vrot.slane %v5786_v51, 6  ;;  %v5846_v8 = vld [vmem:[%s5033_s11 + $0x290] sm:$0xff] }
 0x1d7   : > { %v5816_v29 = vpack.i.bf16 %v1429_v16, %v1389_v20  ;;  %v1633_v50 = vsel %vm1603_vm2, %v1630_v52, %v1632_v28  ;;  %v1673_v11 = vsel %vm1603_vm2, %v1670_v18, %v1672_v14  ;;  %v5825_v27 = vpack.i.bf16 %v5786_v51, %v5778_v23  ;;  %v5834_v52 = vld [vmem:[%s5033_s11 + $0x188] sm:$0xff]  ;;  %7443 = vst [vmem:[#allocation44_spill] sm:$0xff] %v5846_v8 }
 0x1d8   : > { %v1391_v12 = vsel %vm1361_vm3, %v1388_v60, %v1390_v6  ;;  %v1431_v36 = vsel %vm1361_vm3, %v1428_v48, %v1430_v10  ;;  %v5828_v16 = vpack.i.bf16 %v1673_v11, %v1633_v50  ;;  %v1634_v14 = vrot.slane %v5834_v52, 2  ;;  %v5838_v6 = vld [vmem:[%s5033_s11 + $0x190] sm:$0xff]  ;;  %v5842_v60 = vld [vmem:[%s5033_s11 + $0x288] sm:$0xff]  ;;  %v5850_v10 = vld [vmem:[%s5033_s11 + $0x180] sm:$0xff] }
 0x1d9   : > { %4089 = vxpose.xlu2.b32.cont [9/16] (narrow) %v5749_v46, 16  ;;  %7441 = vst [vmem:[#allocation42_spill] sm:$0xff] %v5825_v27  ;;  %v5830_v20 = vpack.i.bf16 %v1431_v36, %v1391_v12  ;;  %v1635_v18 = vrot.slane %v5838_v6, 2  ;;  %v1674_v28 = vrot.slane %v5842_v60, 2  ;;  %v1675_v48 = vrot.slane %v5846_v8, 2  ;;  %v5855_v12 = vld [vmem:[%s5033_s11 + $0x280] sm:$0xff] }
 0x1da   : > { %4005 = vxpose.xlu0.b32.cont [9/16] (narrow) %v5751_v1, 16  ;;  %7442 = vst [vmem:[#allocation43_spill] sm:$0xff] %v5842_v60  ;;  %v1392_v50 = vrot.slane %v5850_v10, 6  ;;  %v1393_v11 = vrot.slane %v5834_v52, 6  ;;  %v1432_v36 = vrot.slane %v5855_v12, 6  ;;  %v1433_v51 = vrot.slane %v5842_v60, 6 }
 0x1db   : > { %7444 = vst [vmem:[#allocation45_spill] sm:$0xff] %v5855_v12  ;;  %v5862_v23 = vpack.i.bf16 %v5842_v60, %v5834_v52  ;;  %v1636_v38 = vsel %vm1603_vm2, %v1634_v14, %v1635_v18  ;;  %v1676_v31 = vsel %vm1603_vm2, %v1674_v28, %v1675_v48  ;;  %v1637_v60 = vrot.slane %v5875_v21, 2 }
 0x1dc   : > { %v1394_v32 = vsel %vm1361_vm3, %v1392_v50, %v1393_v11  ;;  %v1434_v0 = vsel %vm1361_vm3, %v1432_v36, %v1433_v51  ;;  %v5869_v7 = vpack.i.bf16 %v1676_v31, %v1636_v38  ;;  %v1677_v14 = vrot.slane %v4844_v40, 2 }
 0x1dd   : > { %7445 = vst [vmem:[#allocation46_spill] sm:$0xff] %v5862_v23  ;;  %v5871_v12 = vpack.i.bf16 %v1434_v0, %v1394_v32  ;;  %v1395_v28 = vrot.slane %v5838_v6, 6  ;;  %v1435_v50 = vrot.slane %v5846_v8, 6  ;;  %v5884_v32 = vpack.i.bf16 %v5846_v8, %v5838_v6  ;;  %v5897_v8 = vld [vmem:[%s5033_s11 + $0x1a8] sm:$0xff] }
 0x1de   : > { %4049 = vxpose.xlu1.b32.cont [10/16] (narrow) %v5761_v25, 16  ;;  %v1638_v0 = vsel %vm1603_vm2, %v1635_v18, %v1637_v60  ;;  %v1678_v31 = vsel %vm1603_vm2, %v1675_v48, %v1677_v14  ;;  %7448 = vst [vmem:[#allocation49_spill] sm:$0xff] %v5897_v8  ;;  %v1640_v18 = vrot.slane %v5901_v37, 2  ;;  %v5905_v60 = vld [vmem:[%s5033_s11 + $0x2a8] sm:$0xff]  ;;  %v5913_v14 = vld [vmem:[%s5033_s11 + $0x1a0] sm:$0xff]  ;;  %v5938_v25 = vld [vmem:[%s5033_s11 + $0x1b8] sm:$0xff] }
 0x1df   : > { %7447 = vst [vmem:[#allocation48_spill] sm:$0xff] %v5884_v32  ;;  %v1396_v40 = vsel %vm1361_vm3, %v1393_v11, %v1395_v28  ;;  %v1436_v38 = vsel %vm1361_vm3, %v1433_v51, %v1435_v50  ;;  %v5891_v36 = vpack.i.bf16 %v1678_v31, %v1638_v0  ;;  %v1679_v48 = vrot.slane %v5905_v60, 2  ;;  %v5909_v11 = vld [vmem:[%s5033_s11 + $0x2b0] sm:$0xff]  ;;  %v5918_v0 = vld [vmem:[%s5033_s11 + $0x2a0] sm:$0xff] }
 0x1e0   : > { %v5893_v21 = vpack.i.bf16 %v1436_v38, %v1396_v40  ;;  %7449 = vst [vmem:[#allocation50_spill] sm:$0xff] %v5905_v60  ;;  %v1680_v51 = vrot.slane %v5909_v11, 2  ;;  %v1397_v28 = vrot.slane %v5913_v14, 6  ;;  %v1398_v50 = vrot.slane %v5897_v8, 6 }
 0x1e1   : > { %4091 = vxpose.xlu2.b32.cont [10/16] (narrow) %v5768_v58, 16  ;;  %7450 = vst [vmem:[#allocation51_spill] sm:$0xff] %v5918_v0  ;;  %v1437_v31 = vrot.slane %v5918_v0, 6  ;;  %v1438_v40 = vrot.slane %v5905_v60, 6  ;;  %v5925_v38 = vpack.i.bf16 %v5905_v60, %v5897_v8  ;;  %v1642_v60 = vrot.slane %v5938_v25, 2 }
 0x1e2   : > { %4007 = vxpose.xlu0.b32.cont [10/16] (narrow) %v5770_v24, 16  ;;  %v1399_v45 = vsel %vm1361_vm3, %v1397_v28, %v1398_v50  ;;  %7451 = vst [vmem:[#allocation52_spill] sm:$0xff] %v5938_v25  ;;  %v1440_v28 = vrot.slane %v5909_v11, 6 }
 0x1e3   : > { %v1439_v61 = vsel %vm1361_vm3, %v1437_v31, %v1438_v40 }
 0x1e4   : > { %v5935_v0 = vpack.i.bf16 %v1439_v61, %v1399_v45  ;;  %v1643_v45 = vsel %vm1603_vm2, %v1640_v18, %v1642_v60  ;;  %v1441_v31 = vsel %vm1361_vm3, %v1438_v40, %v1440_v28  ;;  %v1863_v28 = vrot.slane %v5389_v35, 2 }
 0x1e6   : > { %4051 = vxpose.xlu1.b32.cont [11/16] (narrow) %v5802_v34, 16 }
 0x1e9   : > { %4093 = vxpose.xlu2.b32.cont [11/16] (narrow) %v5810_v19, 16 }
 0x1ea   : > { %4009 = vxpose.xlu0.b32.cont [11/16] (narrow) %v5816_v29, 16 }
 0x1ee   : > { %4053 = vxpose.xlu1.b32.cont [12/16] (narrow) %v5825_v27, 16  ;;  %v1681_v27 = vsel %vm1603_vm2, %v1679_v48, %v1680_v51  ;;  %v1400_v48 = vrot.slane %v5901_v37, 6 }
 0x1f1   : > { %4095 = vxpose.xlu2.b32.cont [12/16] (narrow) %v5828_v16, 16 }
 0x1f2   : > { %4011 = vxpose.xlu0.b32.cont [12/16] (narrow) %v5830_v20, 16 }
 0x1f6   : > { %4055 = vxpose.xlu1.b32.cont [13/16] (narrow) %v5862_v23, 16  ;;  %v1639_v23 = vrot.slane %v5897_v8, 2  ;;  %v5942_v8 = vld [vmem:[%s5033_s11 + $0x2b8] sm:$0xff] }
 0x1f7   : > { %7452 = vst [vmem:[#allocation53_spill] sm:$0xff] %v5942_v8 }
 0x1f9   : > { %4097 = vxpose.xlu2.b32.cont [13/16] (narrow) %v5869_v7, 16 }
 0x1fa   : > { %4013 = vxpose.xlu0.b32.cont [13/16] (narrow) %v5871_v12, 16 }
 0x1fe   : > { %4057 = vxpose.xlu1.b32.cont [14/16] (narrow) %v5884_v32, 16  ;;  %v1641_v32 = vsel %vm1603_vm2, %v1639_v23, %v1640_v18  ;;  %v1682_v23 = vrot.slane %v5942_v8, 2 }
 0x1ff   : > { %v5932_v34 = vpack.i.bf16 %v1681_v27, %v1641_v32  ;;  %v5950_v27 = vpack.i.bf16 %v5909_v11, %v5901_v37  ;;  %v1401_v32 = vsel %vm1361_vm3, %v1398_v50, %v1400_v48 }
 0x200   : > { %v1683_v61 = vsel %vm1603_vm2, %v1680_v51, %v1682_v23  ;;  %v4018_v25 = vpack.i.bf16 %v1441_v31, %v1401_v32  ;;  %v1940_v51 = vrot.slane %v5458_v4, 6  ;;  %v6024_v23 = vld [vmem:[%s5033_s11 + $0x2d8] sm:$0xff]  ;;  %v1942_v4 = vrot.slane %v5461_v26, 6 }
 0x201   : > { %4099 = vxpose.xlu2.b32.cont [14/16] (narrow) %v5891_v36, 16  ;;  %v5957_v8 = vpack.i.bf16 %v1683_v61, %v1643_v45  ;;  %7453 = vst [vmem:[#allocation54_spill] sm:$0xff] %v6024_v23  ;;  %v1864_v45 = vrot.slane %v5392_v49, 2  ;;  %v6038_v61 = vld [vmem:[%s5033_s11 + $0x320] sm:$0xff] }
 0x202   : > { %4015 = vxpose.xlu0.b32.cont [14/16] (narrow) %v5893_v21, 16  ;;  %7454 = vst [vmem:[#allocation55_spill] sm:$0xff] %v6038_v61  ;;  %v1944_v32 = vrot.slane %v6038_v61, 6 }
 0x203   : > { %v1865_v31 = vsel %vm1603_vm2, %v1863_v28, %v1864_v45  ;;  %v7346_v28 = vrot.slane %v5901_v37, 4 }
 0x206   : > { %4059 = vxpose.xlu1.b32.cont [15/16] (narrow) %v5925_v38, 16 }
 0x209   : > { %4101 = vxpose.xlu2.b32.cont [15/16] (narrow) %v5932_v34, 16 }
 0x20a   : > { %4017 = vxpose.xlu0.b32.cont [15/16] (narrow) %v5935_v0, 16 }
 0x20e   : > { %4061 = vxpose.xlu1.b32.end [16/16] (narrow) %v5950_v27, 16 }
 0x211   : > { %4103 = vxpose.xlu2.b32.end [16/16] (narrow) %v5957_v8, 16 }
 0x212   : > { %4019 = vxpose.xlu0.b32.end [16/16] (narrow) %v4018_v25, 16 }
 0x216   : > { %4157 = vxpose.xlu1.b32.start [1/16] (narrow) %v5620_v33, 16  ;;  %v5984_v33 = vld [vmem:[%s5033_s11 + $0x2c0] sm:$0xff] }
 0x219   : > { %4199 = vxpose.xlu2.b32.start [1/16] (narrow) %v5751_v1, 16 }
 0x21a   : > { %4115 = vxpose.xlu0.b32.start [1/16] (narrow) %v5623_v53, 16  ;;  %v1780_v53 = vrot.slane %v5984_v33, 6 }
 0x21e   : > { %4159 = vxpose.xlu1.b32.cont [2/16] (narrow) %v5642_v5, 16  ;;  %v5988_v5 = vld [vmem:[%s5033_s11 + $0x2c8] sm:$0xff] }
 0x221   : > { %4201 = vxpose.xlu2.b32.cont [2/16] (narrow) %v5770_v24, 16 }
 0x222   : > { %4117 = vxpose.xlu0.b32.cont [2/16] (narrow) %v5645_v47, 16  ;;  %v1781_v47 = vrot.slane %v5988_v5, 6 }
 0x226   : > { %4161 = vxpose.xlu1.b32.cont [3/16] (narrow) %v5687_v43, 16  ;;  %v1782_v43 = vsel %vm1361_vm3, %v1780_v53, %v1781_v47  ;;  %v1866_v53 = vrot.slane %v5409_v13, 2  ;;  %v6068_v13 = vld [vmem:[%s5033_s11 + $0x88] sm:$0xff] }
 0x229   : > { %4203 = vxpose.xlu2.b32.cont [3/16] (narrow) %v5816_v29, 16 }
 0x22a   : > { %4119 = vxpose.xlu0.b32.cont [3/16] (narrow) %v5693_v41, 16  ;;  %v4214_v41 = vpack.i.bf16 %v1782_v43, %v5509_v62 }
 0x22e   : > { %4163 = vxpose.xlu1.b32.cont [4/16] (narrow) %v5708_v59, 16  ;;  %v5996_v59 = vld [vmem:[%s5033_s11 + $0x2d0] sm:$0xff] }
 0x22f   : > { %v1859_v60 = vrot.slane %v5996_v59, 2 }
 0x231   : > { %4205 = vxpose.xlu2.b32.cont [4/16] (narrow) %v5830_v20, 16 }
 0x232   : > { %4121 = vxpose.xlu0.b32.cont [4/16] (narrow) %v5711_v57, 16  ;;  %v1783_v57 = vrot.slane %v5996_v59, 6 }
 0x236   : > { %4165 = vxpose.xlu1.b32.cont [5/16] (narrow) %v5749_v46, 16 }
 0x239   : > { %4207 = vxpose.xlu2.b32.cont [5/16] (narrow) %v5871_v12, 16 }
 0x23a   : > { %4123 = vxpose.xlu0.b32.cont [5/16] (narrow) %v5751_v1, 16  ;;  %v1784_v1 = vsel %vm1361_vm3, %v1781_v47, %v1783_v57 }
 0x23e   : > { %4167 = vxpose.xlu1.b32.cont [6/16] (narrow) %v5768_v58, 16 }
 0x241   : > { %4209 = vxpose.xlu2.b32.cont [6/16] (narrow) %v5893_v21, 16 }
 0x242   : > { %4125 = vxpose.xlu0.b32.cont [6/16] (narrow) %v5770_v24, 16  ;;  %v4216_v24 = vpack.i.bf16 %v1784_v1, %v5525_v2  ;;  %v6065_v1 = vld [vmem:[%s5033_s11 + $0x80] sm:$0xff] }
 0x243   : > { %7455 = vst [vmem:[#allocation56_spill] sm:$0xff] %v6065_v1 }
 0x246   : > { %4169 = vxpose.xlu1.b32.cont [7/16] (narrow) %v5810_v19, 16 }
 0x249   : > { %4211 = vxpose.xlu2.b32.cont [7/16] (narrow) %v5935_v0, 16 }
 0x24a   : > { %4127 = vxpose.xlu0.b32.cont [7/16] (narrow) %v5816_v29, 16  ;;  %v1785_v29 = vrot.slane %v5395_v56, 6  ;;  %v1858_v56 = vrot.slane %v5988_v5, 2 }
 0x24c   : > { %v1860_v50 = vsel %vm1603_vm2, %v1858_v56, %v1859_v60 }
 0x24e   : > { %4171 = vxpose.xlu1.b32.cont [8/16] (narrow) %v5828_v16, 16 }
 0x251   : > { %4213 = vxpose.xlu2.b32.cont [8/16] (narrow) %v4018_v25, 16 }
 0x252   : > { %4129 = vxpose.xlu0.b32.cont [8/16] (narrow) %v5830_v20, 16  ;;  %v1786_v20 = vrot.slane %v5389_v35, 6  ;;  %v6049_v35 = vpack.i.bf16 %v1865_v31, %v5559_v44 }
 0x254   : > { %v1787_v62 = vsel %vm1361_vm3, %v1785_v29, %v1786_v20  ;;  %v2208_v29 = vrot.slane %v5834_v52, 4 }
 0x255   : > { %v4218_v18 = vpack.i.bf16 %v1787_v62, %v5563_v9  ;;  %v1939_v9 = vrot.slane %v5464_v30, 6 }
 0x256   : > { %4173 = vxpose.xlu1.b32.cont [9/16] (narrow) %v5869_v7, 16 }
 0x257   : > { %v1941_v40 = vsel %vm1361_vm3, %v1939_v9, %v1940_v51 }
 0x258   : > { %v4222_v48 = vpack.i.bf16 %v1941_v40, %v5617_v22  ;;  %v6041_v22 = vld [vmem:[%s5033_s11 + $0x328] sm:$0xff]  ;;  %v7457_v40 = vld [vmem:[#allocation49_spill] sm:$0xff] }
 0x259   : > { %4215 = vxpose.xlu2.b32.cont [9/16] (narrow) %v4214_v41, 16 }
 0x25a   : > { %4131 = vxpose.xlu0.b32.cont [9/16] (narrow) %v5871_v12, 16  ;;  %v1788_v12 = vrot.slane %v5392_v49, 6 }
 0x25c   : > { %v1789_v2 = vsel %vm1361_vm3, %v1786_v20, %v1788_v12  ;;  %v2167_v20 = vrot.slane %v6065_v1, 4  ;;  %v7494_v1 = vld [vmem:[#allocation31_spill] sm:$0xff] }
 0x25e   : > { %4175 = vxpose.xlu1.b32.cont [10/16] (narrow) %v5891_v36, 16 }
 0x261   : > { %4217 = vxpose.xlu2.b32.cont [10/16] (narrow) %v4216_v24, 16 }
 0x262   : > { %4133 = vxpose.xlu0.b32.cont [10/16] (narrow) %v5893_v21, 16  ;;  %v4220_v21 = vpack.i.bf16 %v1789_v2, %v5577_v55  ;;  %v1861_v55 = vrot.slane %v6024_v23, 2  ;;  %v7348_v2 = vrot.slane %v5838_v6, 4  ;;  %v7356_v23 = vrot.slane %v7494_v1, 4 }
 0x264   : > { %v1862_v30 = vsel %vm1603_vm2, %v1859_v60, %v1861_v55  ;;  %v6094_v60 = vsel %vm2166_vm4, %v2208_v29, %v7348_v2  ;;  %v2213_v55 = vrot.slane %v7457_v40, 4 }
 0x266   : > { %4177 = vxpose.xlu1.b32.cont [11/16] (narrow) %v5932_v34, 16 }
 0x269   : > { %4219 = vxpose.xlu2.b32.cont [11/16] (narrow) %v4218_v18, 16 }
 0x26a   : > { %4135 = vxpose.xlu0.b32.cont [11/16] (narrow) %v5935_v0, 16  ;;  %v6020_v0 = vpack.i.bf16 %v1860_v50, %v5505_v54  ;;  %v6032_v54 = vpack.i.bf16 %v1862_v30, %v5521_v3  ;;  %v1945_v3 = vrot.slane %v6041_v22, 6  ;;  %v2212_v50 = vrot.slane %v5913_v14, 4 }
 0x26c   : > { %v1946_v49 = vsel %vm1361_vm3, %v1944_v32, %v1945_v3  ;;  %v6114_v30 = vsel %vm2166_vm4, %v2212_v50, %v2213_v55  ;;  %v6130_v32 = vsel %vm2166_vm4, %v2213_v55, %v7346_v28  ;;  %v7465_v50 = vld [vmem:[#allocation10_spill] sm:$0xff] }
 0x26d   : > { %v4226_v47 = vpack.i.bf16 %v1946_v49, %v5683_v17  ;;  %v7461_v49 = vld [vmem:[#allocation3_spill] sm:$0xff]  ;;  %v2182_v55 = vrot.slane %v7465_v50, 4  ;;  %v7474_v50 = vld [vmem:[#allocation12_spill] sm:$0xff] }
 0x26e   : > { %4179 = vxpose.xlu1.b32.cont [12/16] (narrow) %v5957_v8, 16 }
 0x271   : > { %4221 = vxpose.xlu2.b32.cont [12/16] (narrow) %v4220_v21, 16 }
 0x272   : > { %4137 = vxpose.xlu0.b32.cont [12/16] (narrow) %v4018_v25, 16  ;;  %v1943_v25 = vsel %vm1361_vm3, %v1940_v51, %v1942_v4 }
 0x273   : > { %v4224_v26 = vpack.i.bf16 %v1943_v25, %v5639_v42  ;;  %v6054_v42 = vld [vmem:[%s5033_s11 + $0x330] sm:$0xff] }
 0x274   : > { %v1947_v43 = vrot.slane %v6054_v42, 6 }
 0x276   : > { %4181 = vxpose.xlu1.b32.cont [13/16] (narrow) %v6020_v0, 16  ;;  %v1948_v44 = vsel %vm1361_vm3, %v1945_v3, %v1947_v43 }
 0x277   : > { %v4228_v17 = vpack.i.bf16 %v1948_v44, %v5702_v39 }
 0x279   : > { %4223 = vxpose.xlu2.b32.cont [13/16] (narrow) %v4222_v48, 16  ;;  %v7458_v48 = vld [vmem:[#allocation34_spill] sm:$0xff] }
 0x27a   : > { %4139 = vxpose.xlu0.b32.cont [13/16] (narrow) %v4214_v41, 16  ;;  %v1867_v41 = vsel %vm1603_vm2, %v1864_v45, %v1866_v53  ;;  %v7459_v45 = vld [vmem:[#allocation41_spill] sm:$0xff]  ;;  %v2178_v53 = vrot.slane %v7461_v49, 4 }
 0x27b   : > { %v6061_v57 = vpack.i.bf16 %v1867_v41, %v5573_v63  ;;  %v2168_v63 = vrot.slane %v6068_v13, 4  ;;  %v6140_v41 = vld [vmem:[%s5033_s11 + $0x1c8] sm:$0xff] }
 0x27c   : > { %v2218_v44 = vrot.slane %v6140_v41, 4 }
 0x27d   : > { %v2169_v39 = vsel %vm2166_vm4, %v2167_v20, %v2168_v63  ;;  %v7463_v20 = vld [vmem:[#allocation5_spill] sm:$0xff] }
 0x27e   : > { %4183 = vxpose.xlu1.b32.cont [14/16] (narrow) %v6032_v54, 16 }
 0x281   : > { %4225 = vxpose.xlu2.b32.cont [14/16] (narrow) %v4224_v26, 16 }
 0x282   : > { %4141 = vxpose.xlu0.b32.cont [14/16] (narrow) %v4216_v24, 16  ;;  %v2207_v24 = vrot.slane %v5850_v10, 4 }
 0x284   : > { %v6077_v62 = vsel %vm2166_vm4, %v2207_v24, %v2208_v29 }
 0x285   : > { %v4324_v10 = vpack.i.bf16 %v6077_v62, %v2169_v39  ;;  %v6153_v39 = vld [vmem:[%s5033_s11 + $0x1d0] sm:$0xff] }
 0x286   : > { %4185 = vxpose.xlu1.b32.cont [15/16] (narrow) %v6049_v35, 16 }
 0x289   : > { %4227 = vxpose.xlu2.b32.cont [15/16] (narrow) %v4226_v47, 16  ;;  %v4857_v47 = vld [vmem:[%s5033_s11 + $0x1c0] sm:$0xff] }
 0x28a   : > { %4143 = vxpose.xlu0.b32.cont [15/16] (narrow) %v4218_v18, 16  ;;  %v6081_v18 = vld [vmem:[%s5033_s11 + $0x90] sm:$0xff]  ;;  %v2217_v43 = vrot.slane %v4857_v47, 4 }
 0x28b   : > { %v7349_v12 = vrot.slane %v6081_v18, 4 }
 0x28c   : > { %v6147_v29 = vsel %vm2166_vm4, %v2217_v43, %v2218_v44 }
 0x28d   : > { %v2171_v56 = vsel %vm2166_vm4, %v2168_v63, %v7349_v12  ;;  %v7345_v63 = vrot.slane %v7463_v20, 4 }
 0x28e   : > { %4187 = vxpose.xlu1.b32.end [16/16] (narrow) %v6061_v57, 16  ;;  %v6103_v9 = vpack.i.bf16 %v6094_v60, %v2171_v56  ;;  %v7464_v56 = vld [vmem:[#allocation46_spill] sm:$0xff] }
 0x291   : > { %4229 = vxpose.xlu2.b32.end [16/16] (narrow) %v4228_v17, 16  ;;  %v7462_v17 = vld [vmem:[#allocation42_spill] sm:$0xff] }
 0x292   : > { %4145 = vxpose.xlu0.b32.end [16/16] (narrow) %v4220_v21, 16  ;;  %v6097_v21 = vld [vmem:[%s5033_s11 + $0xa0] sm:$0xff] }
 0x293   : > { %7456 = vst [vmem:[#allocation57_spill] sm:$0xff] %v6097_v21 }
 0x296   : > { %4283 = vxpose.xlu1.b32.start [1/16] (narrow) %v5749_v46, 16  ;;  %v6100_v46 = vld [vmem:[%s5033_s11 + $0xa8] sm:$0xff] }
 0x297   : > { %v2173_v51 = vrot.slane %v6100_v46, 4 }
 0x299   : > { %4325 = vxpose.xlu2.b32.start [1/16] (narrow) %v4324_v10, 16  ;;  %v7342_v10 = vrot.slane %v6153_v39, 4 }
 0x29a   : > { %4241 = vxpose.xlu0.b32.start [1/16] (narrow) %v5742_v15, 16  ;;  %v2172_v15 = vrot.slane %v6097_v21, 4  ;;  %v7491_v21 = vld [vmem:[#allocation18_spill] sm:$0xff] }
 0x29c   : > { %v2174_v4 = vsel %vm2166_vm4, %v2172_v15, %v2173_v51  ;;  %v2181_v15 = vsel %vm2166_vm4, %v2178_v53, %v7345_v63  ;;  %v7489_v63 = vld [vmem:[#allocation33_spill] sm:$0xff] }
 0x29d   : > { %v4328_v25 = vpack.i.bf16 %v6114_v30, %v2174_v4  ;;  %v2237_v28 = vrot.slane %v7489_v63, 4  ;;  %v7493_v63 = vld [vmem:[#allocation29_spill] sm:$0xff] }
 0x29e   : > { %4285 = vxpose.xlu1.b32.cont [2/16] (narrow) %v5768_v58, 16  ;;  %v6117_v58 = vld [vmem:[%s5033_s11 + $0xb0] sm:$0xff] }
 0x29f   : > { %v7347_v14 = vrot.slane %v6117_v58, 4 }
 0x2a1   : > { %4327 = vxpose.xlu2.b32.cont [2/16] (narrow) %v6103_v9, 16  ;;  %v2176_v26 = vsel %vm2166_vm4, %v2173_v51, %v7347_v14  ;;  %v6163_v51 = vsel %vm2166_vm4, %v2218_v44, %v7342_v10  ;;  %v7471_v44 = vld [vmem:[#allocation9_spill] sm:$0xff]  ;;  %v7490_v14 = vld [vmem:[#allocation30_spill] sm:$0xff] }
 0x2a2   : > { %4243 = vxpose.xlu0.b32.cont [2/16] (narrow) %v7458_v48, 16  ;;  %v6133_v3 = vpack.i.bf16 %v6130_v32, %v2176_v26  ;;  %v7466_v48 = vld [vmem:[#allocation4_spill] sm:$0xff]  ;;  %v2238_v2 = vrot.slane %v7490_v14, 4 }
 0x2a3   : > { %v2183_v4 = vrot.slane %v7466_v48, 4  ;;  %v7468_v26 = vld [vmem:[#allocation8_spill] sm:$0xff]  ;;  %v7475_v48 = vld [vmem:[#allocation17_spill] sm:$0xff] }
 0x2a5   : > { %v2184_v49 = vsel %vm2166_vm4, %v2182_v55, %v2183_v4  ;;  %v2188_v55 = vrot.slane %v7474_v50, 4 }
 0x2a6   : > { %4287 = vxpose.xlu1.b32.cont [3/16] (narrow) %v5810_v19, 16  ;;  %v7460_v19 = vld [vmem:[#allocation6_spill] sm:$0xff] }
 0x2a7   : > { %v2177_v31 = vrot.slane %v7460_v19, 4  ;;  %v2223_v19 = vrot.slane %v7468_v26, 4 }
 0x2a9   : > { %4329 = vxpose.xlu2.b32.cont [3/16] (narrow) %v4328_v25, 16  ;;  %v2179_v24 = vsel %vm2166_vm4, %v2177_v31, %v2178_v53  ;;  %v7467_v25 = vld [vmem:[#allocation11_spill] sm:$0xff]  ;;  %v7469_v31 = vld [vmem:[#allocation48_spill] sm:$0xff] }
 0x2aa   : > { %4245 = vxpose.xlu0.b32.cont [3/16] (narrow) %v7459_v45, 16  ;;  %v2222_v45 = vrot.slane %v7467_v25, 4  ;;  %v7476_v25 = vld [vmem:[#allocation14_spill] sm:$0xff] }
 0x2ac   : > { %v6177_v53 = vsel %vm2166_vm4, %v2222_v45, %v2223_v19  ;;  %v2228_v45 = vrot.slane %v7476_v25, 4 }
 0x2ad   : > { %v4336_v47 = vpack.i.bf16 %v6177_v53, %v2184_v49  ;;  %v7477_v49 = vld [vmem:[#allocation13_spill] sm:$0xff] }
 0x2ae   : > { %4289 = vxpose.xlu1.b32.cont [4/16] (narrow) %v5828_v16, 16  ;;  %v4332_v16 = vpack.i.bf16 %v6147_v29, %v2179_v24 }
 0x2b1   : > { %4331 = vxpose.xlu2.b32.cont [4/16] (narrow) %v6133_v3, 16 }
 0x2b2   : > { %4247 = vxpose.xlu0.b32.cont [4/16] (narrow) %v7462_v17, 16  ;;  %v7338_v17 = vrot.slane %v7471_v44, 4 }
 0x2b6   : > { %4291 = vxpose.xlu1.b32.cont [5/16] (narrow) %v5869_v7, 16  ;;  %v6166_v7 = vpack.i.bf16 %v6163_v51, %v2181_v15 }
 0x2b9   : > { %4333 = vxpose.xlu2.b32.cont [5/16] (narrow) %v4332_v16, 16  ;;  %v6190_v16 = vsel %vm2166_vm4, %v2223_v19, %v7338_v17 }
 0x2ba   : > { %4249 = vxpose.xlu0.b32.cont [5/16] (narrow) %v7464_v56, 16  ;;  %7472 = vst [vmem:[#allocation49_spill] sm:$0xff] %v6190_v16 }
 0x2be   : > { %4293 = vxpose.xlu1.b32.cont [6/16] (narrow) %v5891_v36, 16  ;;  %v7470_v36 = vld [vmem:[#allocation7_spill] sm:$0xff] }
 0x2bf   : > { %v7339_v43 = vrot.slane %v7470_v36, 4 }
 0x2c1   : > { %4335 = vxpose.xlu2.b32.cont [6/16] (narrow) %v6166_v7, 16  ;;  %v2186_v24 = vsel %vm2166_vm4, %v2183_v4, %v7339_v43  ;;  %v7482_v43 = vld [vmem:[#allocation22_spill] sm:$0xff] }
 0x2c2   : > { %4251 = vxpose.xlu0.b32.cont [6/16] (narrow) %v7469_v31, 16  ;;  %v6193_v56 = vpack.i.bf16 %v6190_v16, %v2186_v24  ;;  %v7478_v24 = vld [vmem:[#allocation15_spill] sm:$0xff] }
 0x2c6   : > { %4295 = vxpose.xlu1.b32.cont [7/16] (narrow) %v5932_v34, 16  ;;  %v7473_v34 = vld [vmem:[#allocation16_spill] sm:$0xff] }
 0x2c7   : > { %v2187_v15 = vrot.slane %v7473_v34, 4  ;;  %v7340_v34 = vrot.slane %v7478_v24, 4 }
 0x2c9   : > { %4337 = vxpose.xlu2.b32.cont [7/16] (narrow) %v4336_v47, 16  ;;  %v2189_v4 = vsel %vm2166_vm4, %v2187_v15, %v2188_v55  ;;  %v7341_v47 = vrot.slane %v7477_v49, 4  ;;  %v2231_v15 = vsel %vm2166_vm4, %v2228_v45, %v7340_v34  ;;  %v7484_v34 = vld [vmem:[#allocation23_spill] sm:$0xff] }
 0x2ca   : > { %4253 = vxpose.xlu0.b32.cont [7/16] (narrow) %v5925_v38, 16  ;;  %v2227_v38 = vrot.slane %v7475_v48, 4  ;;  %v7479_v48 = vld [vmem:[#allocation24_spill] sm:$0xff] }
 0x2cc   : > { %v2229_v19 = vsel %vm2166_vm4, %v2227_v38, %v2228_v45  ;;  %v2192_v38 = vrot.slane %v7479_v48, 4 }
 0x2cd   : > { %v6204_v31 = vpack.i.bf16 %v2229_v19, %v2189_v4  ;;  %v7480_v4 = vld [vmem:[#allocation20_spill] sm:$0xff] }
 0x2ce   : > { %4297 = vxpose.xlu1.b32.cont [8/16] (narrow) %v5957_v8, 16  ;;  %v4256_v8 = vpack.i.bf16 %v5988_v5, %v6140_v41  ;;  %v2193_v19 = vrot.slane %v7480_v4, 4  ;;  %v7483_v4 = vld [vmem:[#allocation21_spill] sm:$0xff] }
 0x2d0   : > { %v2194_v45 = vsel %vm2166_vm4, %v2192_v38, %v2193_v19 }
 0x2d1   : > { %4339 = vxpose.xlu2.b32.cont [8/16] (narrow) %v6193_v56, 16 }
 0x2d2   : > { %4255 = vxpose.xlu0.b32.cont [8/16] (narrow) %v5950_v27, 16  ;;  %v2191_v27 = vsel %vm2166_vm4, %v2188_v55, %v7341_v47  ;;  %v2233_v55 = vrot.slane %v7482_v43, 4  ;;  %v7343_v47 = vrot.slane %v7484_v34, 4 }
 0x2d3   : > { %v6220_v50 = vpack.i.bf16 %v2231_v15, %v2191_v27 }
 0x2d6   : > { %4299 = vxpose.xlu1.b32.cont [9/16] (narrow) %v6020_v0, 16  ;;  %v4258_v0 = vpack.i.bf16 %v5996_v59, %v6153_v39 }
 0x2d9   : > { %4341 = vxpose.xlu2.b32.cont [9/16] (narrow) %v6204_v31, 16 }
 0x2da   : > { %4257 = vxpose.xlu0.b32.cont [9/16] (narrow) %v4256_v8, 16  ;;  %v7481_v8 = vld [vmem:[#allocation25_spill] sm:$0xff] }
 0x2db   : > { %v2232_v17 = vrot.slane %v7481_v8, 4  ;;  %v7344_v8 = vrot.slane %v7483_v4, 4 }
 0x2dd   : > { %v2234_v27 = vsel %vm2166_vm4, %v2232_v17, %v2233_v55  ;;  %v2196_v17 = vsel %vm2166_vm4, %v2193_v19, %v7344_v8  ;;  %v7487_v19 = vld [vmem:[#allocation32_spill] sm:$0xff] }
 0x2de   : > { %4301 = vxpose.xlu1.b32.cont [10/16] (narrow) %v6032_v54, 16  ;;  %v6230_v15 = vpack.i.bf16 %v2234_v27, %v2194_v45  ;;  %v6234_v54 = vld [vmem:[%s5033_s11 + $0x2e8] sm:$0xff]  ;;  %v6256_v27 = vld [vmem:[%s5033_s11 + $0x2f0] sm:$0xff] }
 0x2df   : > { %v4260_v48 = vpack.i.bf16 %v6234_v54, %v7468_v26  ;;  %v6252_v26 = vld [vmem:[%s5033_s11 + $0x310] sm:$0xff] }
 0x2e0   : > { %7486 = vst [vmem:[#allocation41_spill] sm:$0xff] %v6252_v26  ;;  %v2083_v45 = vrot.slane %v6252_v26, 2 }
 0x2e1   : > { %4343 = vxpose.xlu2.b32.cont [10/16] (narrow) %v6220_v50, 16 }
 0x2e2   : > { %4259 = vxpose.xlu0.b32.cont [10/16] (narrow) %v4258_v0, 16  ;;  %v6248_v0 = vld [vmem:[%s5033_s11 + $0x308] sm:$0xff] }
 0x2e3   : > { %7485 = vst [vmem:[#allocation34_spill] sm:$0xff] %v6248_v0  ;;  %v2082_v38 = vrot.slane %v6248_v0, 2  ;;  %v4264_v14 = vpack.i.bf16 %v6248_v0, %v7476_v25  ;;  %v2087_v25 = vrot.slane %v6041_v22, 2  ;;  %v7500_v0 = vld [vmem:[#allocation26_spill] sm:$0xff] }
 0x2e5   : > { %v2084_v12 = vsel %vm1603_vm2, %v2082_v38, %v2083_v45  ;;  %v7354_v38 = vrot.slane %v7493_v63, 4 }
 0x2e6   : > { %4303 = vxpose.xlu1.b32.cont [11/16] (narrow) %v6049_v35, 16  ;;  %v2236_v35 = vsel %vm2166_vm4, %v2233_v55, %v7343_v47  ;;  %v2197_v55 = vrot.slane %v7487_v19, 4  ;;  %v7488_v47 = vld [vmem:[#allocation28_spill] sm:$0xff]  ;;  %v4306_v61 = vpack.i.bf16 %v2084_v12, %v7491_v21  ;;  %v7495_v21 = vld [vmem:[#allocation19_spill] sm:$0xff] }
 0x2e7   : > { %v6260_v10 = vpack.i.bf16 %v2236_v35, %v2196_v17  ;;  %v2198_v8 = vrot.slane %v7488_v47, 4  ;;  %v2239_v35 = vsel %vm2166_vm4, %v2237_v28, %v2238_v2 }
 0x2e9   : > { %4345 = vxpose.xlu2.b32.cont [11/16] (narrow) %v6230_v15, 16  ;;  %v2199_v17 = vsel %vm2166_vm4, %v2197_v55, %v2198_v8  ;;  %v2088_v55 = vrot.slane %v6054_v42, 2 }
 0x2ea   : > { %4261 = vxpose.xlu0.b32.cont [11/16] (narrow) %v4260_v48, 16  ;;  %v4262_v48 = vpack.i.bf16 %v6256_v27, %v7471_v44  ;;  %v6276_v47 = vpack.i.bf16 %v2239_v35, %v2199_v17  ;;  %v7496_v35 = vld [vmem:[#allocation39_spill] sm:$0xff] }
 0x2ee   : > { %4305 = vxpose.xlu1.b32.cont [12/16] (narrow) %v6061_v57, 16  ;;  %v6273_v57 = vld [vmem:[%s5033_s11 + $0x318] sm:$0xff] }
 0x2ef   : > { %7492 = vst [vmem:[#allocation6_spill] sm:$0xff] %v6273_v57  ;;  %v2085_v19 = vrot.slane %v6273_v57, 2 }
 0x2f1   : > { %4347 = vxpose.xlu2.b32.cont [12/16] (narrow) %v6260_v10, 16  ;;  %v2086_v12 = vsel %vm1603_vm2, %v2083_v45, %v2085_v19  ;;  %v4266_v45 = vpack.i.bf16 %v6252_v26, %v7478_v24  ;;  %v2202_v19 = vrot.slane %v7496_v35, 4 }
 0x2f2   : > { %4263 = vxpose.xlu0.b32.cont [12/16] (narrow) %v4262_v48, 16  ;;  %v4308_v28 = vpack.i.bf16 %v2086_v12, %v7495_v21  ;;  %v2201_v48 = vsel %vm2166_vm4, %v2198_v8, %v7354_v38  ;;  %v7498_v21 = vld [vmem:[#allocation40_spill] sm:$0xff]  ;;  %v7499_v38 = vld [vmem:[#allocation37_spill] sm:$0xff] }
 0x2f3   : > { %v2242_v8 = vrot.slane %v7498_v21, 4  ;;  %v2243_v57 = vrot.slane %v7499_v38, 4  ;;  %v4268_v38 = vpack.i.bf16 %v6041_v22, %v7482_v43  ;;  %v7502_v21 = vld [vmem:[#allocation38_spill] sm:$0xff] }
 0x2f4   : > { %v7364_v26 = vrot.slane %v7502_v21, 4 }
 0x2f6   : > { %4307 = vxpose.xlu1.b32.cont [13/16] (narrow) %v4306_v61, 16  ;;  %v2241_v61 = vsel %vm2166_vm4, %v2238_v2, %v7356_v23  ;;  %v2089_v2 = vsel %vm1603_vm2, %v2087_v25, %v2088_v55  ;;  %v6303_v23 = vld [vmem:[%s5033_s11 + $0x338] sm:$0xff]  ;;  %v7501_v25 = vld [vmem:[#allocation36_spill] sm:$0xff] }
 0x2f7   : > { %v6295_v17 = vpack.i.bf16 %v2241_v61, %v2201_v48  ;;  %v4310_v16 = vpack.i.bf16 %v2089_v2, %v7500_v0  ;;  %v2090_v61 = vrot.slane %v6303_v23, 2  ;;  %v347_v2 = vld [vmem:[%s5033_s11 + $0x98] sm:$0xff] }
 0x2f9   : > { %4349 = vxpose.xlu2.b32.cont [13/16] (narrow) %v6276_v47, 16  ;;  %v2091_v0 = vsel %vm1603_vm2, %v2088_v55, %v2090_v61  ;;  %v4270_v55 = vpack.i.bf16 %v6054_v42, %v7484_v34 }
 0x2fa   : > { %4265 = vxpose.xlu0.b32.cont [13/16] (narrow) %v4264_v14, 16  ;;  %v7497_v14 = vld [vmem:[#allocation35_spill] sm:$0xff] }
 0x2fb   : > { %v2203_v12 = vrot.slane %v7497_v14, 4  ;;  %v7365_v14 = vrot.slane %v7501_v25, 4 }
 0x2fd   : > { %v2204_v48 = vsel %vm2166_vm4, %v2202_v19, %v2203_v12 }
 0x2fe   : > { %4309 = vxpose.xlu1.b32.cont [14/16] (narrow) %v4308_v28, 16  ;;  %v2244_v28 = vsel %vm2166_vm4, %v2242_v8, %v2243_v57  ;;  %v2206_v8 = vsel %vm2166_vm4, %v2203_v12, %v7365_v14  ;;  %v4366_v12 = vpack.i.bf16 %v5834_v52, %v6068_v13 }
 0x2ff   : > { %v6310_v35 = vpack.i.bf16 %v2244_v28, %v2204_v48  ;;  %v2409_v48 = vrot.slane %v347_v2, 4  ;;  %v7504_v28 = vld [vmem:[#allocation47_spill] sm:$0xff]  ;;  %v7508_v2 = vrot.slane %v6117_v58, 4 }
 0x300   : > { %v2425_v61 = vrot.slane %v7504_v28, 4 }
 0x301   : > { %4351 = vxpose.xlu2.b32.cont [14/16] (narrow) %v6295_v17, 16 }
 0x302   : > { %4267 = vxpose.xlu0.b32.cont [14/16] (narrow) %v4266_v45, 16  ;;  %v7503_v45 = vld [vmem:[#allocation27_spill] sm:$0xff] }
 0x303   : > { %v4312_v19 = vpack.i.bf16 %v2091_v0, %v7503_v45  ;;  %v7506_v0 = vrot.slane %v5838_v6, 4 }
 0x305   : > { %v6341_v45 = vsel %vm2166_vm4, %v7506_v0, %v2425_v61  ;;  %v7510_v0 = vrot.slane %v7463_v20, 4  ;;  %v4869_v20 = vld [vmem:[%s5033_s11 + $0xf8] sm:$0xff] }
 0x306   : > { %4311 = vxpose.xlu1.b32.cont [15/16] (narrow) %v4310_v16, 16  ;;  %v2246_v16 = vsel %vm2166_vm4, %v2243_v57, %v7364_v26  ;;  %v7505_v57 = vrot.slane %v6081_v18, 4 }
 0x307   : > { %v6325_v43 = vpack.i.bf16 %v2246_v16, %v2206_v8  ;;  %v351_v8 = vld [vmem:[%s5033_s11 + $0xb8] sm:$0xff]  ;;  %v7507_v16 = vld [vmem:[#allocation52_spill] sm:$0xff] }
 0x308   : > { %v2411_v52 = vrot.slane %v351_v8, 4  ;;  %v2415_v8 = vrot.slane %v4869_v20, 4  ;;  %v7516_v20 = vld [vmem:[#allocation44_spill] sm:$0xff] }
 0x309   : > { %4353 = vxpose.xlu2.b32.cont [15/16] (narrow) %v6310_v35, 16 }
 0x30a   : > { %4269 = vxpose.xlu0.b32.cont [15/16] (narrow) %v4268_v38, 16  ;;  %v2410_v38 = vsel %vm2166_vm4, %v7505_v57, %v2409_v48  ;;  %v2412_v48 = vsel %vm2166_vm4, %v7508_v2, %v2411_v52  ;;  %v4870_v52 = vld [vmem:[%s5033_s11 + $0x1f8] sm:$0xff]  ;;  %v7512_v2 = vrot.slane %v7470_v36, 4 }
 0x30e   : > { %4313 = vxpose.xlu1.b32.end [16/16] (narrow) %v4312_v19, 16  ;;  %v4410_v19 = vpack.i.bf16 %v6341_v45, %v2410_v38 }
 0x311   : > { %4355 = vxpose.xlu2.b32.end [16/16] (narrow) %v6325_v43, 16 }
 0x312   : > { %4271 = vxpose.xlu0.b32.end [16/16] (narrow) %v4270_v55, 16  ;;  %v2427_v55 = vrot.slane %v7507_v16, 4  ;;  %v2431_v16 = vrot.slane %v4870_v52, 4  ;;  %v7517_v52 = vrot.slane %v7477_v49, 4 }
 0x316   : > { %4409 = vxpose.xlu1.b32.start [1/16] (narrow) %v6103_v9, 16  ;;  %v4368_v9 = vpack.i.bf16 %v5838_v6, %v6081_v18  ;;  %v7509_v6 = vrot.slane %v5901_v37, 4 }
 0x318   : > { %v6359_v18 = vsel %vm2166_vm4, %v7509_v6, %v2427_v55  ;;  %v6391_v55 = vld [vmem:[%s5033_s11 + $0xe8] sm:$0xff] }
 0x319   : > { %4451 = vxpose.xlu2.b32.start [1/16] (narrow) %v6204_v31, 16  ;;  %v4370_v31 = vpack.i.bf16 %v7457_v40, %v6100_v46  ;;  %v4414_v28 = vpack.i.bf16 %v6359_v18, %v2412_v48  ;;  %v4865_v40 = vld [vmem:[%s5033_s11 + $0xd8] sm:$0xff]  ;;  %v7513_v48 = vrot.slane %v7471_v44, 4 }
 0x31a   : > { %4367 = vxpose.xlu0.b32.start [1/16] (narrow) %v4366_v12, 16  ;;  %v2413_v61 = vrot.slane %v4865_v40, 4  ;;  %v4866_v12 = vld [vmem:[%s5033_s11 + $0x1d8] sm:$0xff]  ;;  %v7515_v40 = vld [vmem:[#allocation43_spill] sm:$0xff] }
 0x31b   : > { %v2429_v57 = vrot.slane %v4866_v12, 4  ;;  %v6401_v6 = vsel %vm2166_vm4, %v7513_v48, %v2431_v16  ;;  %v2522_v36 = vrot.slane %v7515_v40, 4  ;;  %v4874_v12 = vld [vmem:[%s5033_s11 + $0x1f0] sm:$0xff] }
 0x31e   : > { %4411 = vxpose.xlu1.b32.cont [2/16] (narrow) %v4410_v19, 16 }
 0x321   : > { %4453 = vxpose.xlu2.b32.cont [2/16] (narrow) %v6220_v50, 16 }
 0x322   : > { %4369 = vxpose.xlu0.b32.cont [2/16] (narrow) %v4368_v9, 16  ;;  %v4868_v9 = vld [vmem:[%s5033_s11 + $0xd0] sm:$0xff] }
 0x326   : > { %4413 = vxpose.xlu1.b32.cont [3/16] (narrow) %v6133_v3, 16  ;;  %v4372_v3 = vpack.i.bf16 %v5901_v37, %v6117_v58  ;;  %v2414_v37 = vsel %vm2166_vm4, %v7510_v0, %v2413_v61  ;;  %v7511_v58 = vrot.slane %v6153_v39, 4  ;;  %v4873_v61 = vld [vmem:[%s5033_s11 + $0xf0] sm:$0xff]  ;;  %v6418_v0 = vld [vmem:[%s5033_s11 + $0x218] sm:$0xff] }
 0x328   : > { %v6380_v19 = vsel %vm2166_vm4, %v7511_v58, %v2429_v57  ;;  %v4380_v57 = vpack.i.bf16 %v4874_v12, %v4873_v61  ;;  %v6470_v12 = vld [vmem:[%s5033_s11 + $0x238] sm:$0xff] }
 0x329   : > { %4455 = vxpose.xlu2.b32.cont [3/16] (narrow) %v6230_v15, 16  ;;  %v6370_v15 = vld [vmem:[%s5033_s11 + $0xc8] sm:$0xff] }
 0x32a   : > { %4371 = vxpose.xlu0.b32.cont [3/16] (narrow) %v4370_v31, 16  ;;  %v4374_v38 = vpack.i.bf16 %v6140_v41, %v6370_v15  ;;  %v4376_v41 = vpack.i.bf16 %v6153_v39, %v4868_v9  ;;  %v2416_v39 = vsel %vm2166_vm4, %v7512_v2, %v2415_v8  ;;  %v6428_v9 = vld [vmem:[%s5033_s11 + $0x208] sm:$0xff]  ;;  %v7363_v8 = vrot.slane %v7516_v20, 4 }
 0x32c   : > { %v6444_v2 = vsel %vm2166_vm4, %v2522_v36, %v7363_v8  ;;  %v7527_v8 = vrot.slane %v7494_v1, 4  ;;  %v6556_v1 = vld [vmem:[%s5033_s11 + $0x150] sm:$0xff] }
 0x32d   : > { %v6448_v49 = vpack.i.bf16 %v6444_v2, %v6094_v60 }
 0x32e   : > { %4415 = vxpose.xlu1.b32.cont [4/16] (narrow) %v4414_v28, 16  ;;  %v7514_v28 = vld [vmem:[#allocation45_spill] sm:$0xff] }
 0x331   : > { %4457 = vxpose.xlu2.b32.cont [4/16] (narrow) %v6260_v10, 16 }
 0x332   : > { %4373 = vxpose.xlu0.b32.cont [4/16] (narrow) %v4372_v3, 16  ;;  %v2521_v3 = vrot.slane %v7514_v28, 4 }
 0x334   : > { %v6411_v44 = vsel %vm2166_vm4, %v2521_v3, %v2522_v36  ;;  %v7520_v3 = vld [vmem:[#allocation50_spill] sm:$0xff] }
 0x335   : > { %v4466_v58 = vpack.i.bf16 %v6411_v44, %v6077_v62  ;;  %v2527_v40 = vrot.slane %v7520_v3, 4  ;;  %v6466_v36 = vld [vmem:[%s5033_s11 + $0x138] sm:$0xff] }
 0x336   : > { %4417 = vxpose.xlu1.b32.cont [5/16] (narrow) %v6166_v7, 16  ;;  %v4418_v7 = vpack.i.bf16 %v6380_v19, %v2414_v37  ;;  %v2433_v37 = vrot.slane %v6418_v0, 4  ;;  %v2419_v61 = vrot.slane %v6466_v36, 4 }
 0x339   : > { %4459 = vxpose.xlu2.b32.cont [5/16] (narrow) %v6276_v47, 16  ;;  %v4872_v47 = vld [vmem:[%s5033_s11 + $0x1e8] sm:$0xff] }
 0x33a   : > { %4375 = vxpose.xlu0.b32.cont [5/16] (narrow) %v4374_v38, 16  ;;  %v4378_v31 = vpack.i.bf16 %v4872_v47, %v6391_v55  ;;  %v7518_v47 = vrot.slane %v7478_v24, 4  ;;  %v6452_v24 = vld [vmem:[%s5033_s11 + $0x110] sm:$0xff] }
 0x33c   : > { %v2434_v62 = vsel %vm2166_vm4, %v7518_v47, %v2433_v37  ;;  %v6477_v37 = vld [vmem:[%s5033_s11 + $0x128] sm:$0xff] }
 0x33e   : > { %4419 = vxpose.xlu1.b32.cont [6/16] (narrow) %v4418_v7, 16  ;;  %v6425_v7 = vld [vmem:[%s5033_s11 + $0x108] sm:$0xff] }
 0x341   : > { %4461 = vxpose.xlu2.b32.cont [6/16] (narrow) %v6295_v17, 16 }
 0x342   : > { %4377 = vxpose.xlu0.b32.cont [6/16] (narrow) %v4376_v41, 16  ;;  %v4382_v41 = vpack.i.bf16 %v6428_v9, %v6425_v7 }
 0x346   : > { %4421 = vxpose.xlu1.b32.cont [7/16] (narrow) %v6193_v56, 16  ;;  %v4422_v56 = vpack.i.bf16 %v6401_v6, %v2416_v39  ;;  %v6455_v39 = vld [vmem:[%s5033_s11 + $0x210] sm:$0xff] }
 0x347   : > { %v4384_v48 = vpack.i.bf16 %v6455_v39, %v6452_v24 }
 0x349   : > { %4463 = vxpose.xlu2.b32.cont [7/16] (narrow) %v6310_v35, 16  ;;  %v6414_v35 = vld [vmem:[%s5033_s11 + $0x118] sm:$0xff] }
 0x34a   : > { %4379 = vxpose.xlu0.b32.cont [7/16] (narrow) %v4378_v31, 16  ;;  %v2417_v38 = vrot.slane %v6414_v35, 4 }
 0x34c   : > { %v2418_v16 = vsel %vm2166_vm4, %v7517_v52, %v2417_v38  ;;  %v7362_v52 = vrot.slane %v5909_v11, 4 }
 0x34d   : > { %v6439_v31 = vpack.i.bf16 %v2434_v62, %v2418_v16  ;;  %v7521_v16 = vrot.slane %v7483_v4, 4  ;;  %v7522_v62 = vrot.slane %v7484_v34, 4  ;;  %v6504_v34 = vld [vmem:[%s5033_s11 + $0x130] sm:$0xff] }
 0x34e   : > { %4423 = vxpose.xlu1.b32.cont [8/16] (narrow) %v4422_v56, 16  ;;  %v7519_v56 = vld [vmem:[#allocation51_spill] sm:$0xff] }
 0x34f   : > { %v2526_v28 = vrot.slane %v7519_v56, 4  ;;  %v2420_v47 = vsel %vm2166_vm4, %v7521_v16, %v2419_v61  ;;  %v6496_v56 = vsel %vm2166_vm4, %v2527_v40, %v7362_v52  ;;  %v2531_v61 = vrot.slane %v5984_v33, 4 }
 0x350   : > { %v6500_v4 = vpack.i.bf16 %v6496_v56, %v6130_v32 }
 0x351   : > { %4465 = vxpose.xlu2.b32.cont [8/16] (narrow) %v6325_v43, 16  ;;  %v6463_v60 = vsel %vm2166_vm4, %v2526_v28, %v2527_v40  ;;  %v6507_v28 = vld [vmem:[%s5033_s11 + $0x230] sm:$0xff]  ;;  %v2532_v40 = vrot.slane %v5988_v5, 4 }
 0x352   : > { %4381 = vxpose.xlu0.b32.cont [8/16] (narrow) %v4380_v57, 16  ;;  %v2435_v57 = vrot.slane %v6470_v12, 4  ;;  %v4470_v38 = vpack.i.bf16 %v6463_v60, %v6114_v30  ;;  %v4388_v3 = vpack.i.bf16 %v6507_v28, %v6504_v34 }
 0x353   : > { %v6515_v32 = vsel %vm2166_vm4, %v2531_v61, %v2532_v40  ;;  %v7526_v61 = vrot.slane %v7493_v63, 4 }
 0x354   : > { %v2436_v30 = vsel %vm2166_vm4, %v7522_v62, %v2435_v57  ;;  %v6518_v57 = vld [vmem:[%s5033_s11 + $0x158] sm:$0xff]  ;;  %v4474_v33 = vpack.i.bf16 %v6515_v32, %v6147_v29  ;;  %v6532_v62 = vld [vmem:[%s5033_s11 + $0x248] sm:$0xff] }
 0x355   : > { %7525 = vst [vmem:[#allocation5_spill] sm:$0xff] %v6532_v62 }
 0x356   : > { %4425 = vxpose.xlu1.b32.cont [9/16] (narrow) %v6220_v50, 16 }
 0x359   : > { %4467 = vxpose.xlu2.b32.cont [9/16] (narrow) %v4466_v58, 16  ;;  %v6480_v58 = vld [vmem:[%s5033_s11 + $0x228] sm:$0xff] }
 0x35a   : > { %4383 = vxpose.xlu0.b32.cont [9/16] (narrow) %v4382_v41, 16  ;;  %v4386_v41 = vpack.i.bf16 %v6480_v58, %v6477_v37 }
 0x35e   : > { %4427 = vxpose.xlu1.b32.cont [10/16] (narrow) %v6439_v31, 16 }
 0x361   : > { %4469 = vxpose.xlu2.b32.cont [10/16] (narrow) %v6448_v49, 16 }
 0x362   : > { %4385 = vxpose.xlu0.b32.cont [10/16] (narrow) %v4384_v48, 16  ;;  %v6491_v48 = vpack.i.bf16 %v2436_v30, %v2420_v47  ;;  %v6529_v47 = vld [vmem:[%s5033_s11 + $0x148] sm:$0xff] }
 0x363   : > { %7524 = vst [vmem:[#allocation42_spill] sm:$0xff] %v6529_v47  ;;  %v4390_v30 = vpack.i.bf16 %v6532_v62, %v6529_v47  ;;  %v7532_v47 = vrot.slane %v7501_v25, 4  ;;  %v7533_v62 = vrot.slane %v7502_v21, 4  ;;  %v6608_v21 = vld [vmem:[%s5033_s11 + $0x170] sm:$0xff] }
 0x366   : > { %4429 = vxpose.xlu1.b32.cont [11/16] (narrow) %v6260_v10, 16 }
 0x369   : > { %4471 = vxpose.xlu2.b32.cont [11/16] (narrow) %v4470_v38, 16  ;;  %v2421_v38 = vrot.slane %v6518_v57, 4 }
 0x36a   : > { %4387 = vxpose.xlu0.b32.cont [11/16] (narrow) %v4386_v41, 16  ;;  %v6522_v41 = vld [vmem:[%s5033_s11 + $0x258] sm:$0xff] }
 0x36b   : > { %7523 = vst [vmem:[#allocation3_spill] sm:$0xff] %v6522_v41  ;;  %v2437_v16 = vrot.slane %v6522_v41, 4  ;;  %v2422_v52 = vsel %vm2166_vm4, %v7526_v61, %v2421_v38  ;;  %v4893_v38 = vld [vmem:[%s5033_s11 + $0x2e0] sm:$0xff]  ;;  %v6574_v61 = vld [vmem:[%s5033_s11 + $0x278] sm:$0xff] }
 0x36c   : > { %7529 = vst [vmem:[#allocation10_spill] sm:$0xff] %v6574_v61 }
 0x36d   : > { %v2438_v29 = vsel %vm2166_vm4, %v7527_v8, %v2437_v16  ;;  %v6559_v8 = vld [vmem:[%s5033_s11 + $0x250] sm:$0xff]  ;;  %v2536_v16 = vrot.slane %v4893_v38, 4 }
 0x36e   : > { %4431 = vxpose.xlu1.b32.cont [12/16] (narrow) %v6491_v48, 16  ;;  %v6543_v26 = vpack.i.bf16 %v2438_v29, %v2422_v52  ;;  %v4392_v52 = vpack.i.bf16 %v6559_v8, %v6556_v1  ;;  %v2439_v29 = vrot.slane %v6574_v61, 4 }
 0x371   : > { %4473 = vxpose.xlu2.b32.cont [12/16] (narrow) %v6500_v4, 16 }
 0x372   : > { %4389 = vxpose.xlu0.b32.cont [12/16] (narrow) %v4388_v3, 16  ;;  %v7366_v3 = vrot.slane %v5996_v59, 4 }
 0x374   : > { %v6548_v14 = vsel %vm2166_vm4, %v2532_v40, %v7366_v3  ;;  %v2537_v40 = vrot.slane %v6234_v54, 4  ;;  %v6581_v3 = vld [vmem:[%s5033_s11 + $0x168] sm:$0xff] }
 0x375   : > { %v6552_v63 = vpack.i.bf16 %v6548_v14, %v6163_v51  ;;  %7530 = vst [vmem:[#allocation4_spill] sm:$0xff] %v6581_v3 }
 0x376   : > { %4433 = vxpose.xlu1.b32.cont [13/16] (narrow) %v6295_v17, 16  ;;  %v6567_v51 = vsel %vm2166_vm4, %v2536_v16, %v2537_v40 }
 0x377   : > { %v4478_v38 = vpack.i.bf16 %v6567_v51, %v6177_v53  ;;  %v2440_v53 = vsel %vm2166_vm4, %v7533_v62, %v2439_v29 }
 0x379   : > { %4475 = vxpose.xlu2.b32.cont [13/16] (narrow) %v4474_v33, 16  ;;  %v6570_v33 = vld [vmem:[%s5033_s11 + $0x178] sm:$0xff] }
 0x37a   : > { %4391 = vxpose.xlu0.b32.cont [13/16] (narrow) %v4390_v30, 16  ;;  %7528 = vst [vmem:[#allocation46_spill] sm:$0xff] %v6570_v33  ;;  %v2423_v30 = vrot.slane %v6570_v33, 4  ;;  %v7374_v33 = vrot.slane %v6256_v27, 4 }
 0x37c   : > { %v2424_v61 = vsel %vm2166_vm4, %v7532_v47, %v2423_v30  ;;  %v6611_v47 = vld [vmem:[%s5033_s11 + $0x270] sm:$0xff]  ;;  %v6617_v30 = vld [vmem:[%s5033_s11 + $0x288] sm:$0xff] }
 0x37d   : > { %v6595_v41 = vpack.i.bf16 %v2440_v53, %v2424_v61  ;;  %v4396_v62 = vpack.i.bf16 %v6611_v47, %v6608_v21  ;;  %v328_v61 = vld [vmem:[%s5033_s11] sm:$0xff] }
 0x37e   : > { %4435 = vxpose.xlu1.b32.cont [14/16] (narrow) %v6543_v26, 16  ;;  %v4576_v29 = vpack.i.bf16 %v328_v61, %v6444_v2 }
 0x381   : > { %4477 = vxpose.xlu2.b32.cont [14/16] (narrow) %v6552_v63, 16 }
 0x382   : > { %4393 = vxpose.xlu0.b32.cont [14/16] (narrow) %v4392_v52, 16  ;;  %v6584_v52 = vld [vmem:[%s5033_s11 + $0x268] sm:$0xff] }
 0x383   : > { %7531 = vst [vmem:[#allocation11_spill] sm:$0xff] %v6584_v52  ;;  %v4394_v16 = vpack.i.bf16 %v6584_v52, %v6581_v3  ;;  %v6600_v3 = vsel %vm2166_vm4, %v2537_v40, %v7374_v33  ;;  %v7534_v52 = vld [vmem:[#allocation49_spill] sm:$0xff]  ;;  %v4534_v40 = vpack.i.bf16 %v6617_v30, %v6411_v44  ;;  %v6634_v44 = vld [vmem:[%s5033_s11 + $0x8] sm:$0xff] }
 0x384   : > { %v6604_v25 = vpack.i.bf16 %v6600_v3, %v7534_v52  ;;  %v7536_v33 = vld [vmem:[#allocation53_spill] sm:$0xff] }
 0x386   : > { %4437 = vxpose.xlu1.b32.cont [15/16] (narrow) %v6325_v43, 16 }
 0x389   : > { %4479 = vxpose.xlu2.b32.cont [15/16] (narrow) %v4478_v38, 16  ;;  %v6624_v38 = vld [vmem:[%s5033_s11 + $0x298] sm:$0xff] }
 0x38a   : > { %4395 = vxpose.xlu0.b32.cont [15/16] (narrow) %v4394_v16, 16  ;;  %v2613_v52 = vrot.slane %v6624_v38, 4  ;;  %v6628_v16 = vld [vmem:[%s5033_s11 + $0x290] sm:$0xff] }
 0x38b   : > { %v4536_v53 = vpack.i.bf16 %v6628_v16, %v6444_v2 }
 0x38e   : > { %4439 = vxpose.xlu1.b32.end [16/16] (narrow) %v6595_v41, 16 }
 0x391   : > { %4481 = vxpose.xlu2.b32.end [16/16] (narrow) %v6604_v25, 16 }
 0x392   : > { %4397 = vxpose.xlu0.b32.end [16/16] (narrow) %v4396_v62, 16  ;;  %v7535_v62 = vrot.slane %v7516_v20, 4 }
 0x396   : > { %4535 = vxpose.xlu1.b32.start [1/16] (narrow) %v4534_v40, 16  ;;  %v6639_v40 = vsel %vm2166_vm4, %v7535_v62, %v2613_v52  ;;  %v2615_v52 = vrot.slane %v7536_v33, 4  ;;  %v6653_v62 = vld [vmem:[%s5033_s11 + $0x2b0] sm:$0xff]  ;;  %v4542_v33 = vpack.i.bf16 %v5988_v5, %v6515_v32  ;;  %v7539_v5 = vrot.slane %v5996_v59, 4 }
 0x397   : > { %v4578_v61 = vpack.i.bf16 %v6634_v44, %v6639_v40 }
 0x399   : > { %4577 = vxpose.xlu2.b32.start [1/16] (narrow) %v4576_v29, 16  ;;  %v6644_v29 = vld [vmem:[%s5033_s11 + $0x2a8] sm:$0xff] }
 0x39a   : > { %4493 = vxpose.xlu0.b32.start [1/16] (narrow) %v6220_v50, 16  ;;  %v4538_v2 = vpack.i.bf16 %v6644_v29, %v6463_v60  ;;  %v332_v50 = vld [vmem:[%s5033_s11 + $0x20] sm:$0xff] }
 0x39b   : > { %v4580_v20 = vpack.i.bf16 %v332_v50, %v6496_v56 }
 0x39e   : > { %4537 = vxpose.xlu1.b32.cont [2/16] (narrow) %v4536_v53, 16  ;;  %v4540_v53 = vpack.i.bf16 %v6653_v62, %v6496_v56  ;;  %v336_v56 = vld [vmem:[%s5033_s11 + $0x40] sm:$0xff] }
 0x3a1   : > { %4579 = vxpose.xlu2.b32.cont [2/16] (narrow) %v4578_v61, 16  ;;  %v6659_v61 = vld [vmem:[%s5033_s11 + $0x28] sm:$0xff] }
 0x3a2   : > { %4495 = vxpose.xlu0.b32.cont [2/16] (narrow) %v6439_v31, 16  ;;  %v7537_v31 = vrot.slane %v5909_v11, 4  ;;  %v7538_v11 = vld [vmem:[#allocation54_spill] sm:$0xff] }
 0x3a3   : > { %v2617_v50 = vrot.slane %v7538_v11, 4 }
 0x3a4   : > { %v6664_v60 = vsel %vm2166_vm4, %v7537_v31, %v2615_v52  ;;  %v6678_v52 = vld [vmem:[%s5033_s11 + $0x48] sm:$0xff]  ;;  %v6693_v31 = vld [vmem:[%s5033_s11 + $0x2f8] sm:$0xff] }
 0x3a6   : > { %4539 = vxpose.xlu1.b32.cont [3/16] (narrow) %v4538_v2, 16  ;;  %v4582_v2 = vpack.i.bf16 %v6659_v61, %v6664_v60 }
 0x3a9   : > { %4581 = vxpose.xlu2.b32.cont [3/16] (narrow) %v4580_v20, 16  ;;  %v4544_v20 = vpack.i.bf16 %v5996_v59, %v6548_v14  ;;  %v2619_v59 = vrot.slane %v6693_v31, 4 }
 0x3aa   : > { %4497 = vxpose.xlu0.b32.cont [3/16] (narrow) %v6260_v10, 16  ;;  %v4584_v10 = vpack.i.bf16 %v336_v56, %v6548_v14 }
 0x3ae   : > { %4541 = vxpose.xlu1.b32.cont [4/16] (narrow) %v4540_v53, 16  ;;  %v4546_v53 = vpack.i.bf16 %v6234_v54, %v6567_v51  ;;  %v7540_v54 = vrot.slane %v6256_v27, 4  ;;  %v7541_v51 = vld [vmem:[#allocation34_spill] sm:$0xff] }
 0x3af   : > { %v2696_v56 = vrot.slane %v7541_v51, 4 }
 0x3b1   : > { %4583 = vxpose.xlu2.b32.cont [4/16] (narrow) %v4582_v2, 16  ;;  %v4548_v2 = vpack.i.bf16 %v6256_v27, %v6600_v3 }
 0x3b2   : > { %4499 = vxpose.xlu0.b32.cont [4/16] (narrow) %v6491_v48, 16  ;;  %v6683_v48 = vsel %vm2166_vm4, %v7539_v5, %v2617_v50 }
 0x3b3   : > { %v4586_v32 = vpack.i.bf16 %v6678_v52, %v6683_v48 }
 0x3b6   : > { %4543 = vxpose.xlu1.b32.cont [5/16] (narrow) %v4542_v33, 16  ;;  %v6700_v33 = vld [vmem:[%s5033_s11 + $0x68] sm:$0xff] }
 0x3b9   : > { %4585 = vxpose.xlu2.b32.cont [5/16] (narrow) %v4584_v10, 16  ;;  %v6709_v10 = vld [vmem:[%s5033_s11 + $0x300] sm:$0xff] }
 0x3ba   : > { %4501 = vxpose.xlu0.b32.cont [5/16] (narrow) %v6295_v17, 16  ;;  %v340_v17 = vld [vmem:[%s5033_s11 + $0x60] sm:$0xff]  ;;  %v2695_v11 = vrot.slane %v6709_v10, 4 }
 0x3bb   : > { %v4588_v14 = vpack.i.bf16 %v340_v17, %v6600_v3  ;;  %v7542_v3 = vld [vmem:[#allocation41_spill] sm:$0xff]  ;;  %v7544_v17 = vld [vmem:[#allocation6_spill] sm:$0xff] }
 0x3be   : > { %4545 = vxpose.xlu1.b32.cont [6/16] (narrow) %v4544_v20, 16  ;;  %v2698_v20 = vrot.slane %v7542_v3, 4 }
 0x3c0   : > { %v2699_v5 = vsel %vm2166_vm4, %v2696_v56, %v2698_v20 }
 0x3c1   : > { %4587 = vxpose.xlu2.b32.cont [6/16] (narrow) %v4586_v32, 16  ;;  %v7543_v32 = vld [vmem:[#allocation56_spill] sm:$0xff] }
 0x3c2   : > { %4503 = vxpose.xlu0.b32.cont [6/16] (narrow) %v6543_v26, 16  ;;  %v6705_v26 = vsel %vm2166_vm4, %v7540_v54, %v2619_v59  ;;  %v4552_v59 = vpack.i.bf16 %v7542_v3, %v2699_v5  ;;  %v2701_v54 = vrot.slane %v6041_v22, 4  ;;  %v2703_v3 = vrot.slane %v6054_v42, 4 }
 0x3c3   : > { %v4590_v50 = vpack.i.bf16 %v6700_v33, %v6705_v26 }
 0x3c6   : > { %4547 = vxpose.xlu1.b32.cont [7/16] (narrow) %v4546_v53, 16  ;;  %v4592_v53 = vpack.i.bf16 %v7543_v32, %v2699_v5  ;;  %v7546_v32 = vld [vmem:[#allocation57_spill] sm:$0xff] }
 0x3c9   : > { %4589 = vxpose.xlu2.b32.cont [7/16] (narrow) %v4588_v14, 16  ;;  %v2789_v14 = vrot.slane %v7544_v17, 4  ;;  %v6747_v17 = vld [vmem:[%s5033_s11 + $0x340] sm:$0xff] }
 0x3ca   : > { %4505 = vxpose.xlu0.b32.cont [7/16] (narrow) %v6325_v43, 16  ;;  %v2697_v43 = vsel %vm2166_vm4, %v2695_v11, %v2696_v56  ;;  %v7545_v11 = vld [vmem:[#allocation55_spill] sm:$0xff]  ;;  %v4510_v56 = vpack.i.bf16 %v6639_v40, %v6341_v45  ;;  %v2791_v45 = vrot.slane %v6303_v23, 4  ;;  %v6759_v23 = vld [vmem:[%s5033_s11 + $0x350] sm:$0xff] }
 0x3cb   : > { %v4550_v27 = vpack.i.bf16 %v7541_v51, %v2697_v43  ;;  %v2700_v51 = vrot.slane %v7545_v11, 4  ;;  %v2704_v43 = vsel %vm2166_vm4, %v2701_v54, %v2703_v3  ;;  %v6744_v40 = vld [vmem:[%s5033_s11 + $0x348] sm:$0xff]  ;;  %7548 = vst [vmem:[#allocation48_spill] sm:$0xff] %v6759_v23 }
 0x3cc   : > { %7547 = vst [vmem:[#allocation8_spill] sm:$0xff] %v6744_v40 }
 0x3ce   : > { %4549 = vxpose.xlu1.b32.cont [8/16] (narrow) %v4548_v2, 16  ;;  %v2790_v2 = vsel %vm2166_vm4, %v2698_v20, %v2789_v14  ;;  %v2792_v14 = vsel %vm2166_vm4, %v2703_v3, %v2791_v45  ;;  %v6782_v45 = vld [vmem:[%s5033_s11 + $0x368] sm:$0xff] }
 0x3cf   : > { %7550 = vst [vmem:[#allocation9_spill] sm:$0xff] %v6782_v45 }
 0x3d1   : > { %4591 = vxpose.xlu2.b32.cont [8/16] (narrow) %v4590_v50, 16  ;;  %v6726_v50 = vpop.trf.xlu0 }
 0x3d2   : > { %4507 = vxpose.xlu0.b32.cont [8/16] (narrow) %v6595_v41, 16  ;;  %v4594_v41 = vpack.i.bf16 %v6068_v13, %v2790_v2  ;;  %v6739_v13 = vpop.trf.xlu1  ;;  %v2705_v2 = vrot.slane %v6747_v17, 4 }
 0x3d6   : > { %4551 = vxpose.xlu1.b32.cont [9/16] (narrow) %v4550_v27, 16  ;;  %v6735_v27 = vpop.trf.xlu2 }
 0x3d9   : > { %4593 = vxpose.xlu2.b32.cont [9/16] (narrow) %v4592_v53, 16  ;;  %v6737_v5 = vpop.trf.xlu0  ;;  %v4596_v53 = vpack.i.bf16 %v7546_v32, %v2704_v43 }
 0x3da   : > { %4509 = vxpose.xlu0.b32.cont [9/16] (narrow) %v6448_v49, 16  ;;  %v2702_v49 = vsel %vm2166_vm4, %v2700_v51, %v2701_v54  ;;  %v6761_v51 = vpop.trf.xlu1 }
 0x3db   : > { %v4554_v20 = vpack.i.bf16 %v6041_v22, %v2702_v49  ;;  %v4556_v22 = vpack.i.bf16 %v6054_v42, %v2704_v43  ;;  %v4598_v42 = vpack.i.bf16 %v6100_v46, %v2792_v14  ;;  %v6775_v46 = vld [vmem:[%s5033_s11 + $0x358] sm:$0xff] }
 0x3dc   : > { %7549 = vst [vmem:[#allocation7_spill] sm:$0xff] %v6775_v46 }
 0x3de   : > { %4553 = vxpose.xlu1.b32.cont [10/16] (narrow) %v4552_v59, 16  ;;  %v2706_v59 = vrot.slane %v6744_v40, 4  ;;  %v6754_v54 = vpop.trf.xlu2 }
 0x3e1   : > { %4595 = vxpose.xlu2.b32.cont [10/16] (narrow) %v4594_v41, 16  ;;  %v6756_v11 = vpop.trf.xlu0  ;;  %v2708_v41 = vrot.slane %v6759_v23, 4 }
 0x3e2   : > { %4511 = vxpose.xlu0.b32.cont [10/16] (narrow) %v4510_v56, 16  ;;  %v2707_v56 = vsel %vm2166_vm4, %v2705_v2, %v2706_v59  ;;  %v6777_v32 = vpop.trf.xlu1  ;;  %v2711_v2 = vrot.slane %v6782_v45, 4 }
 0x3e3   : > { %v4558_v3 = vpack.i.bf16 %v6744_v40, %v2707_v56  ;;  %v2709_v49 = vsel %vm2166_vm4, %v2706_v59, %v2708_v41 }
 0x3e4   : > { %v4560_v14 = vpack.i.bf16 %v6759_v23, %v2709_v49 }
 0x3e6   : > { %4555 = vxpose.xlu1.b32.cont [11/16] (narrow) %v4554_v20, 16  ;;  %v6770_v20 = vpop.trf.xlu2 }
 0x3e9   : > { %4597 = vxpose.xlu2.b32.cont [11/16] (narrow) %v4596_v53, 16  ;;  %v6772_v43 = vpop.trf.xlu0  ;;  %v2793_v53 = vrot.slane %v6775_v46, 4 }
 0x3ea   : > { %4513 = vxpose.xlu0.b32.cont [11/16] (narrow) %v6500_v4, 16  ;;  %v4514_v4 = vpack.i.bf16 %v6664_v60, %v6359_v18  ;;  %v4907_v18 = vld [vmem:[%s5033_s11 + $0xc0] sm:$0xff] }
 0x3eb   : > { %v4600_v60 = vpack.i.bf16 %v4907_v18, %v2709_v49  ;;  %v2794_v59 = vsel %vm2166_vm4, %v2708_v41, %v2793_v53  ;;  %v6799_v18 = vpop.trf.xlu1  ;;  %v4518_v41 = vpack.i.bf16 %v6683_v48, %v6380_v19  ;;  %v6821_v48 = vld [vmem:[%s5033_s11 + $0x378] sm:$0xff] }
 0x3ec   : > { %7553 = vst [vmem:[#allocation17_spill] sm:$0xff] %v6821_v48  ;;  %v2795_v23 = vrot.slane %v6821_v48, 4  ;;  %v4909_v48 = vld [vmem:[%s5033_s11 + $0x200] sm:$0xff] }
 0x3ee   : > { %4557 = vxpose.xlu1.b32.cont [12/16] (narrow) %v4556_v22, 16  ;;  %v6785_v22 = vld [vmem:[%s5033_s11 + $0x360] sm:$0xff] }
 0x3ef   : > { %7551 = vst [vmem:[#allocation16_spill] sm:$0xff] %v6785_v22 }
 0x3f1   : > { %4599 = vxpose.xlu2.b32.cont [12/16] (narrow) %v4598_v42, 16  ;;  %v2710_v42 = vrot.slane %v6785_v22, 4  ;;  %v6794_v56 = vpop.trf.xlu0  ;;  %v6810_v22 = vunpack.i.l.bf16 %v6777_v32 }
 0x3f2   : > { %4515 = vxpose.xlu0.b32.cont [12/16] (narrow) %v4514_v4, 16  ;;  %v6792_v4 = vpop.trf.xlu2 }
 0x3f3   : > { %v2712_v53 = vsel %vm2166_vm4, %v2710_v42, %v2711_v2  ;;  %v4908_v42 = vld [vmem:[%s5033_s11 + $0xe0] sm:$0xff] }
 0x3f4   : > { %v4562_v46 = vpack.i.bf16 %v6782_v45, %v2712_v53 }
 0x3f6   : > { %4559 = vxpose.xlu1.b32.cont [13/16] (narrow) %v4558_v3, 16  ;;  %v6797_v3 = vld [vmem:[%s5033_s11 + $0x370] sm:$0xff] }
 0x3f7   : > { %7552 = vst [vmem:[#allocation12_spill] sm:$0xff] %v6797_v3  ;;  %v2713_v49 = vrot.slane %v6797_v3, 4 }
 0x3f9   : > { %4601 = vxpose.xlu2.b32.cont [13/16] (narrow) %v4600_v60, 16  ;;  %v6802_v60 = vunpack.i.l.bf16 %v6799_v18  ;;  %v6818_v19 = vpop.trf.xlu0 }
 0x3fa   : > { %4517 = vxpose.xlu0.b32.cont [13/16] (narrow) %v6552_v63, 16  ;;  %v4602_v63 = vpack.i.bf16 %v6370_v15, %v2794_v59  ;;  %v2714_v15 = vsel %vm2166_vm4, %v2711_v2, %v2713_v49  ;;  %v6823_v59 = vpop.trf.xlu1  ;;  %v2796_v2 = vsel %vm2166_vm4, %v2713_v49, %v2795_v23 }
 0x3fb   : > { %3251 = vmatpush.msra.mxu3 %v6802_v60  ;;  %v4604_v40 = vpack.i.bf16 %v4908_v42, %v2714_v15 }
 0x3fd   : > { %3252 = vmatpush.msra.mxu3 %v6810_v22 }
 0x3fe   : > { %4561 = vxpose.xlu1.b32.cont [14/16] (narrow) %v4560_v14, 16  ;;  %v6816_v14 = vpop.trf.xlu2 }
 0x401   : > { %4603 = vxpose.xlu2.b32.cont [14/16] (narrow) %v4602_v63, 16  ;;  %v4564_v63 = vpack.i.bf16 %v6797_v3, %v2714_v15  ;;  %v6832_v53 = vpop.trf.xlu0  ;;  %v330_v15 = vld [vmem:[%s5033_s11 + $0x10] sm:$0xff]  ;;  %v4702_v3 = vpack.i.bf16 %v4909_v48, %v6455_v39  ;;  %v4704_v39 = vpack.i.bf16 %v6428_v9, %v6418_v0  ;;  %v4912_v0 = vld [vmem:[%s5033_s11 + $0x120] sm:$0xff] }
 0x402   : > { %4519 = vxpose.xlu0.b32.cont [14/16] (narrow) %v4518_v41, 16  ;;  %v6834_v45 = vpop.trf.xlu1  ;;  %v334_v48 = vld [vmem:[%s5033_s11 + $0x30] sm:$0xff]  ;;  %v4622_v9 = vpack.i.bf16 %v6659_v61, %v4912_v0 }
 0x403   : > { %v4624_v61 = vpack.i.bf16 %v334_v48, %v6477_v37  ;;  %v4914_v37 = vld [vmem:[%s5033_s11 + $0x140] sm:$0xff] }
 0x406   : > { %4563 = vxpose.xlu1.b32.cont [15/16] (narrow) %v4562_v46, 16  ;;  %v6830_v41 = vpop.trf.xlu2  ;;  %v4606_v46 = vpack.i.bf16 %v6391_v55, %v2796_v2  ;;  %v4910_v55 = vld [vmem:[%s5033_s11 + $0x100] sm:$0xff] }
 0x409   : > { %4605 = vxpose.xlu2.b32.cont [15/16] (narrow) %v4604_v40, 16  ;;  %v4522_v40 = vpack.i.bf16 %v6705_v26, %v6401_v6  ;;  %v6843_v49 = vpop.trf.xlu0  ;;  %v331_v6 = vld [vmem:[%s5033_s11 + $0x18] sm:$0xff] }
 0x40a   : > { %4521 = vxpose.xlu0.b32.cont [15/16] (narrow) %v6604_v25, 16  ;;  %v4660_v25 = vpack.i.bf16 %v6452_v24, %v330_v15  ;;  %v6845_v42 = vpop.trf.xlu1  ;;  %v4662_v24 = vpack.i.bf16 %v6414_v35, %v331_v6 }
 0x40e   : > { %4565 = vxpose.xlu1.b32.end [16/16] (narrow) %v4564_v63, 16  ;;  %v6841_v23 = vpop.trf.xlu2  ;;  %v4618_v63 = vpack.i.bf16 %v6634_v44, %v4910_v55  ;;  %v4620_v44 = vpack.i.bf16 %v330_v15, %v6425_v7  ;;  %v4911_v55 = vld [vmem:[%s5033_s11 + $0x220] sm:$0xff]  ;;  %v335_v7 = vld [vmem:[%s5033_s11 + $0x38] sm:$0xff] }
 0x40f   : > { %v4666_v15 = vpack.i.bf16 %v6466_v36, %v335_v7  ;;  %v338_v36 = vld [vmem:[%s5033_s11 + $0x50] sm:$0xff] }
 0x411   : > { %4607 = vxpose.xlu2.b32.end [16/16] (narrow) %v4606_v46, 16  ;;  %v6855_v2 = vpop.trf.xlu0 }
 0x412   : > { %4523 = vxpose.xlu0.b32.end [16/16] (narrow) %v4522_v40, 16  ;;  %v6857_v46 = vpop.trf.xlu1 }
 0x416   : > { %4661 = vxpose.xlu1.b32.start [1/16] (narrow) %v4660_v25, 16  ;;  %v6853_v26 = vpop.trf.xlu2 }
 0x419   : > { %4703 = vxpose.xlu2.b32.start [1/16] (narrow) %v4702_v3, 16  ;;  %v4664_v3 = vpack.i.bf16 %v6504_v34, %v334_v48  ;;  %v6866_v40 = vpop.trf.xlu0  ;;  %v4626_v48 = vpack.i.bf16 %v6678_v52, %v4914_v37  ;;  %v7554_v52 = vld [vmem:[#allocation3_spill] sm:$0xff] }
 0x41a   : > { %4619 = vxpose.xlu0.b32.start [1/16] (narrow) %v4618_v63, 16  ;;  %v6868_v25 = vpop.trf.xlu1  ;;  %v4706_v63 = vpack.i.bf16 %v4911_v55, %v6507_v28  ;;  %v4152_v7 = vunpack.i.l.bf16 %v6866_v40 }
 0x41b   : > { %v4189_v0 = vunpack.i.l.bf16 %v6868_v25 }
 0x41e   : > { %4663 = vxpose.xlu1.b32.cont [2/16] (narrow) %v4662_v24, 16  ;;  %v6864_v35 = vpop.trf.xlu2 }
 0x41f   : > { %v4231_v28 = vunpack.i.l.bf16 %v6864_v35 }
 0x421   : > { %4705 = vxpose.xlu2.b32.cont [2/16] (narrow) %v4704_v39, 16  ;;  %v6878_v6 = vpop.trf.xlu0 }
 0x422   : > { %4621 = vxpose.xlu0.b32.cont [2/16] (narrow) %v4620_v44, 16  ;;  %v6880_v24 = vpop.trf.xlu1  ;;  %v4708_v44 = vpack.i.bf16 %v6480_v58, %v6470_v12  ;;  %v4913_v12 = vld [vmem:[%s5033_s11 + $0x240] sm:$0xff] }
 0x423   : > { %v4194_v55 = vunpack.i.l.bf16 %v6880_v24  ;;  %v4710_v58 = vpack.i.bf16 %v4913_v12, %v6559_v8  ;;  %v4147_v8 = vunpack.i.l.bf16 %v6855_v2  ;;  %v4068_v12 = vunpack.i.l.bf16 %v6857_v46 }
 0x426   : > { %4665 = vxpose.xlu1.b32.cont [3/16] (narrow) %v4664_v3, 16  ;;  %v6876_v34 = vpop.trf.xlu2  ;;  %v4668_v3 = vpack.i.bf16 %v6556_v1, %v338_v36 }
 0x427   : > { %v4236_v39 = vunpack.i.l.bf16 %v6876_v34 }
 0x429   : > { %4707 = vxpose.xlu2.b32.cont [3/16] (narrow) %v4706_v63, 16  ;;  %3205 = vmatpush.msra.mxu1 %v4236_v39  ;;  %v6890_v63 = vpop.trf.xlu0  ;;  %v4110_v39 = vunpack.i.l.bf16 %v6853_v26 }
 0x42a   : > { %4623 = vxpose.xlu0.b32.cont [3/16] (narrow) %v4622_v9, 16  ;;  %v339_v9 = vld [vmem:[%s5033_s11 + $0x58] sm:$0xff] }
 0x42b   : > { %3206 = vmatpush.msra.mxu1 %v4231_v28  ;;  %v4670_v1 = vpack.i.bf16 %v6518_v57, %v339_v9  ;;  %v7555_v28 = vld [vmem:[#allocation5_spill] sm:$0xff]  ;;  %v4105_v57 = vunpack.i.l.bf16 %v6841_v23  ;;  %v4026_v9 = vunpack.i.l.bf16 %v6843_v49 }
 0x42d   : > { %3207 = vmatpush.msra.mxu1 %v4194_v55  ;;  %v342_v55 = vld [vmem:[%s5033_s11 + $0x70] sm:$0xff] }
 0x42e   : > { %4667 = vxpose.xlu1.b32.cont [4/16] (narrow) %v4666_v15, 16  ;;  %v6915_v37 = vpop.trf.xlu2 }
 0x42f   : > { %3208 = vmatpush.msra.mxu1 %v4189_v0  ;;  %v4672_v0 = vpack.i.bf16 %v6608_v21, %v342_v55  ;;  %v4021_v21 = vunpack.i.l.bf16 %v6832_v53 }
 0x431   : > { %4709 = vxpose.xlu2.b32.cont [4/16] (narrow) %v4708_v44, 16  ;;  %3209 = vmatpush.msra.mxu1 %v6802_v60  ;;  %v6902_v15 = vpop.trf.xlu0  ;;  %v4712_v44 = vpack.i.bf16 %v7555_v28, %v7554_v52  ;;  %v343_v52 = vld [vmem:[%s5033_s11 + $0x78] sm:$0xff] }
 0x432   : > { %4625 = vxpose.xlu0.b32.cont [4/16] (narrow) %v4624_v61, 16  ;;  %v7556_v61 = vld [vmem:[#allocation42_spill] sm:$0xff] }
 0x433   : > { %3210 = vmatpush.msra.mxu1 %v6810_v22  ;;  %v7557_v28 = vld [vmem:[#allocation46_spill] sm:$0xff] }
 0x435   : > { %3211 = vmatpush.msra.mxu1 %v4152_v7 }
 0x436   : > { %4669 = vxpose.xlu1.b32.cont [5/16] (narrow) %v4668_v3, 16  ;;  %v4628_v3 = vpack.i.bf16 %v338_v36, %v7556_v61  ;;  %v6919_v36 = vpop.trf.xlu1 }
 0x437   : > { %3212 = vmatpush.msra.mxu1 %v4147_v8  ;;  %v4916_v8 = vld [vmem:[%s5033_s11 + $0x160] sm:$0xff] }
 0x439   : > { %4711 = vxpose.xlu2.b32.cont [5/16] (narrow) %v4710_v58, 16  ;;  %3213 = vmatpush.msra.mxu1 %v4110_v39  ;;  %v6913_v58 = vpop.trf.xlu0  ;;  %v4630_v39 = vpack.i.bf16 %v6700_v33, %v4916_v8  ;;  %v3937_v33 = vunpack.i.l.bf16 %v6823_v59  ;;  %v7560_v8 = vld [vmem:[#allocation4_spill] sm:$0xff] }
 0x43a   : > { %4627 = vxpose.xlu0.b32.cont [5/16] (narrow) %v4626_v48, 16  ;;  %v4063_v48 = vunpack.i.l.bf16 %v6845_v42 }
 0x43b   : > { %3214 = vmatpush.msra.mxu1 %v4105_v57  ;;  %v3984_v57 = vunpack.i.l.bf16 %v6830_v41 }
 0x43d   : > { %3215 = vmatpush.msra.mxu1 %v4068_v12  ;;  %v3945_v12 = vunpack.i.h.bf16 %v6834_v45 }
 0x43e   : > { %4671 = vxpose.xlu1.b32.cont [6/16] (narrow) %v4670_v1, 16  ;;  %v4915_v1 = vld [vmem:[%s5033_s11 + $0x260] sm:$0xff] }
 0x43f   : > { %v4714_v7 = vpack.i.bf16 %v4915_v1, %v6611_v47  ;;  %3216 = vmatpush.msra.mxu1 %v4063_v48  ;;  %v3979_v47 = vunpack.i.l.bf16 %v6816_v14  ;;  %v6937_v48 = vpop.trf.xlu1  ;;  %v7558_v1 = vld [vmem:[#allocation10_spill] sm:$0xff] }
 0x441   : > { %4713 = vxpose.xlu2.b32.cont [6/16] (narrow) %v4712_v44, 16  ;;  %3217 = vmatpush.msra.mxu1 %v4026_v9  ;;  %v4674_v44 = vpack.i.bf16 %v7557_v28, %v343_v52  ;;  %v6929_v61 = vpop.trf.xlu0  ;;  %v3940_v9 = vunpack.i.h.bf16 %v6823_v59  ;;  %v3903_v52 = vunpack.i.h.bf16 %v6818_v19  ;;  %v4917_v28 = vld [vmem:[%s5033_s11 + $0x190] sm:$0xff] }
 0x442   : > { %4629 = vxpose.xlu0.b32.cont [6/16] (narrow) %v4628_v3, 16  ;;  %v6931_v3 = vpop.trf.xlu2 }
 0x443   : > { %3218 = vmatpush.msra.mxu1 %v4021_v21 }
 0x445   : > { %3219 = vmatpush.msra.mxu1 %v3984_v57  ;;  %v6947_v57 = vld [vmem:[%s5033_s11 + $0x90] sm:$0xff] }
 0x446   : > { %4673 = vxpose.xlu1.b32.cont [7/16] (narrow) %v4672_v0, 16  ;;  %v3942_v0 = vunpack.i.l.bf16 %v6834_v45  ;;  %v3900_v45 = vunpack.i.l.bf16 %v6818_v19  ;;  %v4676_v59 = vpack.i.bf16 %v4917_v28, %v6947_v57  ;;  %v3858_v19 = vunpack.i.l.bf16 %v6792_v4  ;;  %v4922_v28 = vld [vmem:[%s5033_s11 + $0x198] sm:$0xff] }
 0x447   : > { %3220 = vmatpush.msra.mxu1 %v3979_v47 }
 0x448   : > { %3182 = vmatpush.msra.mxu0 %v3942_v0 }
 0x449   : > { %4715 = vxpose.xlu2.b32.cont [7/16] (narrow) %v4714_v7, 16  ;;  %v7559_v7 = vld [vmem:[#allocation11_spill] sm:$0xff]  ;;  %3297 = vmatpush.msrb.mxu1 %v3945_v12  ;;  %v6952_v47 = vpop.trf.xlu0  ;;  %v3861_v12 = vunpack.i.h.bf16 %v6792_v4 }
 0x44a   : > { %4631 = vxpose.xlu0.b32.cont [7/16] (narrow) %v4630_v39, 16  ;;  %v4716_v21 = vpack.i.bf16 %v7559_v7, %v7558_v1  ;;  %v4632_v39 = vpack.i.bf16 %v342_v55, %v7560_v8  ;;  %3183 = vmatpush.msra.mxu0 %v3937_v33  ;;  %v3898_v55 = vunpack.i.h.bf16 %v6794_v56  ;;  %v6954_v0 = vpop.trf.xlu2  ;;  %v6958_v33 = vpop.trf.xlu1  ;;  %v3853_v1 = vunpack.i.l.bf16 %v6770_v20  ;;  %v4919_v7 = vld [vmem:[%s5033_s11 + $0x280] sm:$0xff] }
 0x44b   : > { %3298 = vmatpush.msrb.mxu1 %v3940_v9  ;;  %v4530_v9 = vunpack.i.l.bf16 %v6952_v47  ;;  %v4525_v8 = vunpack.i.l.bf16 %v6929_v61  ;;  %v4920_v4 = vld [vmem:[%s5033_s11 + $0x180] sm:$0xff] }
 0x44c   : > { %3184 = vmatpush.msra.mxu0 %v3900_v45 }
 0x44d   : > { %3299 = vmatpush.msrb.mxu1 %v3903_v52  ;;  %3228 = vmatpush.msra.mxu2 %v4530_v9  ;;  %v6969_v52 = vunpack.i.h.bf16 %v6799_v18  ;;  %v3774_v18 = vunpack.i.l.bf16 %v6772_v43  ;;  %v4720_v9 = vpack.i.bf16 %v6617_v30, %v6624_v38  ;;  %v3735_v30 = vunpack.i.h.bf16 %v6754_v54  ;;  %v4925_v38 = vld [vmem:[%s5033_s11 + $0x1b0] sm:$0xff] }
 0x44e   : > { %4675 = vxpose.xlu1.b32.cont [8/16] (narrow) %v4674_v44, 16  ;;  %v3895_v44 = vunpack.i.l.bf16 %v6794_v56  ;;  %v4718_v56 = vpack.i.bf16 %v4919_v7, %v6628_v16  ;;  %v6972_v16 = vunpack.i.h.bf16 %v6777_v32  ;;  %v3777_v32 = vunpack.i.h.bf16 %v6772_v43  ;;  %v4924_v7 = vld [vmem:[%s5033_s11 + $0x188] sm:$0xff] }
 0x44f   : > { %3300 = vmatpush.msrb.mxu1 %v3898_v55  ;;  %3229 = vmatpush.msra.mxu2 %v4525_v8  ;;  %v4636_v43 = vpack.i.bf16 %v6947_v57, %v4924_v7  ;;  %v7000_v8 = vld [vmem:[%s5033_s11 + $0xb0] sm:$0xff]  ;;  %v4930_v7 = vld [vmem:[%s5033_s11 + $0x1b8] sm:$0xff] }
 0x450   : > { %3185 = vmatpush.msra.mxu0 %v3895_v44 }
 0x451   : > { %4717 = vxpose.xlu2.b32.cont [8/16] (narrow) %v4716_v21, 16  ;;  %v3856_v21 = vunpack.i.h.bf16 %v6770_v20  ;;  %3301 = vmatpush.msrb.mxu1 %v3861_v12  ;;  %v3769_v12 = vunpack.i.l.bf16 %v6756_v11 }
 0x452   : > { %4633 = vxpose.xlu0.b32.cont [8/16] (narrow) %v4632_v39, 16  ;;  %v4921_v39 = vld [vmem:[%s5033_s11 + $0x88] sm:$0xff]  ;;  %3186 = vmatpush.msra.mxu0 %v3858_v19  ;;  %v6977_v44 = vpop.trf.xlu2  ;;  %v6983_v55 = vpop.trf.xlu1 }
 0x453   : > { %v4634_v45 = vpack.i.bf16 %v4921_v39, %v4920_v4  ;;  %3302 = vmatpush.msrb.mxu1 %v3856_v21  ;;  %3230 = vmatpush.msra.mxu2 %v6802_v60  ;;  %v4488_v19 = vunpack.i.l.bf16 %v6977_v44  ;;  %v3732_v21 = vunpack.i.l.bf16 %v6754_v54  ;;  %v4446_v57 = vunpack.i.l.bf16 %v6983_v55 }
 0x454   : > { %3187 = vmatpush.msra.mxu0 %v3853_v1  ;;  %v3772_v1 = vunpack.i.h.bf16 %v6756_v11  ;;  %v4680_v11 = vpack.i.bf16 %v4925_v38, %v7000_v8  ;;  %v3727_v4 = vunpack.i.l.bf16 %v6735_v27  ;;  %v3730_v39 = vunpack.i.h.bf16 %v6735_v27  ;;  %v4932_v38 = vld [vmem:[%s5033_s11 + $0x2b8] sm:$0xff] }
 0x455   : > { %3303 = vmatpush.msrb.mxu1 %v6969_v52  ;;  %3231 = vmatpush.msra.mxu2 %v6810_v22  ;;  %v4441_v54 = vunpack.i.l.bf16 %v6958_v33  ;;  %v3643_v27 = vunpack.i.l.bf16 %v6739_v13 }
 0x456   : > { %4677 = vxpose.xlu1.b32.cont [9/16] (narrow) %v4676_v59, 16  ;;  %v4923_v59 = vld [vmem:[%s5033_s11 + $0x98] sm:$0xff]  ;;  %3188 = vmatpush.msra.mxu0 %v6802_v60 }
 0x457   : > { %v4678_v20 = vpack.i.bf16 %v4922_v28, %v4923_v59  ;;  %3304 = vmatpush.msrb.mxu1 %v6972_v16  ;;  %3232 = vmatpush.msra.mxu2 %v4488_v19  ;;  %v3651_v28 = vunpack.i.h.bf16 %v6761_v51  ;;  %v4404_v59 = vunpack.i.l.bf16 %v6913_v58  ;;  %v4929_v19 = vld [vmem:[%s5033_s11 + $0xa8] sm:$0xff] }
 0x458   : > { %3189 = vmatpush.msra.mxu0 %v6810_v22 }
 0x459   : > { %4719 = vxpose.xlu2.b32.cont [9/16] (narrow) %v4718_v56, 16  ;;  %v4483_v56 = vunpack.i.l.bf16 %v6954_v0  ;;  %3305 = vmatpush.msrb.mxu1 %v3777_v32  ;;  %v4928_v32 = vld [vmem:[%s5033_s11 + $0x1a0] sm:$0xff] }
 0x45a   : > { %4635 = vxpose.xlu0.b32.cont [9/16] (narrow) %v4634_v45, 16  ;;  %3190 = vmatpush.msra.mxu0 %v3774_v18  ;;  %v3648_v45 = vunpack.i.l.bf16 %v6761_v51  ;;  %v4399_v51 = vunpack.i.l.bf16 %v6902_v15 }
 0x45b   : > { %3306 = vmatpush.msrb.mxu1 %v3772_v1  ;;  %3233 = vmatpush.msra.mxu2 %v4483_v56  ;;  %v3693_v1 = vunpack.i.h.bf16 %v6737_v5 }
 0x45c   : > { %3191 = vmatpush.msra.mxu0 %v3769_v12  ;;  %v4638_v12 = vpack.i.bf16 %v4929_v19, %v4928_v32  ;;  %v4938_v32 = vld [vmem:[%s5033_s11 + $0x1c0] sm:$0xff]  ;;  %v4939_v19 = vld [vmem:[%s5033_s11 + $0xc8] sm:$0xff] }
 0x45d   : > { %3307 = vmatpush.msrb.mxu1 %v3735_v30  ;;  %3234 = vmatpush.msra.mxu2 %v4446_v57  ;;  %v3688_v30 = vunpack.i.h.bf16 %v6726_v50  ;;  %v4320_v57 = vunpack.i.l.bf16 %v6937_v48 }
 0x45e   : > { %4679 = vxpose.xlu1.b32.cont [10/16] (narrow) %v4678_v20, 16  ;;  %3192 = vmatpush.msra.mxu0 %v3732_v21  ;;  %v4927_v20 = vld [vmem:[%s5033_s11 + $0x2a0] sm:$0xff]  ;;  %v4362_v21 = vunpack.i.l.bf16 %v6931_v3 }
 0x45f   : > { %v4722_v18 = vpack.i.bf16 %v4927_v20, %v6653_v62  ;;  %3308 = vmatpush.msrb.mxu1 %v3730_v39  ;;  %3235 = vmatpush.msra.mxu2 %v4441_v54  ;;  %v3690_v62 = vunpack.i.l.bf16 %v6737_v5  ;;  %v4357_v5 = vunpack.i.l.bf16 %v6915_v37  ;;  %v4934_v54 = vld [vmem:[%s5033_s11 + $0x1d0] sm:$0xff] }
 0x460   : > { %3193 = vmatpush.msra.mxu0 %v3727_v4  ;;  %v4933_v4 = vld [vmem:[%s5033_s11 + $0x1a8] sm:$0xff]  ;;  %v4936_v20 = vld [vmem:[%s5033_s11 + $0x2d0] sm:$0xff] }
 0x461   : > { %4721 = vxpose.xlu2.b32.cont [10/16] (narrow) %v4720_v9, 16  ;;  %v3646_v9 = vunpack.i.h.bf16 %v6739_v13  ;;  %3309 = vmatpush.msrb.mxu1 %v3651_v28  ;;  %v3685_v13 = vunpack.i.l.bf16 %v6726_v50  ;;  %v4640_v39 = vpack.i.bf16 %v7000_v8, %v4933_v4  ;;  %v4315_v50 = vunpack.i.l.bf16 %v6919_v36  ;;  %v4949_v4 = vld [vmem:[%s5033_s11 + $0xe8] sm:$0xff] }
 0x462   : > { %4637 = vxpose.xlu0.b32.cont [10/16] (narrow) %v4636_v43, 16  ;;  %3194 = vmatpush.msra.mxu0 %v3648_v45  ;;  %v4931_v43 = vld [vmem:[%s5033_s11 + $0xb8] sm:$0xff]  ;;  %v4935_v45 = vld [vmem:[%s5033_s11 + $0xd0] sm:$0xff]  ;;  %v4278_v28 = vunpack.i.l.bf16 %v6890_v63  ;;  %v4273_v8 = vunpack.i.l.bf16 %v6878_v6 }
 0x463   : > { %3236 = vmatpush.msra.mxu2 %v4404_v59  ;;  %v4682_v56 = vpack.i.bf16 %v4930_v7, %v4931_v43  ;;  %3310 = vmatpush.msrb.mxu1 %v3646_v9  ;;  %v4239_v59 = vunpack.i.h.bf16 %v6876_v34  ;;  %v4234_v9 = vunpack.i.h.bf16 %v6864_v35  ;;  %v4941_v34 = vld [vmem:[%s5033_s11 + $0xd8] sm:$0xff]  ;;  %v4192_v7 = vunpack.i.h.bf16 %v6868_v25  ;;  %v4942_v43 = vld [vmem:[%s5033_s11 + $0x2c8] sm:$0xff] }
 0x464   : > { %3195 = vmatpush.msra.mxu0 %v3643_v27  ;;  %v4943_v35 = vld [vmem:[%s5033_s11 + $0x2d8] sm:$0xff] }
 0x465   : > { %3237 = vmatpush.msra.mxu2 %v4399_v51  ;;  %3311 = vmatpush.msrb.mxu1 %v3693_v1  ;;  %v4197_v51 = vunpack.i.h.bf16 %v6880_v24 }
 0x466   : > { %4681 = vxpose.xlu1.b32.cont [11/16] (narrow) %v4680_v11, 16  ;;  %3196 = vmatpush.msra.mxu0 %v3690_v62  ;;  %v4724_v11 = vpack.i.bf16 %v6644_v29, %v4932_v38  ;;  %v4684_v29 = vpack.i.bf16 %v4934_v54, %v4935_v45  ;;  %v4940_v62 = vld [vmem:[%s5033_s11 + $0x1d8] sm:$0xff]  ;;  %v4947_v38 = vld [vmem:[%s5033_s11 + $0x2f0] sm:$0xff] }
 0x467   : > { %3238 = vmatpush.msra.mxu2 %v4362_v21  ;;  %3312 = vmatpush.msrb.mxu1 %v3688_v30  ;;  %v4686_v1 = vpack.i.bf16 %v4940_v62, %v4941_v34  ;;  %v4944_v21 = vld [vmem:[%s5033_s11 + $0x1c8] sm:$0xff]  ;;  %v4946_v30 = vld [vmem:[%s5033_s11 + $0x1f0] sm:$0xff]  ;;  %v4951_v54 = vld [vmem:[%s5033_s11 + $0xf8] sm:$0xff] }
 0x468   : > { %3197 = vmatpush.msra.mxu0 %v3685_v13  ;;  %v4644_v24 = vpack.i.bf16 %v4935_v45, %v4944_v21  ;;  %v4945_v13 = vld [vmem:[%s5033_s11 + $0xf0] sm:$0xff]  ;;  %v4952_v45 = vld [vmem:[%s5033_s11 + $0x1f8] sm:$0xff] }
 0x469   : > { %4723 = vxpose.xlu2.b32.cont [11/16] (narrow) %v4722_v18, 16  ;;  %3239 = vmatpush.msra.mxu2 %v4357_v5  ;;  %v4937_v18 = vld [vmem:[%s5033_s11 + $0x2c0] sm:$0xff]  ;;  %v4688_v25 = vpack.i.bf16 %v4946_v30, %v4945_v13  ;;  %v7052_v5 = vpop.trf.xlu2  ;;  %v4956_v62 = vld [vmem:[%s5033_s11 + $0x310] sm:$0xff] }
 0x46a   : > { %4639 = vxpose.xlu0.b32.cont [11/16] (narrow) %v4638_v12, 16  ;;  %v4726_v27 = vpack.i.bf16 %v4937_v18, %v4936_v20  ;;  %v4642_v12 = vpack.i.bf16 %v4939_v19, %v4938_v32  ;;  %v4150_v20 = vunpack.i.h.bf16 %v6855_v2  ;;  %v4953_v18 = vld [vmem:[%s5033_s11 + $0x2e8] sm:$0xff]  ;;  %v4071_v2 = vunpack.i.h.bf16 %v6857_v46 }
 0x46b   : > { %3240 = vmatpush.msra.mxu2 %v4320_v57  ;;  %v4954_v32 = vld [vmem:[%s5033_s11 + $0x1e8] sm:$0xff]  ;;  %v3987_v46 = vunpack.i.h.bf16 %v6830_v41  ;;  %v4961_v41 = vld [vmem:[%s5033_s11 + $0x338] sm:$0xff] }
 0x46c   : > { %v4648_v19 = vpack.i.bf16 %v4945_v13, %v4954_v32  ;;  %v7561_v21 = vld [vmem:[#allocation48_spill] sm:$0xff] }
 0x46d   : > { %3241 = vmatpush.msra.mxu2 %v4315_v50 }
 0x46e   : > { %4683 = vxpose.xlu1.b32.cont [12/16] (narrow) %v4682_v56, 16  ;;  %v4728_v56 = vpack.i.bf16 %v4942_v43, %v4943_v35  ;;  %v4960_v43 = vld [vmem:[%s5033_s11 + $0x330] sm:$0xff] }
 0x46f   : > { %3242 = vmatpush.msra.mxu2 %v4278_v28 }
 0x471   : > { %4725 = vxpose.xlu2.b32.cont [12/16] (narrow) %v4724_v11, 16  ;;  %3243 = vmatpush.msra.mxu2 %v4273_v8  ;;  %v4948_v11 = vld [vmem:[%s5033_s11 + $0x2e0] sm:$0xff]  ;;  %v7060_v28 = vpop.trf.xlu2  ;;  %v7062_v8 = vpop.trf.xlu1 }
 0x472   : > { %4641 = vxpose.xlu0.b32.cont [12/16] (narrow) %v4640_v39, 16  ;;  %v4730_v57 = vpack.i.bf16 %v4948_v11, %v4947_v38  ;;  %v4950_v39 = vld [vmem:[%s5033_s11 + $0x1e0] sm:$0xff] }
 0x473   : > { %3320 = vmatpush.msrb.mxu2 %v4239_v59  ;;  %v4646_v50 = vpack.i.bf16 %v4949_v4, %v4950_v39  ;;  %v4155_v59 = vunpack.i.h.bf16 %v6866_v40  ;;  %v7563_v4 = vld [vmem:[#allocation7_spill] sm:$0xff] }
 0x475   : > { %3321 = vmatpush.msrb.mxu2 %v4234_v9  ;;  %v4108_v9 = vunpack.i.h.bf16 %v6841_v23  ;;  %v4024_v23 = vunpack.i.h.bf16 %v6832_v53  ;;  %v7089_v53 = vld [vmem:[%s7255_s2] sm:$0xff] }
 0x476   : > { %4685 = vxpose.xlu1.b32.cont [13/16] (narrow) %v4684_v29, 16  ;;  %v4690_v29 = vpack.i.bf16 %v4952_v45, %v4951_v54  ;;  %3198 = vmatmul.f32.vlgmr.msra.gmra.mxu0 %v7089_v53 }
 0x477   : > { %3322 = vmatpush.msrb.mxu2 %v4197_v51  ;;  %v4955_v51 = vld [vmem:[%s5033_s11 + $0x308] sm:$0xff] }
 0x478   : > { %v4744_v34 = vpack.i.bf16 %v4955_v51, %v4956_v62 }
 0x479   : > { %4727 = vxpose.xlu2.b32.cont [13/16] (narrow) %v4726_v27, 16  ;;  %3323 = vmatpush.msrb.mxu2 %v4192_v7  ;;  %v4732_v27 = vpack.i.bf16 %v4953_v18, %v6693_v31  ;;  %v7071_v40 = vpop.trf.xlu1  ;;  %v4066_v31 = vunpack.i.h.bf16 %v6845_v42  ;;  %v4958_v7 = vld [vmem:[%s5033_s11 + $0x320] sm:$0xff]  ;;  %v7566_v18 = vld [vmem:[#allocation9_spill] sm:$0xff] }
 0x47a   : > { %4643 = vxpose.xlu0.b32.cont [13/16] (narrow) %v4642_v12, 16  ;;  %v4113_v12 = vunpack.i.h.bf16 %v6853_v26  ;;  %v4029_v26 = vunpack.i.h.bf16 %v6843_v49  ;;  %v4959_v49 = vld [vmem:[%s5033_s11 + $0x328] sm:$0xff] }
 0x47b   : > { %3324 = vmatpush.msrb.mxu2 %v6969_v52  ;;  %v4748_v35 = vpack.i.bf16 %v4959_v49, %v4960_v43 }
 0x47d   : > { %3325 = vmatpush.msrb.mxu2 %v6972_v16 }
 0x47e   : > { %4687 = vxpose.xlu1.b32.cont [14/16] (narrow) %v4686_v1, 16  ;;  %v3982_v1 = vunpack.i.h.bf16 %v6816_v14 }
 0x47f   : > { %3326 = vmatpush.msrb.mxu2 %v4155_v59 }
 0x481   : > { %4729 = vxpose.xlu2.b32.cont [14/16] (narrow) %v4728_v56, 16  ;;  %3327 = vmatpush.msrb.mxu2 %v4150_v20  ;;  %v4750_v56 = vpack.i.bf16 %v4960_v43, %v4961_v41  ;;  %v7565_v20 = vld [vmem:[#allocation12_spill] sm:$0xff]  ;;  %v4407_v43 = vunpack.i.h.bf16 %v6913_v58  ;;  %v443_v41 = vld [vmem:[%s5033_s11 + $0x398] sm:$0xff]  ;;  %v4609_v58 = vunpack.i.l.bf16 %v7052_v5 }
 0x482   : > { %4645 = vxpose.xlu0.b32.cont [14/16] (narrow) %v4644_v24, 16  ;;  %v7562_v24 = vld [vmem:[#allocation8_spill] sm:$0xff] }
 0x483   : > { %3328 = vmatpush.msrb.mxu2 %v4113_v12  ;;  %v4752_v13 = vpack.i.bf16 %v7562_v24, %v7561_v21 }
 0x485   : > { %3329 = vmatpush.msrb.mxu2 %v4108_v9 }
 0x486   : > { %4689 = vxpose.xlu1.b32.cont [15/16] (narrow) %v4688_v25, 16 }
 0x487   : > { %3330 = vmatpush.msrb.mxu2 %v4071_v2 }
 0x489   : > { %4731 = vxpose.xlu2.b32.cont [15/16] (narrow) %v4730_v57, 16  ;;  %3331 = vmatpush.msrb.mxu2 %v4066_v31 }
 0x48a   : > { %4647 = vxpose.xlu0.b32.cont [15/16] (narrow) %v4646_v50, 16 }
 0x48b   : > { %3332 = vmatpush.msrb.mxu2 %v4029_v26  ;;  %v4617_v26 = vunpack.i.h.bf16 %v7060_v28 }
 0x48d   : > { %3333 = vmatpush.msrb.mxu2 %v4024_v23  ;;  %v440_v23 = vld [vmem:[%s5033_s11 + $0x380] sm:$0xff] }
 0x48e   : > { %4691 = vxpose.xlu1.b32.end [16/16] (narrow) %v4690_v29, 16  ;;  %v7564_v29 = vld [vmem:[#allocation16_spill] sm:$0xff] }
 0x48f   : > { %3334 = vmatpush.msrb.mxu2 %v3987_v46  ;;  %v4612_v46 = vunpack.i.h.bf16 %v7052_v5  ;;  %v446_v5 = vld [vmem:[%s5033_s11 + $0x3b0] sm:$0xff] }
 0x491   : > { %4733 = vxpose.xlu2.b32.end [16/16] (narrow) %v4732_v27, 16  ;;  %3335 = vmatpush.msrb.mxu2 %v3982_v1  ;;  %v4756_v27 = vpack.i.bf16 %v7566_v18, %v7565_v20  ;;  %v4449_v1 = vunpack.i.h.bf16 %v6983_v55  ;;  %v4614_v55 = vunpack.i.l.bf16 %v7060_v28  ;;  %v4528_v28 = vunpack.i.h.bf16 %v6929_v61 }
 0x492   : > { %4649 = vxpose.xlu0.b32.end [16/16] (narrow) %v4648_v19, 16  ;;  %v4491_v61 = vunpack.i.h.bf16 %v6977_v44  ;;  %v3155_v44 = vld [vmem:[%s7255_s2 + $0x10] sm:$0xff] }
 0x493   : > { %3244 = vmatmul.f32.vlgmr.msra.gmra.mxu2 %v3155_v44 }
 0x496   : > { %3057 = vxpose.xlu1.b32.start [1/16] (narrow) %v6709_v10, 16  ;;  %v4957_v10 = vld [vmem:[%s5033_s11 + $0x318] sm:$0xff] }
 0x497   : > { %v4746_v42 = vpack.i.bf16 %v4956_v62, %v4957_v10  ;;  %v441_v10 = vld [vmem:[%s5033_s11 + $0x388] sm:$0xff] }
 0x49a   : > { %4745 = vxpose.xlu0.b32.start [1/16] (narrow) %v4744_v34, 16 }
 0x49e   : > { %3058 = vxpose.xlu1.b32.cont [2/16] (narrow) %v4955_v51, 16  ;;  %v7567_v51 = vld [vmem:[#allocation17_spill] sm:$0xff] }
 0x49f   : > { %v4758_v62 = vpack.i.bf16 %v7565_v20, %v7567_v51  ;;  %v3163_v51 = vld [vmem:[%s7256_s3] sm:$0xff] }
 0x4a2   : > { %4747 = vxpose.xlu0.b32.cont [2/16] (narrow) %v4746_v42, 16  ;;  %v442_v42 = vld [vmem:[%s5033_s11 + $0x390] sm:$0xff] }
 0x4a6   : > { %3059 = vxpose.xlu1.b32.cont [3/16] (narrow) %v4958_v7, 16  ;;  %v4760_v7 = vpack.i.bf16 %v441_v10, %v442_v42 }
 0x4aa   : > { %4749 = vxpose.xlu0.b32.cont [3/16] (narrow) %v4748_v35, 16  ;;  %v4402_v35 = vunpack.i.h.bf16 %v6902_v15  ;;  %v4533_v15 = vunpack.i.h.bf16 %v6952_v47 }
 0x4ae   : > { %3060 = vxpose.xlu1.b32.cont [4/16] (narrow) %v4959_v49, 16  ;;  %v4444_v49 = vunpack.i.h.bf16 %v6958_v33  ;;  %v4575_v33 = vunpack.i.h.bf16 %v7071_v40 }
 0x4b2   : > { %4751 = vxpose.xlu0.b32.cont [4/16] (narrow) %v4750_v56, 16  ;;  %v7093_v14 = vpop.trf.xlu2  ;;  %v4365_v56 = vunpack.i.h.bf16 %v6931_v3  ;;  %v444_v3 = vld [vmem:[%s5033_s11 + $0x3a0] sm:$0xff] }
 0x4b3   : > { %v4735_v11 = vunpack.i.l.bf16 %v7093_v14  ;;  %v4738_v54 = vunpack.i.h.bf16 %v7093_v14 }
 0x4b6   : > { %3061 = vxpose.xlu1.b32.cont [5/16] (narrow) %v6747_v17, 16  ;;  %v4754_v17 = vpack.i.bf16 %v7561_v21, %v7563_v4  ;;  %v4570_v21 = vunpack.i.h.bf16 %v7062_v8  ;;  %v3156_v4 = vld [vmem:[%s7255_s2 + $0x18] sm:$0xff] }
 0x4ba   : > { %v4692_v30 = vpop.trf.xlu1  ;;  %4753 = vxpose.xlu0.b32.cont [5/16] (narrow) %v4752_v13, 16  ;;  %v7098_v25 = vpop.trf.xlu2  ;;  %v4567_v13 = vunpack.i.l.bf16 %v7062_v8  ;;  %v449_v8 = vld [vmem:[%s5033_s11 + $0x3c8] sm:$0xff] }
 0x4bb   : > { %v4740_v38 = vunpack.i.l.bf16 %v7098_v25  ;;  %v4743_v39 = vunpack.i.h.bf16 %v7098_v25  ;;  %v4696_v32 = vunpack.i.h.bf16 %v4692_v30  ;;  %v4693_v2 = vunpack.i.l.bf16 %v4692_v30 }
 0x4bc   : > { %v4486_v30 = vunpack.i.h.bf16 %v6954_v0  ;;  %v450_v0 = vld [vmem:[%s5033_s11 + $0x3d0] sm:$0xff] }
 0x4bd   : > { %3282 = vmatpush.msrb.mxu0 %v4740_v38 }
 0x4be   : > { %3062 = vxpose.xlu1.b32.cont [6/16] (narrow) %v7562_v24, 16  ;;  %v7105_v57 = vpop.trf.xlu0  ;;  %v445_v24 = vld [vmem:[%s5033_s11 + $0x3a8] sm:$0xff] }
 0x4bf   : > { %3283 = vmatpush.msrb.mxu0 %v4735_v11  ;;  %v4651_v12 = vunpack.i.l.bf16 %v7105_v57  ;;  %v4654_v34 = vunpack.i.h.bf16 %v7105_v57  ;;  %v4764_v47 = vpack.i.bf16 %v445_v24, %v446_v5 }
 0x4c1   : > { %3284 = vmatpush.msrb.mxu0 %v6969_v52 }
 0x4c2   : > { %v4697_v50 = vpop.trf.xlu1  ;;  %4755 = vxpose.xlu0.b32.cont [6/16] (narrow) %v4754_v17, 16  ;;  %v3154_v17 = vld [vmem:[%s7255_s2 + $0x8] sm:$0xff] }
 0x4c3   : > { %3285 = vmatpush.msrb.mxu0 %v6972_v16  ;;  %v4701_v45 = vunpack.i.h.bf16 %v4697_v50  ;;  %v4698_v9 = vunpack.i.l.bf16 %v4697_v50  ;;  %3221 = vmatmul.f32.vlgmr.msra.gmra.mxu1 %v3154_v17  ;;  %v3160_v50 = vld [vmem:[%s7255_s2 + $0x38] sm:$0xff] }
 0x4c4   : > { %3247 = vmatmul.f32.gmra.mxu2 %v3160_v50 }
 0x4c5   : > { %3286 = vmatpush.msrb.mxu0 %v4743_v39 }
 0x4c6   : > { %3063 = vxpose.xlu1.b32.cont [7/16] (narrow) %v7564_v29, 16  ;;  %v4655_v59 = vpop.trf.xlu0  ;;  %v4318_v29 = vunpack.i.h.bf16 %v6919_v36 }
 0x4c7   : > { %3287 = vmatpush.msrb.mxu0 %v4738_v54  ;;  %v4656_v19 = vunpack.i.l.bf16 %v4655_v59  ;;  %v4659_v31 = vunpack.i.h.bf16 %v4655_v59  ;;  %v4281_v59 = vunpack.i.h.bf16 %v6890_v63  ;;  %v3161_v63 = vld [vmem:[%s7255_s2 + $0x40] sm:$0xff] }
 0x4c9   : > { %3253 = vmatpush.msra.mxu3 %v4656_v19  ;;  %3288 = vmatpush.msrb.mxu0 %v4701_v45 }
 0x4ca   : > { %4757 = vxpose.xlu0.b32.cont [7/16] (narrow) %v4756_v27, 16  ;;  %v452_v27 = vld [vmem:[%s5033_s11 + $0x3e0] sm:$0xff] }
 0x4cb   : > { %3254 = vmatpush.msra.mxu3 %v4651_v12  ;;  %3289 = vmatpush.msrb.mxu0 %v4696_v32 }
 0x4cc   : > { %3336 = vmatmul.f32.vlgmr.msrb.gmra.mxu2 %v3154_v17 }
 0x4cd   : > { %3366 = vmatpush.msra.mxu0 %v6969_v52  ;;  %3255 = vmatpush.msra.mxu3 %v4698_v9  ;;  %v3159_v9 = vld [vmem:[%s7255_s2 + $0x30] sm:$0xff] }
 0x4ce   : > { %3064 = vxpose.xlu1.b32.cont [8/16] (narrow) %v7566_v18, 16  ;;  %v4276_v18 = vunpack.i.h.bf16 %v6878_v6  ;;  %v3157_v6 = vld [vmem:[%s7255_s2 + $0x20] sm:$0xff]  ;;  %3224 = vmatmul.f32.gmra.mxu1 %v3159_v9 }
 0x4cf   : > { %3367 = vmatpush.msra.mxu0 %v6972_v16  ;;  %3256 = vmatpush.msra.mxu3 %v4693_v2  ;;  %v3162_v2 = vld [vmem:[%s7255_s2 + $0x48] sm:$0xff] }
 0x4d1   : > { %3368 = vmatpush.msra.mxu0 %v4743_v39  ;;  %3257 = vmatpush.msra.mxu3 %v4659_v31  ;;  %v4768_v39 = vpack.i.bf16 %v449_v8, %v450_v0  ;;  %v4970_v31 = vmov 0  }
 0x4d2   : > { %4759 = vxpose.xlu0.b32.cont [8/16] (narrow) %v4758_v62, 16 }
 0x4d3   : > { %3369 = vmatpush.msra.mxu0 %v4738_v54  ;;  %3258 = vmatpush.msra.mxu3 %v4654_v34  ;;  %v4323_v54 = vunpack.i.h.bf16 %v6937_v48  ;;  %v3164_v34 = vld [vmem:[%s7256_s3 + $0x8] sm:$0xff] }
 0x4d4   : > { %3339 = vmatmul.f32.gmra.mxu2 %v3159_v9 }
 0x4d5   : > { %3370 = vmatpush.msra.mxu0 %v4701_v45  ;;  %3259 = vmatpush.msra.mxu3 %v4617_v26  ;;  %v451_v45 = vld [vmem:[%s5033_s11 + $0x3d8] sm:$0xff] }
 0x4d6   : > { %3065 = vxpose.xlu1.b32.cont [9/16] (narrow) %v440_v23, 16  ;;  %v4770_v20 = vpack.i.bf16 %v450_v0, %v451_v45  ;;  %3313 = vmatmul.f32.vlgmr.msrb.gmra.mxu1 %v7089_v53 }
 0x4d7   : > { %3371 = vmatpush.msra.mxu0 %v4696_v32  ;;  %3260 = vmatpush.msra.mxu3 %v4612_v46  ;;  %v453_v32 = vld [vmem:[%s5033_s11 + $0x3e8] sm:$0xff] }
 0x4d9   : > { %3372 = vmatpush.msra.mxu0 %v6802_v60  ;;  %3261 = vmatpush.msra.mxu3 %v4449_v1  ;;  %v4762_v60 = vpack.i.bf16 %v442_v42, %v443_v41 }
 0x4da   : > { %4761 = vxpose.xlu0.b32.cont [9/16] (narrow) %v4760_v7, 16 }
 0x4db   : > { %3373 = vmatpush.msra.mxu0 %v6810_v22  ;;  %3262 = vmatpush.msra.mxu3 %v4444_v49  ;;  %v4360_v22 = vunpack.i.h.bf16 %v6915_v37  ;;  %v4572_v37 = vunpack.i.l.bf16 %v7071_v40  ;;  %v447_v40 = vld [vmem:[%s5033_s11 + $0x3b8] sm:$0xff] }
 0x4dc   : > { %v4766_v57 = vpack.i.bf16 %v446_v5, %v447_v40 }
 0x4dd   : > { %3374 = vmatpush.msra.mxu0 %v4656_v19  ;;  %3263 = vmatpush.msra.mxu3 %v4407_v43  ;;  %v454_v19 = vld [vmem:[%s5033_s11 + $0x3f0] sm:$0xff] }
 0x4de   : > { %3066 = vxpose.xlu1.b32.cont [10/16] (narrow) %v441_v10, 16  ;;  %v4772_v48 = vpack.i.bf16 %v453_v32, %v454_v19 }
 0x4df   : > { %3375 = vmatpush.msra.mxu0 %v4651_v12  ;;  %3264 = vmatpush.msra.mxu3 %v4402_v35  ;;  %v455_v12 = vld [vmem:[%s5033_s11 + $0x3f8] sm:$0xff] }
 0x4e0   : > { %v4774_v36 = vpack.i.bf16 %v454_v19, %v455_v12  ;;  %v3421_v12 = vld [vmem:[%s7257_s4 + $0x8] sm:$0xff] }
 0x4e1   : > { %3376 = vmatpush.msra.mxu0 %v4614_v55  ;;  %3265 = vmatpush.msra.mxu3 %v4365_v56 }
 0x4e2   : > { %4763 = vxpose.xlu0.b32.cont [10/16] (narrow) %v4762_v60, 16 }
 0x4e3   : > { %3377 = vmatpush.msra.mxu0 %v4609_v58  ;;  %3266 = vmatpush.msra.mxu3 %v4360_v22 }
 0x4e4   : > { %3267 = vmatmul.f32.vlgmr.msra.gmra.mxu3 %v3156_v4 }
 0x4e5   : > { %3343 = vmatpush.msrb.mxu3 %v4533_v15  ;;  %3378 = vmatpush.msra.mxu0 %v4575_v33 }
 0x4e6   : > { %3067 = vxpose.xlu1.b32.cont [11/16] (narrow) %v444_v3, 16 }
 0x4e7   : > { %3344 = vmatpush.msrb.mxu3 %v4528_v28  ;;  %3379 = vmatpush.msra.mxu0 %v4570_v21 }
 0x4e9   : > { %3345 = vmatpush.msrb.mxu3 %v6969_v52  ;;  %3380 = vmatpush.msra.mxu0 %v4572_v37  ;;  %v448_v52 = vld [vmem:[%s5033_s11 + $0x3c0] sm:$0xff] }
 0x4ea   : > { %4765 = vxpose.xlu0.b32.cont [11/16] (narrow) %v4764_v47, 16 }
 0x4eb   : > { %3346 = vmatpush.msrb.mxu3 %v6972_v16  ;;  %3381 = vmatpush.msra.mxu0 %v4567_v13  ;;  %v3158_v16 = vld [vmem:[%s7255_s2 + $0x28] sm:$0xff] }
 0x4ec   : > { %3201 = vmatmul.f32.gmra.mxu0 %v3158_v16  ;;  %3270 = vmatmul.f32.gmra.mxu3 %v3161_v63 }
 0x4ed   : > { %3347 = vmatpush.msrb.mxu3 %v4491_v61  ;;  %3316 = vmatmul.f32.gmra.mxu1 %v3158_v16 }
 0x4ee   : > { %3068 = vxpose.xlu1.b32.cont [12/16] (narrow) %v445_v24, 16 }
 0x4ef   : > { %3348 = vmatpush.msrb.mxu3 %v4486_v30 }
 0x4f1   : > { %3349 = vmatpush.msrb.mxu3 %v4449_v1 }
 0x4f2   : > { %4767 = vxpose.xlu0.b32.cont [12/16] (narrow) %v4766_v57, 16 }
 0x4f3   : > { %3350 = vmatpush.msrb.mxu3 %v4444_v49  ;;  %4786 = vset.pattern.permute.xlu2 %v4970_v31  ;;  %v3199_v7 = vpop.f32.mrf.mxu0 }
 0x4f4   : > { %3590 = vmatmul.msk.f32.vlgmr.msrb.gmra.mxu0 %vm3175_vm5, %v3157_v6 }
 0x4f5   : > { %3351 = vmatpush.msrb.mxu3 %v4407_v43 }
 0x4f6   : > { %3069 = vxpose.xlu1.b32.cont [13/16] (narrow) %v448_v52, 16 }
 0x4f7   : > { %3352 = vmatpush.msrb.mxu3 %v4402_v35 }
 0x4f9   : > { %3353 = vmatpush.msrb.mxu3 %v4365_v56 }
 0x4fa   : > { %4769 = vxpose.xlu0.b32.cont [13/16] (narrow) %v4768_v39, 16  ;;  %3167 = vperm.xlu2 %4786, %v3163_v51  }
 0x4fb   : > { %3354 = vmatpush.msrb.mxu3 %v4360_v22 }
 0x4fc   : > { %3591 = vmatmul.msk.f32.gmra.mxu0 %vm3175_vm5, %v3162_v2 }
 0x4fd   : > { %3355 = vmatpush.msrb.mxu3 %v4323_v54 }
 0x4fe   : > { %3070 = vxpose.xlu1.b32.cont [14/16] (narrow) %v449_v8, 16 }
 0x4ff   : > { %3356 = vmatpush.msrb.mxu3 %v4318_v29 }
 0x501   : > { %3357 = vmatpush.msrb.mxu3 %v4281_v59 }
 0x502   : > { %4771 = vxpose.xlu0.b32.cont [14/16] (narrow) %v4770_v20, 16  ;;  %3172 = vperm.xlu2 %4786, %v3164_v34  }
 0x503   : > { %3358 = vmatpush.msrb.mxu3 %v4276_v18 }
 0x504   : > { %3359 = vmatmul.f32.vlgmr.msrb.gmra.mxu3 %v3155_v44  ;;  %3382 = vmatmul.f32.vlgmr.msra.gmra.mxu0 %v3156_v4 }
 0x506   : > { %3071 = vxpose.xlu1.b32.cont [15/16] (narrow) %v452_v27, 16 }
 0x50a   : > { %4773 = vxpose.xlu0.b32.cont [15/16] (narrow) %v4772_v48, 16  ;;  %v3420_v48 = vld [vmem:[%s7257_s4] sm:$0xff] }
 0x50c   : > { %3362 = vmatmul.f32.gmra.mxu3 %v3160_v50  ;;  %3385 = vmatmul.f32.gmra.mxu0 %v3161_v63 }
 0x50e   : > { %3072 = vxpose.xlu1.b32.end [16/16] (narrow) %v453_v32, 16 }
 0x512   : > { %4775 = vxpose.xlu0.b32.end [16/16] (narrow) %v4774_v36, 16 }
 0x516   : > { %v3245_v35 = vpop.f32.mrf.mxu2 }
 0x53a   : > { %v3073_v26 = vpop.trf.xlu1 }
 0x53e   : > { %v4776_v62 = vpop.trf.xlu0 }
 0x53f   : > { %v4777_v46 = vunpack.i.l.bf16 %v4776_v62  ;;  %v4780_v42 = vunpack.i.h.bf16 %v4776_v62 }
 0x540   : > { %v3222_v49 = vpop.f32.mrf.mxu1 }
 0x542   : > { %v3074_v1 = vpop.trf.xlu1 }
 0x546   : > { %v4781_v23 = vpop.trf.xlu0 }
 0x547   : > { %v4782_v53 = vunpack.i.l.bf16 %v4781_v23  ;;  %v4785_v10 = vunpack.i.h.bf16 %v4781_v23  ;;  %v3248_v60 = vpop.f32.mrf.mxu2 }
 0x549   : > { %3397 = vmatpush.msra.mxu1 %v4782_v53 }
 0x54b   : > { %3398 = vmatpush.msra.mxu1 %v4777_v46  ;;  %v3225_v55 = vpop.f32.mrf.mxu1  ;;  %v3434_v46 = vld [vmem:[#allocation2] sm:$0x1] }
 0x54d   : > { %3399 = vmatpush.msra.mxu1 %v4785_v10 }
 0x54f   : > { %3400 = vmatpush.msra.mxu1 %v4780_v42 }
 0x551   : > { %3401 = vmatpush.msra.mxu1 %v3074_v1 }
 0x553   : > { %3402 = vmatpush.msra.mxu1 %v3073_v26 }
 0x554   : > { %v3168_v58 = vpop.permute.xlu2 %3167 }
 0x555   : > { %3403 = vmatpush.msra.mxu1 %v4740_v38  ;;  %v3314_v38 = vpop.f32.mrf.mxu1  ;;  %v3200_v14 = vadd.f32 %v3199_v7, %v3168_v58  ;;  %v3437_v7 = vld [vmem:[%s7259_s6] sm:$0xff] }
 0x556   : > { %v3315_v15 = vadd.f32 %v3314_v38, %v3168_v58 }
 0x557   : > { %3404 = vmatpush.msra.mxu1 %v4735_v11  ;;  %v3337_v11 = vpop.f32.mrf.mxu2  ;;  %v3223_v33 = vadd.f32 %v3222_v49, %v3200_v14  ;;  %v3438_v49 = vld [vmem:[%s7259_s6 + $0x8] sm:$0xff] }
 0x558   : > { %3592 = vmatmul.msk.f32.vlgmr.msra.gmra.mxu1 %vm3175_vm5, %v3157_v6  ;;  %v3338_v24 = vadd.f32 %v3337_v11, %v3315_v15 }
 0x559   : > { %v3246_v5 = vadd.f32 %v3245_v35, %v3223_v33  ;;  %v3444_v35 = vld [vmem:[%s7260_s7] sm:$0xff] }
 0x55c   : > { %v3173_v28 = vpop.permute.xlu2 %3172 }
 0x55f   : > { %v3340_v30 = vpop.f32.mrf.mxu2 }
 0x560   : > { %3593 = vmatmul.msk.f32.gmra.mxu1 %vm3175_vm5, %v3162_v2 }
 0x561   : > { %4787 = vset.pattern.permute.xlu1 %v4970_v31 }
 0x567   : > { %v3268_v41 = vpop.f32.mrf.mxu3 }
 0x568   : > { %v3269_v40 = vadd.f32 %v3268_v41, %v3246_v5  ;;  %v3445_v41 = vld [vmem:[%s7260_s7 + $0x8] sm:$0xff] }
 0x569   : > { %v3202_v43 = vpop.f32.mrf.mxu0 }
 0x56a   : > { %v3317_v21 = vpop.f32.mrf.mxu1  ;;  %v3203_v37 = vadd.f32 %v3202_v43, %v3173_v28 }
 0x56b   : > { %v3318_v61 = vadd.f32 %v3317_v21, %v3173_v28 }
 0x56c   : > { %v3226_v57 = vadd.f32 %v3225_v55, %v3203_v37 }
 0x56d   : > { %v3341_v52 = vadd.f32 %v3340_v30, %v3318_v61 }
 0x56e   : > { %v3249_v4 = vadd.f32 %v3248_v60, %v3226_v57 }
 0x56f   : > { %v3271_v25 = vpop.f32.mrf.mxu3 }
 0x570   : > { %v3272_v45 = vadd.f32 %v3271_v25, %v3249_v4 }
 0x571   : > { %v3291_v56 = vpop.f32.mrf.mxu0 }
 0x572   : > { %v7209_v0 = vadd.f32 %v3291_v56, %v3269_v40 }
 0x579   : > { %4788 = vset.pattern.permute.xlu0 %v4970_v31  ;;  %v3294_v22 = vpop.f32.mrf.mxu0 }
 0x57a   : > { %v7215_v20 = vadd.f32 %v3294_v22, %v3272_v45  ;;  %v3489_v45 = vld [vmem:[%s322_s9 + $0x18] sm:$0xff] }
 0x581   : > { %v3383_v47 = vpop.f32.mrf.mxu0 }
 0x587   : > { %v3360_v3 = vpop.f32.mrf.mxu3 }
 0x588   : > { %v3361_v13 = vadd.f32 %v3360_v3, %v3338_v24 }
 0x589   : > { %v3386_v54 = vpop.f32.mrf.mxu0 }
 0x58a   : > { %v3384_v8 = vadd.f32 %v3383_v47, %v3361_v13 }
 0x58f   : > { %v3363_v44 = vpop.f32.mrf.mxu3 }
 0x590   : > { %v3364_v39 = vadd.f32 %v3363_v44, %v3341_v52 }
 0x592   : > { %v3387_v29 = vadd.f32 %v3386_v54, %v3364_v39  ;;  %v3488_v54 = vld [vmem:[%s322_s9 + $0x10] sm:$0xff] }
 0x5d5   : > { %v3406_v16 = vpop.f32.mrf.mxu1 }
 0x5d6   : > { %v7211_v17 = vadd.f32 %v3406_v16, %v3384_v8 }
 0x5d8   : > { %v3412_v50 = vadd.f32 %v7211_v17, %v7209_v0 }
 0x5da   : > { %3413 = vadd.xlane.f32.xlu2 %v3412_v50 }
 0x5dd   : > { %v3409_v59 = vpop.f32.mrf.mxu1 }
 0x5de   : > { %v7217_v18 = vadd.f32 %v3409_v59, %v3387_v29 }
 0x5e0   : > { %v3415_v27 = vadd.f32 %v7217_v18, %v7215_v20 }
 0x5e2   : > { %3416 = vadd.xlane.f32.xlu0 %v3415_v27 }
 0x64d   : > { %v3414_v32 = vpop.xlane.xlu2 %3413 }
 0x64e   : > { %v3418_v19 = vmul.f32 0.00390625, %v3414_v32 }
 0x650   : > { %v3422_v63 = vmul.f32 %v3420_v48, %v3418_v19  ;;  %v3486_v48 = vld [vmem:[%s322_s9] sm:$0xff] }
 0x652   : > { %v3425_v2 = vsel %vm3424_vm6, %v3422_v63, 0.0 }
 0x655   : > { %v3417_v36 = vpop.xlane.xlu0 %3416 }
 0x656   : > { %v3419_v6 = vmul.f32 0.00390625, %v3417_v36 }
 0x658   : > { %v3423_v9 = vmul.f32 %v3421_v12, %v3419_v6  ;;  %v3487_v12 = vld [vmem:[%s322_s9 + $0x8] sm:$0xff] }
 0x65a   : > { %v3426_v31 = vsel %vm3424_vm6, %v3423_v9, 0.0 }
 0x65b   : > { %v3427_v51 = vadd.f32 %v3426_v31, %v3425_v2 }
 0x65d   : > { %v3428_v62 = vrot.slane %v3427_v51, 4 }
 0x65f   : > { %v3429_v34 = vadd.f32 %v3428_v62, %v3427_v51 }
 0x661   : > { %v3430_v26 = vrot.slane %v3429_v34, 2 }
 0x663   : > { %v3431_v23 = vadd.f32 %v3430_v26, %v3429_v34 }
 0x665   : > { %v3432_v53 = vrot.slane %v3431_v23, 1 }
 0x667   : > { %v3433_v10 = vadd.f32 %v3432_v53, %v3431_v23 }
 0x669   : > { %v3435_v42 = vadd.f32 %v3434_v46, %v3433_v10 }
 0x66b   : > { %v3436_v1 = vmax.f32 %v3435_v42, 0.0 }
 0x66d   : > { %v3439_v43 = vperm.slane %v3436_v1, 0 }
 0x66f   : > { %v3440_v55 = vmul.f32 %v3439_v43, %v3437_v7  ;;  %v3441_v56 = vmul.f32 %v3439_v43, %v3438_v49 }
 0x671   : > { %v3446_v60 = vadd.f32 %v3444_v35, %v3440_v55  ;;  %v3447_v58 = vadd.f32 %v3445_v41, %v3441_v56 }
 0x673   : > { %v3594_v25 = vmul.f32 -1.442695, %v3446_v60  ;;  %v3595_v38 = vmul.f32 -1.442695, %v3447_v58 }
 0x675   : > { %4789 = vpow2.f32 %v3595_v38 }
 0x676   : > { %4791 = vpow2.f32 %v3594_v25 }
 0x67b   : > { %v4790_v22 = vpop.eup %4789 }
 0x67c   : > { %v4792_v14 = vpop.eup %4791  ;;  %v3455_v11 = vadd.f32 1.0, %v4790_v22 }
 0x67d   : > { %v3454_v15 = vadd.f32 1.0, %v4792_v14 }
 0x67e   : > { %4793 = vrcp.f32 %v3455_v11  ;;  %v3482_v5 = vand.u32 2147483648, %v3455_v11  ;;  %v3480_v13 = vand.u32 2147483647, %v3455_v11  ;;  %vm3476_vm9 = vweird.f32 %v3455_v11 }
 0x67f   : > { %4795 = vrcp.f32 %v3454_v15  ;;  %v3467_v61 = vand.u32 2147483648, %v3454_v15  ;;  %v3465_v40 = vand.u32 2147483647, %v3454_v15  ;;  %vm3461_vm11 = vweird.f32 %v3454_v15 }
 0x680   : > { %v3483_v8 = vor.u32 1.1754944e-38, %v3482_v5  ;;  %vm3481_vm12 = vcmp.eq.f32.partialorder %v3480_v13, 8.507059e+37 }
 0x681   : > { %v3468_v16 = vor.u32 1.1754944e-38, %v3467_v61  ;;  %vm3466_vm14 = vcmp.eq.f32.partialorder %v3465_v40, 8.507059e+37 }
 0x684   : > { %v4794_v33 = vpop.eup %4793 }
 0x685   : > { %v4796_v28 = vpop.eup %4795  ;;  %v3472_v3 = vmul.f32 %v4794_v33, %v3455_v11  ;;  %vm3477_vm7 = vweird.f32 %v4794_v33 }
 0x686   : > { %v3457_v21 = vmul.f32 %v4796_v28, %v3454_v15  ;;  %vm3462_vm8 = vweird.f32 %v4796_v28  ;;  %vm3478_vm10 = vmor %vm3476_vm9, %vm3477_vm7 }
 0x687   : > { %v3473_v24 = vsub.f32 1.0, %v3472_v3  ;;  %vm3463_vm13 = vmor %vm3461_vm11, %vm3462_vm8 }
 0x688   : > { %v3458_v37 = vsub.f32 1.0, %v3457_v21 }
 0x689   : > { %v3474_v47 = vmul.f32 %v4794_v33, %v3473_v24 }
 0x68a   : > { %v3459_v30 = vmul.f32 %v4796_v28, %v3458_v37 }
 0x68b   : > { %v3475_v57 = vadd.f32 %v4794_v33, %v3474_v47 }
 0x68c   : > { %v3460_v52 = vadd.f32 %v4796_v28, %v3459_v30 }
 0x68d   : > { %v3479_v44 = vsel %vm3478_vm10, %v4794_v33, %v3475_v57 }
 0x68e   : > { %v3484_v4 = vsel %vm3481_vm12, %v3483_v8, %v3479_v44  ;;  %v3464_v39 = vsel %vm3463_vm13, %v4796_v28, %v3460_v52 }
 0x68f   : > { %3497 = vperm.xlu2 %4786, %v3484_v4   ;;  %v3469_v50 = vsel %vm3466_vm14, %v3468_v16, %v3464_v39 }
 0x690   : > { %3492 = vperm.xlu1 %4787, %v3469_v50  }
 0x6e9   : > { %v3498_v29 = vpop.permute.xlu2 %3497 }
 0x6ea   : > { %v3502_v59 = vmul.f32 %v3498_v29, %v7215_v20  ;;  %v3503_v27 = vmul.f32 %v3498_v29, %v7217_v18 }
 0x6ec   : > { %v3506_v32 = vadd.f32 %v3502_v59, %v3488_v54  ;;  %v3507_v19 = vadd.f32 %v3503_v27, %v3489_v45 }
 0x6ee   : > { %3510 = vst [vmem:[%s327_s12 + $0x10] sm:$0xff] %v3506_v32 }
 0x6ef   : > { %3511 = vst [vmem:[%s327_s12 + $0x18] sm:$0xff] %v3507_v19 }
 0x702   : > { %v3493_v36 = vpop.permute.xlu1 %3492 }
 0x703   : > { %v3500_v63 = vmul.f32 %v3493_v36, %v7209_v0  ;;  %v3501_v6 = vmul.f32 %v3493_v36, %v7211_v17 }
 0x705   : > { %v3504_v9 = vadd.f32 %v3500_v63, %v3486_v48  ;;  %v3505_v2 = vadd.f32 %v3501_v6, %v3487_v12 }
 0x707   : > { %3508 = vst [vmem:[%s327_s12] sm:$0xff] %v3504_v9 }
 0x708   : > { %3509 = vst [vmem:[%s327_s12 + $0x8] sm:$0xff] %v3505_v2 }
 0x709 PF: > { %s20_s29 = sadd.s32 1, %s4968_s29  }
 0x70a   : > { %p17_p4 = scmp.ge.s32.totalorder %s20_s29, 4  }
 0x70c   :  { %19 = sbr.rel (!%p17_p4) target bundleno = 3 (0x3), region = 85 }

</bundles_post_ra>
